<compile_context>
chip_gen: v6e
topology: v6e:2x2x1
jax: 0.10.0
libtpu: 0.0.40
codegen_flags: <defaults>
</compile_context>

<pallas_src>
import functools

import jax
import jax.numpy as jnp
from jax.experimental import pallas as pl
from jax.experimental.pallas import tpu as pltpu

_VMEM_LIMIT = 48 * 1024 * 1024  # fits v7x (64 MiB physical); plenty on v5e/v6e


# ------------------------------ Pallas kernel -------------------------------


def _bottleneck_kernel(x_ref, w1_ref, b1_ref, w2_ref, b2_ref, w3_ref, b3_ref,
                       o_ref, xp_ref, *, h, w, planes):
    """Full Bottleneck residual block for one batch element, resident in VMEM.

    x_ref : (1, H*W, Cin)         f32 input rows (also the identity residual)
    w1_ref: (Cin, planes)         bf16, BN1 scale folded
    w2_ref: (3, 3*planes, planes) bf16, ky-major, kx packed along K, BN2 folded
    w3_ref: (planes, Cout)        bf16, BN3 scale folded
    b*_ref: (1, C)                f32 folded BN biases
    o_ref : (1, H*W, Cout)        output rows
    xp_ref: (H+2, W+2, planes)    VMEM scratch: zero-padded conv1 output
    """
    cd = w1_ref.dtype  # bf16 compute dtype for MXU inputs

    # ---- conv1 (1x1) + bn1 + relu ------------------------------------------
    x32 = x_ref[0]                                             # (H*W, Cin) f32
    c1 = jnp.dot(x32.astype(cd), w1_ref[...],
                 preferred_element_type=jnp.float32)
    c1 = jnp.maximum(c1 + b1_ref[...], 0.0).astype(cd)         # (H*W, planes)

    # ---- conv2 (3x3, stride 1, pad 1) + bn2 + relu --------------------------
    # Zero-padded conv1 output lives only in VMEM (no HBM pad pass).
    xp_ref[...] = jnp.zeros_like(xp_ref)
    xp_ref[1:h + 1, 1:w + 1, :] = c1.reshape(h, w, planes)
    # Pack the 3 kx taps along K once (3 window loads), then 3 MXU dots with
    # K = 3*planes -- better K occupancy than 9 dots with K = planes.
    p = jnp.concatenate(
        [xp_ref[:, 0:w, :], xp_ref[:, 1:w + 1, :], xp_ref[:, 2:w + 2, :]],
        axis=-1)                                               # (H+2, W, 3*planes)
    acc = jnp.zeros((h * w, planes), jnp.float32)
    for ky in range(3):
        patch = p[ky:ky + h].reshape(h * w, 3 * planes)
        acc = acc + jnp.dot(patch, w2_ref[ky],
                            preferred_element_type=jnp.float32)
    c2 = jnp.maximum(acc + b2_ref[...], 0.0).astype(cd)        # (H*W, planes)

    # ---- conv3 (1x1) + bn3 + identity residual + relu -----------------------
    out = jnp.dot(c2, w3_ref[...], preferred_element_type=jnp.float32)
    out = out + b3_ref[...] + x32                              # f32 residual
    o_ref[0] = jnp.maximum(out, 0.0).astype(o_ref.dtype)


# ------------------------------- glue (JAX) ---------------------------------


def _fold_bn(gamma, beta, mean, var, eps=1e-5):
    scale = gamma / jnp.sqrt(var + eps)
    bias = beta - mean * scale
    return scale, bias


def init_params(key, inplanes, planes, expansion=4, dtype=jnp.float32):
    """Deterministic synthetic parameters matching the PyTorch module shapes."""
    keys = jax.random.split(key, 6)

    def conv_w(k, cout, cin, ksz):
        fan = cin * ksz * ksz
        return jax.random.normal(k, (cout, cin, ksz, ksz), dtype) * (2.0 / fan) ** 0.5

    def bn_p(k, c):
        k1, k2, k3, k4 = jax.random.split(k, 4)
        gamma = jax.random.uniform(k1, (c,), dtype, 0.5, 1.5)
        beta = jax.random.normal(k2, (c,), dtype) * 0.1
        mean = jax.random.normal(k3, (c,), dtype) * 0.1
        var = jax.random.uniform(k4, (c,), dtype, 0.5, 1.5)
        return gamma, beta, mean, var

    return {
        "conv1_w": conv_w(keys[0], planes, inplanes, 1),
        "bn1": bn_p(keys[1], planes),
        "conv2_w": conv_w(keys[2], planes, planes, 3),
        "bn2": bn_p(keys[3], planes),
        "conv3_w": conv_w(keys[4], planes * expansion, planes, 1),
        "bn3": bn_p(keys[5], planes * expansion),
    }


def bottleneck_forward_nhwc(x, params, *, stride=1, compute_dtype=jnp.bfloat16,
                            out_dtype=jnp.float32):
    """Pallas Bottleneck.forward, NHWC in / NHWC out (downsample=None path)."""
    # TODO(synk): `downsample` is an externally supplied module; only the
    # downsample=None configuration (identity residual, stride=1) is covered.
    if stride != 1:
        raise NotImplementedError("stride > 1 requires the downsample branch")
    n, h, w, cin = x.shape
    cd = compute_dtype

    s1, b1 = _fold_bn(*params["bn1"])
    s2, b2 = _fold_bn(*params["bn2"])
    s3, b3 = _fold_bn(*params["bn3"])

    w1 = params["conv1_w"]                                    # (planes, Cin, 1, 1) OIHW
    planes = w1.shape[0]
    w3 = params["conv3_w"]                                    # (Cout, planes, 1, 1)
    cout = w3.shape[0]
    assert cout == cin, "identity residual requires Cout == Cin (downsample=None)"

    # Fold BN scales into bf16 weights (bias stays f32 for the epilogue).
    w1m = (w1.reshape(planes, cin).T * s1[None, :]).astype(cd)             # (Cin, planes)
    w2m = (jnp.transpose(params["conv2_w"], (2, 3, 1, 0))                  # (ky, kx, Ci, Co)
           .reshape(3, 3 * planes, planes) * s2[None, None, :]).astype(cd) # (3, 3*planes, planes)
    w3m = (w3.reshape(cout, planes).T * s3[None, :]).astype(cd)            # (planes, Cout)
    b1 = b1.reshape(1, planes).astype(jnp.float32)
    b2 = b2.reshape(1, planes).astype(jnp.float32)
    b3 = b3.reshape(1, cout).astype(jnp.float32)

    xr = x.reshape(n, h * w, cin).astype(jnp.float32)  # free reshape, f32 residual

    out = pl.pallas_call(
        functools.partial(_bottleneck_kernel, h=h, w=w, planes=planes),
        out_shape=jax.ShapeDtypeStruct((n, h * w, cout), out_dtype),
        grid=(n,),
        in_specs=[
            pl.BlockSpec((1, h * w, cin), lambda b: (b, 0, 0)),
            pl.BlockSpec((cin, planes), lambda b: (0, 0)),
            pl.BlockSpec((1, planes), lambda b: (0, 0)),
            pl.BlockSpec((3, 3 * planes, planes), lambda b: (0, 0, 0)),
            pl.BlockSpec((1, planes), lambda b: (0, 0)),
            pl.BlockSpec((planes, cout), lambda b: (0, 0)),
            pl.BlockSpec((1, cout), lambda b: (0, 0)),
        ],
        out_specs=pl.BlockSpec((1, h * w, cout), lambda b: (b, 0, 0)),
        scratch_shapes=[pltpu.VMEM((h + 2, w + 2, planes), cd)],
        compiler_params=pltpu.CompilerParams(
            dimension_semantics=("parallel",),   # batch >= 2 keeps both v7x TCs busy
            vmem_limit_bytes=_VMEM_LIMIT,
        ),
    )(xr, w1m, b1, w2m, b2, w3m, b3)
    return out.reshape(n, h, w, cout)


def bottleneck_forward(x_nchw, params, *, stride=1, compute_dtype=jnp.bfloat16):
    """NCHW wrapper matching the PyTorch module layout.

    Prefer bottleneck_forward_nhwc when stacking blocks: it avoids these two
    boundary transposes (the core never changes layout internally).
    """
    x = jnp.transpose(x_nchw, (0, 2, 3, 1))
    y = bottleneck_forward_nhwc(x, params, stride=stride, compute_dtype=compute_dtype)
    return jnp.transpose(y, (0, 3, 1, 2))


# TODO(synk): ResNet stem (7x7 conv stride 2, avg-pools), BasicBlock, the
# downsample branch (stride-2 / channel-expanding blocks), and the FC head are
# outside this block-level kernel's scope.


# ------------------------- pure-JAX reference check -------------------------


def _ref_forward_nhwc(x, params, compute_dtype=jnp.bfloat16):
    """Precision-matched reference: same bf16-operand / f32-accumulate policy."""
    cd = compute_dtype

    def conv_bn(inp, w_oihw, bn, pad, relu):
        scale, bias = _fold_bn(*bn)
        w_hwio = jnp.transpose(w_oihw, (2, 3, 1, 0)) * scale.reshape(1, 1, 1, -1)
        y = jax.lax.conv_general_dilated(
            inp.astype(cd), w_hwio.astype(cd), (1, 1), [(pad, pad), (pad, pad)],
            dimension_numbers=("NHWC", "HWIO", "NHWC"),
            preferred_element_type=jnp.float32)
        y = y + bias.reshape(1, 1, 1, -1)
        return jnp.maximum(y, 0.0) if relu else y

    o = conv_bn(x, params["conv1_w"], params["bn1"], 0, True).astype(cd)
    o = conv_bn(o, params["conv2_w"], params["bn2"], 1, True).astype(cd)
    o = conv_bn(o, params["conv3_w"], params["bn3"], 0, False)
    o = o + x.astype(jnp.float32)
    return jnp.maximum(o, 0.0)


# ---------------------------------- main -------------------------------------

if __name__ == "__main__":
    key = jax.random.PRNGKey(0)
    k_x, k_p = jax.random.split(key)

    # Small, layout-sane config (ResNet layer1 geometry scaled down):
    # planes=64 -> conv3 output is 256 channels (lane-dense), inplanes=4*planes
    # so the identity residual path is valid.
    batch, planes, expansion, spatial = 2, 64, 4, 16
    inplanes = planes * expansion  # 256

    x = jax.random.normal(k_x, (batch, inplanes, spatial, spatial), jnp.float32)
    params = init_params(k_p, inplanes, planes, expansion)

    fwd = jax.jit(bottleneck_forward)
    out = jax.block_until_ready(fwd(x, params))

    x_nhwc = jnp.transpose(x, (0, 2, 3, 1))
    ref = _ref_forward_nhwc(x_nhwc, params, jnp.bfloat16)
    ref = jax.block_until_ready(jnp.transpose(ref, (0, 3, 1, 2)))

    assert out.shape == (batch, inplanes, spatial, spatial)
    assert out.dtype == jnp.float32
    max_err = float(jnp.max(jnp.abs(out - ref)))
    assert jnp.allclose(out, ref, rtol=1e-3, atol=1e-3), f"mismatch vs reference, max_err={max_err}"

    print("KERNEL_OK")
</pallas_src>

<mosaic_0001>
module attributes {stable_mosaic.version = 11 : i64} {
  func.func @_bottleneck_kernel(%arg0: i32, %arg1: memref<1x256x256xf32, #tpu.memory_space<vmem>>, %arg2: memref<256x64xbf16, #tpu.memory_space<vmem>>, %arg3: memref<1x64xf32, #tpu.memory_space<vmem>>, %arg4: memref<3x192x64xbf16, #tpu.memory_space<vmem>>, %arg5: memref<1x64xf32, #tpu.memory_space<vmem>>, %arg6: memref<64x256xbf16, #tpu.memory_space<vmem>>, %arg7: memref<1x256xf32, #tpu.memory_space<vmem>>, %arg8: memref<1x256x256xf32, #tpu.memory_space<vmem>>, %arg9: memref<18x18x64xbf16, #tpu.memory_space<vmem>>) attributes {dimension_semantics = [#tpu.dimension_semantics<parallel>], iteration_bounds = array<i64: 2>, scalar_prefetch = 0 : i64, scratch_operands = 1 : i64, tpu.core_type = #tpu.core_type<tc>, window_params = [{transform_indices = @transform_0, window_bounds = array<i64: 1, 256, 256>}, {pipeline_mode = #tpu.pipeline_mode<synchronous>, transform_indices = @transform_1, window_bounds = array<i64: 256, 64>}, {pipeline_mode = #tpu.pipeline_mode<synchronous>, transform_indices = @transform_2, window_bounds = array<i64: 1, 64>}, {pipeline_mode = #tpu.pipeline_mode<synchronous>, transform_indices = @transform_3, window_bounds = array<i64: 3, 192, 64>}, {pipeline_mode = #tpu.pipeline_mode<synchronous>, transform_indices = @transform_4, window_bounds = array<i64: 1, 64>}, {pipeline_mode = #tpu.pipeline_mode<synchronous>, transform_indices = @transform_5, window_bounds = array<i64: 64, 256>}, {pipeline_mode = #tpu.pipeline_mode<synchronous>, transform_indices = @transform_6, window_bounds = array<i64: 1, 256>}, {transform_indices = @transform_7, window_bounds = array<i64: 1, 256, 256>}]} {
    %c0 = arith.constant 0 : index
    %c0_0 = arith.constant 0 : index
    %c0_1 = arith.constant 0 : index
    %0 = vector.load %arg1[%c0, %c0_0, %c0_1] : memref<1x256x256xf32, #tpu.memory_space<vmem>>, vector<1x256x256xf32>
    %1 = vector.shape_cast %0 : vector<1x256x256xf32> to vector<256x256xf32>
    %2 = arith.truncf %1 : vector<256x256xf32> to vector<256x256xbf16>
    %c0_2 = arith.constant 0 : index
    %c0_3 = arith.constant 0 : index
    %3 = vector.load %arg2[%c0_2, %c0_3] : memref<256x64xbf16, #tpu.memory_space<vmem>>, vector<256x64xbf16>
    %cst = arith.constant dense<0.000000e+00> : vector<256x64xf32>
    %4 = tpu.matmul %2, %3, %cst {dimension_numbers = #tpu.dot_dimension_numbers<[1], [0], [0], [1], [0, 0, 1, 1], [], []>} : vector<256x256xbf16>, vector<256x64xbf16>, vector<256x64xf32> -> vector<256x64xf32>
    %c0_4 = arith.constant 0 : index
    %c0_5 = arith.constant 0 : index
    %5 = vector.load %arg3[%c0_4, %c0_5] : memref<1x64xf32, #tpu.memory_space<vmem>>, vector<1x64xf32>
    %6 = vector.broadcast %5 : vector<1x64xf32> to vector<256x64xf32>
    %7 = arith.addf %4, %6 : vector<256x64xf32>
    %cst_6 = arith.constant 0.000000e+00 : f32
    %8 = vector.broadcast %cst_6 : f32 to vector<256x64xf32>
    %9 = arith.maximumf %7, %8 : vector<256x64xf32>
    %10 = arith.truncf %9 : vector<256x64xf32> to vector<256x64xbf16>
    %cst_7 = arith.constant 0.000000e+00 : bf16
    %11 = vector.broadcast %cst_7 : bf16 to vector<18x18x64xbf16>
    %c0_8 = arith.constant 0 : index
    %c0_9 = arith.constant 0 : index
    %c0_10 = arith.constant 0 : index
    %12 = vector.load %arg9[%c0_8, %c0_9, %c0_10] : memref<18x18x64xbf16, #tpu.memory_space<vmem>>, vector<18x18x64xbf16>
    tpu.vector_store %arg9[%c0_8, %c0_9, %c0_10], %11 {strides = array<i32>} : memref<18x18x64xbf16, #tpu.memory_space<vmem>>, vector<18x18x64xbf16>,
    %13 = vector.shape_cast %10 : vector<256x64xbf16> to vector<16x16x64xbf16>
    %c1 = arith.constant 1 : index
    %c1_11 = arith.constant 1 : index
    %c0_12 = arith.constant 0 : index
    %14 = vector.load %arg9[%c1, %c1_11, %c0_12] : memref<18x18x64xbf16, #tpu.memory_space<vmem>>, vector<16x16x64xbf16>
    tpu.vector_store %arg9[%c1, %c1_11, %c0_12], %13 {strides = array<i32>} : memref<18x18x64xbf16, #tpu.memory_space<vmem>>, vector<16x16x64xbf16>,
    %c0_13 = arith.constant 0 : index
    %c0_14 = arith.constant 0 : index
    %c0_15 = arith.constant 0 : index
    %15 = vector.load %arg9[%c0_13, %c0_14, %c0_15] : memref<18x18x64xbf16, #tpu.memory_space<vmem>>, vector<18x16x64xbf16>
    %c0_16 = arith.constant 0 : index
    %c1_17 = arith.constant 1 : index
    %c0_18 = arith.constant 0 : index
    %16 = vector.load %arg9[%c0_16, %c1_17, %c0_18] : memref<18x18x64xbf16, #tpu.memory_space<vmem>>, vector<18x16x64xbf16>
    %c0_19 = arith.constant 0 : index
    %c2 = arith.constant 2 : index
    %c0_20 = arith.constant 0 : index
    %17 = vector.load %arg9[%c0_19, %c2, %c0_20] : memref<18x18x64xbf16, #tpu.memory_space<vmem>>, vector<18x16x64xbf16>
    %18 = tpu.concatenate %15, %16, %17 in 2 : vector<18x16x64xbf16>, vector<18x16x64xbf16>, vector<18x16x64xbf16> -> vector<18x16x192xbf16>
    %cst_21 = arith.constant 0.000000e+00 : f32
    %19 = vector.broadcast %cst_21 : f32 to vector<256x64xf32>
    %20 = vector.extract_strided_slice %18 {offsets = [0, 0, 0], sizes = [16, 16, 192], strides = [1, 1, 1]} : vector<18x16x192xbf16> to vector<16x16x192xbf16>
    %21 = vector.shape_cast %20 : vector<16x16x192xbf16> to vector<256x192xbf16>
    %c0_22 = arith.constant 0 : index
    %c0_23 = arith.constant 0 : index
    %c0_24 = arith.constant 0 : index
    %22 = vector.load %arg4[%c0_22, %c0_23, %c0_24] : memref<3x192x64xbf16, #tpu.memory_space<vmem>>, vector<1x192x64xbf16>
    %23 = vector.shape_cast %22 : vector<1x192x64xbf16> to vector<192x64xbf16>
    %cst_25 = arith.constant dense<0.000000e+00> : vector<256x64xf32>
    %24 = tpu.matmul %21, %23, %cst_25 {dimension_numbers = #tpu.dot_dimension_numbers<[1], [0], [0], [1], [0, 0, 1, 1], [], []>} : vector<256x192xbf16>, vector<192x64xbf16>, vector<256x64xf32> -> vector<256x64xf32>
    %25 = arith.addf %19, %24 : vector<256x64xf32>
    %26 = vector.extract_strided_slice %18 {offsets = [1, 0, 0], sizes = [16, 16, 192], strides = [1, 1, 1]} : vector<18x16x192xbf16> to vector<16x16x192xbf16>
    %27 = vector.shape_cast %26 : vector<16x16x192xbf16> to vector<256x192xbf16>
    %c1_26 = arith.constant 1 : index
    %c0_27 = arith.constant 0 : index
    %c0_28 = arith.constant 0 : index
    %28 = vector.load %arg4[%c1_26, %c0_27, %c0_28] : memref<3x192x64xbf16, #tpu.memory_space<vmem>>, vector<1x192x64xbf16>
    %29 = vector.shape_cast %28 : vector<1x192x64xbf16> to vector<192x64xbf16>
    %cst_29 = arith.constant dense<0.000000e+00> : vector<256x64xf32>
    %30 = tpu.matmul %27, %29, %cst_29 {dimension_numbers = #tpu.dot_dimension_numbers<[1], [0], [0], [1], [0, 0, 1, 1], [], []>} : vector<256x192xbf16>, vector<192x64xbf16>, vector<256x64xf32> -> vector<256x64xf32>
    %31 = arith.addf %25, %30 : vector<256x64xf32>
    %32 = vector.extract_strided_slice %18 {offsets = [2, 0, 0], sizes = [16, 16, 192], strides = [1, 1, 1]} : vector<18x16x192xbf16> to vector<16x16x192xbf16>
    %33 = vector.shape_cast %32 : vector<16x16x192xbf16> to vector<256x192xbf16>
    %c2_30 = arith.constant 2 : index
    %c0_31 = arith.constant 0 : index
    %c0_32 = arith.constant 0 : index
    %34 = vector.load %arg4[%c2_30, %c0_31, %c0_32] : memref<3x192x64xbf16, #tpu.memory_space<vmem>>, vector<1x192x64xbf16>
    %35 = vector.shape_cast %34 : vector<1x192x64xbf16> to vector<192x64xbf16>
    %cst_33 = arith.constant dense<0.000000e+00> : vector<256x64xf32>
    %36 = tpu.matmul %33, %35, %cst_33 {dimension_numbers = #tpu.dot_dimension_numbers<[1], [0], [0], [1], [0, 0, 1, 1], [], []>} : vector<256x192xbf16>, vector<192x64xbf16>, vector<256x64xf32> -> vector<256x64xf32>
    %37 = arith.addf %31, %36 : vector<256x64xf32>
    %c0_34 = arith.constant 0 : index
    %c0_35 = arith.constant 0 : index
    %38 = vector.load %arg5[%c0_34, %c0_35] : memref<1x64xf32, #tpu.memory_space<vmem>>, vector<1x64xf32>
    %39 = vector.broadcast %38 : vector<1x64xf32> to vector<256x64xf32>
    %40 = arith.addf %37, %39 : vector<256x64xf32>
    %cst_36 = arith.constant 0.000000e+00 : f32
    %41 = vector.broadcast %cst_36 : f32 to vector<256x64xf32>
    %42 = arith.maximumf %40, %41 : vector<256x64xf32>
    %43 = arith.truncf %42 : vector<256x64xf32> to vector<256x64xbf16>
    %c0_37 = arith.constant 0 : index
    %c0_38 = arith.constant 0 : index
    %44 = vector.load %arg6[%c0_37, %c0_38] : memref<64x256xbf16, #tpu.memory_space<vmem>>, vector<64x256xbf16>
    %cst_39 = arith.constant dense<0.000000e+00> : vector<256x256xf32>
    %45 = tpu.matmul %43, %44, %cst_39 {dimension_numbers = #tpu.dot_dimension_numbers<[1], [0], [0], [1], [0, 0, 1, 1], [], []>} : vector<256x64xbf16>, vector<64x256xbf16>, vector<256x256xf32> -> vector<256x256xf32>
    %c0_40 = arith.constant 0 : index
    %c0_41 = arith.constant 0 : index
    %46 = vector.load %arg7[%c0_40, %c0_41] : memref<1x256xf32, #tpu.memory_space<vmem>>, vector<1x256xf32>
    %47 = vector.broadcast %46 : vector<1x256xf32> to vector<256x256xf32>
    %48 = arith.addf %45, %47 : vector<256x256xf32>
    %49 = arith.addf %48, %1 : vector<256x256xf32>
    %cst_42 = arith.constant 0.000000e+00 : f32
    %50 = vector.broadcast %cst_42 : f32 to vector<256x256xf32>
    %51 = arith.maximumf %49, %50 : vector<256x256xf32>
    %c0_43 = arith.constant 0 : index
    %c0_44 = arith.constant 0 : index
    %c0_45 = arith.constant 0 : index
    %52 = vector.load %arg8[%c0_43, %c0_44, %c0_45] : memref<1x256x256xf32, #tpu.memory_space<vmem>>, vector<1x256x256xf32>
    %53 = vector.shape_cast %52 : vector<1x256x256xf32> to vector<256x256xf32>
    %54 = vector.shape_cast %51 : vector<256x256xf32> to vector<1x256x256xf32>
    tpu.vector_store %arg8[%c0_43, %c0_44, %c0_45], %54 {strides = array<i32>} : memref<1x256x256xf32, #tpu.memory_space<vmem>>, vector<1x256x256xf32>,
    return
  }
  func.func @transform_0(%arg0: i32) -> (i32, i32, i32) {
    %c0_i32 = arith.constant 0 : i32
    %c0_i32_0 = arith.constant 0 : i32
    %c0_i32_1 = arith.constant 0 : i32
    return %arg0, %c0_i32, %c0_i32_0 : i32, i32, i32
  }
  func.func @transform_1(%arg0: i32) -> (i32, i32) {
    %c0_i32 = arith.constant 0 : i32
    %c0_i32_0 = arith.constant 0 : i32
    %c0_i32_1 = arith.constant 0 : i32
    return %c0_i32, %c0_i32_0 : i32, i32
  }
  func.func @transform_2(%arg0: i32) -> (i32, i32) {
    %c0_i32 = arith.constant 0 : i32
    %c0_i32_0 = arith.constant 0 : i32
    %c0_i32_1 = arith.constant 0 : i32
    return %c0_i32, %c0_i32_0 : i32, i32
  }
  func.func @transform_3(%arg0: i32) -> (i32, i32, i32) {
    %c0_i32 = arith.constant 0 : i32
    %c0_i32_0 = arith.constant 0 : i32
    %c0_i32_1 = arith.constant 0 : i32
    %c0_i32_2 = arith.constant 0 : i32
    return %c0_i32, %c0_i32_0, %c0_i32_1 : i32, i32, i32
  }
  func.func @transform_4(%arg0: i32) -> (i32, i32) {
    %c0_i32 = arith.constant 0 : i32
    %c0_i32_0 = arith.constant 0 : i32
    %c0_i32_1 = arith.constant 0 : i32
    return %c0_i32, %c0_i32_0 : i32, i32
  }
  func.func @transform_5(%arg0: i32) -> (i32, i32) {
    %c0_i32 = arith.constant 0 : i32
    %c0_i32_0 = arith.constant 0 : i32
    %c0_i32_1 = arith.constant 0 : i32
    return %c0_i32, %c0_i32_0 : i32, i32
  }
  func.func @transform_6(%arg0: i32) -> (i32, i32) {
    %c0_i32 = arith.constant 0 : i32
    %c0_i32_0 = arith.constant 0 : i32
    %c0_i32_1 = arith.constant 0 : i32
    return %c0_i32, %c0_i32_0 : i32, i32
  }
  func.func @transform_7(%arg0: i32) -> (i32, i32, i32) {
    %c0_i32 = arith.constant 0 : i32
    %c0_i32_0 = arith.constant 0 : i32
    %c0_i32_1 = arith.constant 0 : i32
    return %arg0, %c0_i32, %c0_i32_0 : i32, i32, i32
  }
}

</mosaic_0001>

<bundles_post_ra>
// kernel: bottleneck_forward.1
= control target key start
LH: loop header
LB: loop body
LE: loop exit
PB: predicated region body
PF: predicated region fallthrough
CT: control target
= control target key end

     0   :  { %12 = vsyncpa [#allocation4], 0  ;;  %s5925_s0 = inlined_call_operand.vmem [shape: f32[2,256,256], index: 0, kind: input, shape index: {}]   ;;  %s5926_s1 = inlined_call_operand.vmem [shape: bf16[256,64], index: 1, kind: input, shape index: {}]   ;;  %s5927_s2 = inlined_call_operand.vmem [shape: f32[1,64], index: 2, kind: input, shape index: {}]   ;;  %s5928_s3 = inlined_call_operand.vmem [shape: bf16[3,192,64], index: 3, kind: input, shape index: {}]   ;;  %s5929_s4 = inlined_call_operand.vmem [shape: f32[1,64], index: 4, kind: input, shape index: {}]   ;;  %s5930_s5 = inlined_call_operand.vmem [shape: bf16[64,256], index: 5, kind: input, shape index: {}]   ;;  %s5931_s6 = inlined_call_operand.vmem [shape: f32[1,256], index: 6, kind: input, shape index: {}]   ;;  %s5932_s7 = inlined_call_operand.hbm [shape: f32[2,256,256], index: 7, kind: output, shape index: {}]  }
   0x1   :  { %14 = vsyncpa [#allocation4 + $0x1], 0  ;;  %s4209_s24 = smov 0   ;;  %s4211_s25 = smov 0  }
   0x2   :  { %s4213_s26 = smov 0   ;;  %s4215_s27 = smov 0  }
   0x3 LB: > { %s4230_s28 = sadd.s32 4294967295, %s4162_s27   ;;  %s3443_s29 = sadd.s32 4294967294, %s4162_s27   ;;  %s4162_s27 = sphi %s4215_s27, %s5975_s27   ;;  %s4158_s26 = sphi %s4213_s26, %s5974_s26   ;;  %s4154_s25 = sphi %s4211_s25, %s5973_s25   ;;  %s4150_s24 = sphi %s4209_s24, %s5972_s24  }
   0x4   : > { %s4234_s30 = sadd.s32 1, %s4162_s27   ;;  %s179_s8 = sadd.s32 1, %s4158_s26 }
   0x5   : > { %s176_s9 = ssub.s32 %s4162_s27, %s4234_s30  ;;  %p189_p0 = scmp.ne.s32.totalorder %s4158_s26, %s4154_s25 }
   0x6   : > { %p177_p1 = scmp.eq.s32.totalorder %s176_s9, 0  ;;  %p190_p2 = scmp.eq.s32.totalorder %s4230_s28, 1 }
   0x7   : > { %p195_p3 = scmp.ne.s32.totalorder %s4154_s25, %s4150_s24  ;;  %p196_p4 = scmp.eq.s32.totalorder %s3443_s29, 1 }
   0x8   : > { %s4245_s10 = scalar_select %p177_p1, %s4158_s26, %s179_s8  }
   0x9   : > { %p4247_p5 = por %p190_p2, %p189_p0  ;;  %p4251_p6 = por %p196_p4, %p195_p3 }
   0xa   : > { %p3446_p7 = scmp.ge.s32.totalorder %s4162_s27, 1  ;;  %p240_p8 = scmp.lt.s32.totalorder %s4162_s27, 3 }
   0xc   : > { %p241_p9 = pnand %p3446_p7, %p240_p8 }
   0xe   : > { %244 = sbr.rel (%p241_p9) target bundleno = 1100 (0x44c), region = 48 }
  0x13   : > { %v3920_v0 = vld [vmem:[%s5926_s1 + $0x78] sm:$0xff]   ;;  %v3922_v2 = vld [vmem:[%s5926_s1 + $0x70] sm:$0xff]   ;;  %p272_p10 = scmp.lt.s32.totalorder %s4230_s28, 1  ;;  %v3924_v4 = vld [vmem:[%s5926_s1 + $0x68] sm:$0xff]   ;;  %vm718_vm0 = vcmask 519168   ;;  %vm721_vm1 = vcmask 516096  }
  0x14   : > { %v3921_v1 = vld [vmem:[%s5926_s1 + $0x38] sm:$0xff]   ;;  %3749 = vmatprep.subr.bf16.mxu0 %v3920_v0  ;;  %3861 = vmatprep.subr.bf16.mxu1 %v3920_v0  ;;  %v3923_v3 = vld [vmem:[%s5926_s1 + $0x30] sm:$0xff]   ;;  %v3925_v5 = vld [vmem:[%s5926_s1 + $0x28] sm:$0xff]   ;;  %vm1179_vm2 = vsmask.f32 7938  ;;  %vm1818_vm8 = vcmask 1046528  }
  0x15   : > { %3750 = vmatpush3.bf16.msra.mxu0 %v3921_v1  ;;  %3869 = vmatpush3.bf16.msra.mxu1 %v3921_v1  ;;  %s273_s23 = scalar_select %p272_p10, %s4230_s28, 1  ;;  %v3926_v6 = vld [vmem:[%s5926_s1 + $0x60] sm:$0xff]   ;;  %v3928_v8 = vld [vmem:[%s5926_s1 + $0x58] sm:$0xff]   ;;  %v3930_v10 = vld [vmem:[%s5926_s1 + $0x50] sm:$0xff]   ;;  %vm854_vm3 = vsmask.f32 256 }
  0x16   : > { %3751 = vmatprep.subr.bf16.mxu0 %v3922_v2  ;;  %3862 = vmatprep.subr.bf16.mxu1 %v3922_v2  ;;  %v3927_v7 = vld [vmem:[%s5926_s1 + $0x20] sm:$0xff]   ;;  %v3929_v9 = vld [vmem:[%s5926_s1 + $0x18] sm:$0xff]   ;;  %v3931_v14 = vld [vmem:[%s5926_s1 + $0x10] sm:$0xff]   ;;  %vm855_vm4 = vsmask.f32 4368  ;;  %vm1873_vm9 = vcmask 523264  }
  0x17   : > { %s3715_s14 = sshll.u32 %s273_s23, 9  ;;  %v3932_v17 = vld [vmem:[%s5926_s1 + $0x48] sm:$0xff]   ;;  %v3934_v20 = vld [vmem:[%s5926_s1 + $0x40] sm:$0xff]   ;;  %vm4531_vm5 = vmand %vm718_vm0, %vm1179_vm2  ;;  %vm1511_vm10 = vsmask.f32 7424  ;;  %s4165_s23 = smov 64  }
  0x18   : > { %s4289_s21 = scalar_lea.vmem %s5925_s0, %s3715_s14  ;;  %v3933_v19 = vld [vmem:[%s5926_s1 + $0x8] sm:$0xff]   ;;  %v3935_v21 = vld [vmem:[%s5926_s1] sm:$0xff]   ;;  %vm4552_vm6 = vmor %vm854_vm3, %vm855_vm4  ;;  %s269_s18 = sand.u32 1, %s4154_s25  }
  0x19   : > { %3752 = vmatpush3.bf16.msra.mxu0 %v3923_v3  ;;  %3870 = vmatpush3.bf16.msra.mxu1 %v3923_v3  ;;  %v279_v11 = vld [vmem:[%s4289_s21 + $0x8] sm:$0xff]  ;;  %v281_v12 = vld [vmem:[%s4289_s21 + $0x18] sm:$0xff]  ;;  %v278_v22 = vld [vmem:[%s4289_s21] sm:$0xff]  ;;  %s3447_s19 = sshll.u32 %s269_s18, 9  ;;  %s3748_s20 = sshll.u32 %s4230_s28, 13 }
  0x1a   : > { %3753 = vmatprep.subr.bf16.mxu0 %v3924_v4  ;;  %3863 = vmatprep.subr.bf16.mxu1 %v3924_v4  ;;  %v343_v13 = vpack.c.bf16 %v281_v12, %v279_v11  ;;  %v311_v15 = vld [vmem:[%s4289_s21 + $0x108] sm:$0xff]  ;;  %v313_v16 = vld [vmem:[%s4289_s21 + $0x118] sm:$0xff]  ;;  %v280_v23 = vld [vmem:[%s4289_s21 + $0x10] sm:$0xff]  ;;  %s5877_s9 = scalar_lea.hbm %s5932_s7, %s3748_s20  ;;  %s5885_s28 = scalar_lea.sflag [#allocation4], %s269_s18 }
  0x1b   : > { %v359_v18 = vpack.c.bf16 %v313_v16, %v311_v15  ;;  %v283_v24 = vld [vmem:[%s4289_s21 + $0x28] sm:$0xff]  ;;  %v285_v25 = vld [vmem:[%s4289_s21 + $0x38] sm:$0xff]  ;;  %v310_v26 = vld [vmem:[%s4289_s21 + $0x100] sm:$0xff]  ;;  %v342_v30 = vpack.c.bf16 %v280_v23, %v278_v22 }
  0x1c   : > { %541 = vmatprep.mubr.bf16.mxu0 %v343_v13  ;;  %v312_v27 = vld [vmem:[%s4289_s21 + $0x110] sm:$0xff]  ;;  %v315_v28 = vld [vmem:[%s4289_s21 + $0x128] sm:$0xff]  ;;  %v317_v29 = vld [vmem:[%s4289_s21 + $0x138] sm:$0xff]  ;;  %v345_v31 = vpack.c.bf16 %v285_v25, %v283_v24 }
  0x1d   : > { %3754 = vmatpush3.bf16.msra.mxu0 %v3925_v5  ;;  %3871 = vmatpush3.bf16.msra.mxu1 %v3925_v5  ;;  %v358_v32 = vpack.c.bf16 %v312_v27, %v310_v26  ;;  %v361_v33 = vpack.c.bf16 %v317_v29, %v315_v28  ;;  %v282_v34 = vld [vmem:[%s4289_s21 + $0x20] sm:$0xff]  ;;  %v284_v35 = vld [vmem:[%s4289_s21 + $0x30] sm:$0xff]  ;;  %v287_v36 = vld [vmem:[%s4289_s21 + $0x48] sm:$0xff] }
  0x1e   : > { %3755 = vmatprep.subr.bf16.mxu0 %v3926_v6  ;;  %3864 = vmatprep.subr.bf16.mxu1 %v3926_v6  ;;  %v289_v37 = vld [vmem:[%s4289_s21 + $0x58] sm:$0xff]  ;;  %v314_v38 = vld [vmem:[%s4289_s21 + $0x120] sm:$0xff]  ;;  %v316_v39 = vld [vmem:[%s4289_s21 + $0x130] sm:$0xff]  ;;  %v344_v42 = vpack.c.bf16 %v284_v35, %v282_v34 }
  0x1f   : > { %605 = vmatprep.mubr.bf16.mxu1 %v359_v18  ;;  %v319_v40 = vld [vmem:[%s4289_s21 + $0x148] sm:$0xff]  ;;  %v321_v41 = vld [vmem:[%s4289_s21 + $0x158] sm:$0xff]  ;;  %v347_v43 = vpack.c.bf16 %v289_v37, %v287_v36  ;;  %v360_v44 = vpack.c.bf16 %v316_v39, %v314_v38  ;;  %v286_v46 = vld [vmem:[%s4289_s21 + $0x40] sm:$0xff] }
  0x20   : > { %v363_v45 = vpack.c.bf16 %v321_v41, %v319_v40  ;;  %v288_v47 = vld [vmem:[%s4289_s21 + $0x50] sm:$0xff]  ;;  %v291_v48 = vld [vmem:[%s4289_s21 + $0x68] sm:$0xff]  ;;  %v293_v49 = vld [vmem:[%s4289_s21 + $0x78] sm:$0xff] }
  0x21   : > { %3756 = vmatpush3.bf16.msra.mxu0 %v3927_v7  ;;  %3872 = vmatpush3.bf16.msra.mxu1 %v3927_v7  ;;  %v318_v50 = vld [vmem:[%s4289_s21 + $0x140] sm:$0xff]  ;;  %v320_v51 = vld [vmem:[%s4289_s21 + $0x150] sm:$0xff]  ;;  %v323_v52 = vld [vmem:[%s4289_s21 + $0x168] sm:$0xff]  ;;  %v346_v54 = vpack.c.bf16 %v288_v47, %v286_v46  ;;  %v349_v55 = vpack.c.bf16 %v293_v49, %v291_v48  ;;  %v5937_v48 = vmov 0  }
  0x22   : > { %3757 = vmatprep.subr.bf16.mxu0 %v3928_v8  ;;  %3865 = vmatprep.subr.bf16.mxu1 %v3928_v8  ;;  %v325_v53 = vld [vmem:[%s4289_s21 + $0x178] sm:$0xff]  ;;  %v362_v56 = vpack.c.bf16 %v320_v51, %v318_v50  ;;  %v290_v58 = vld [vmem:[%s4289_s21 + $0x60] sm:$0xff]  ;;  %v292_v59 = vld [vmem:[%s4289_s21 + $0x70] sm:$0xff]  ;;  %723 = vst.msk [vmem:[#allocation2 + $0xc] sm:$0xf] %vm718_vm0, %v5937_v48 }
  0x23   : > { %v365_v57 = vpack.c.bf16 %v325_v53, %v323_v52  ;;  %v295_v60 = vld [vmem:[%s4289_s21 + $0x88] sm:$0xff]  ;;  %v297_v61 = vld [vmem:[%s4289_s21 + $0x98] sm:$0xff]  ;;  %v322_v62 = vld [vmem:[%s4289_s21 + $0x160] sm:$0xff]  ;;  %v348_v2 = vpack.c.bf16 %v292_v59, %v290_v58  ;;  %719 = vst.msk [vmem:[#allocation2] sm:$0xf] %vm718_vm0, %v5937_v48 }
  0x24   : > { %v324_v63 = vld [vmem:[%s4289_s21 + $0x170] sm:$0xff]  ;;  %v327_v0 = vld [vmem:[%s4289_s21 + $0x188] sm:$0xff]  ;;  %v329_v1 = vld [vmem:[%s4289_s21 + $0x198] sm:$0xff]  ;;  %v351_v3 = vpack.c.bf16 %v297_v61, %v295_v60  ;;  %720 = vst.msk [vmem:[#allocation2 + $0x4] sm:$0xf] %vm718_vm0, %v5937_v48 }
  0x25   : > { %3758 = vmatpush3.bf16.msra.mxu0 %v3929_v9  ;;  %3873 = vmatpush3.bf16.msra.mxu1 %v3929_v9  ;;  %v364_v4 = vpack.c.bf16 %v324_v63, %v322_v62  ;;  %v367_v5 = vpack.c.bf16 %v329_v1, %v327_v0  ;;  %v294_v6 = vld [vmem:[%s4289_s21 + $0x80] sm:$0xff]  ;;  %v296_v7 = vld [vmem:[%s4289_s21 + $0x90] sm:$0xff]  ;;  %v299_v8 = vld [vmem:[%s4289_s21 + $0xa8] sm:$0xff]  ;;  %724 = vst.msk [vmem:[#allocation2 + $0x10] sm:$0xf] %vm718_vm0, %v5937_v48 }
  0x26   : > { %3759 = vmatprep.subr.bf16.mxu0 %v3930_v10  ;;  %3866 = vmatprep.subr.bf16.mxu1 %v3930_v10  ;;  %v301_v9 = vld [vmem:[%s4289_s21 + $0xb8] sm:$0xff]  ;;  %v326_v10 = vld [vmem:[%s4289_s21 + $0x180] sm:$0xff]  ;;  %v328_v11 = vld [vmem:[%s4289_s21 + $0x190] sm:$0xff]  ;;  %726 = vst.msk [vmem:[#allocation2 + $0x18] sm:$0xf] %vm718_vm0, %v5937_v48 }
  0x27   : > { %v331_v12 = vld [vmem:[%s4289_s21 + $0x1a8] sm:$0xff]  ;;  %v333_v13 = vld [vmem:[%s4289_s21 + $0x1b8] sm:$0xff]  ;;  %v353_v15 = vpack.c.bf16 %v301_v9, %v299_v8  ;;  %v366_v16 = vpack.c.bf16 %v328_v11, %v326_v10  ;;  %v298_v18 = vld [vmem:[%s4289_s21 + $0xa0] sm:$0xff]  ;;  %727 = vst.msk [vmem:[#allocation2 + $0x1c] sm:$0xf] %vm718_vm0, %v5937_v48 }
  0x28   : > { %v330_v22 = vld [vmem:[%s4289_s21 + $0x1a0] sm:$0xff]  ;;  %v332_v23 = vld [vmem:[%s4289_s21 + $0x1b0] sm:$0xff]  ;;  %v335_v24 = vld [vmem:[%s4289_s21 + $0x1c8] sm:$0xff]  ;;  %729 = vst.msk [vmem:[#allocation2 + $0x24] sm:$0xf] %vm718_vm0, %v5937_v48 }
  0x29   : > { %3760 = vmatpush3.bf16.msra.mxu0 %v3931_v14  ;;  %3874 = vmatpush3.bf16.msra.mxu1 %v3931_v14  ;;  %v350_v14 = vpack.c.bf16 %v296_v7, %v294_v6  ;;  %v337_v25 = vld [vmem:[%s4289_s21 + $0x1d8] sm:$0xff]  ;;  %v368_v28 = vpack.c.bf16 %v332_v23, %v330_v22  ;;  %v334_v34 = vld [vmem:[%s4289_s21 + $0x1c0] sm:$0xff]  ;;  %v336_v35 = vld [vmem:[%s4289_s21 + $0x1d0] sm:$0xff]  ;;  %730 = vst.msk [vmem:[#allocation2 + $0x28] sm:$0xf] %vm718_vm0, %v5937_v48 }
  0x2a   : > { %3761 = vmatprep.subr.bf16.mxu0 %v3932_v17  ;;  %3867 = vmatprep.subr.bf16.mxu1 %v3932_v17  ;;  %v369_v17 = vpack.c.bf16 %v333_v13, %v331_v12  ;;  %v371_v29 = vpack.c.bf16 %v337_v25, %v335_v24  ;;  %v339_v36 = vld [vmem:[%s4289_s21 + $0x1e8] sm:$0xff]  ;;  %v341_v37 = vld [vmem:[%s4289_s21 + $0x1f8] sm:$0xff]  ;;  %v370_v40 = vpack.c.bf16 %v336_v35, %v334_v34  ;;  %v3958_v50 = vld [vmem:[%s5928_s3 + $0x90] sm:$0xff]  }
  0x2b   : > { %v373_v41 = vpack.c.bf16 %v341_v37, %v339_v36  ;;  %732 = vst.msk [vmem:[#allocation2 + $0x30] sm:$0xf] %vm718_vm0, %v5937_v48  ;;  %733 = vst.msk [vmem:[#allocation2 + $0x34] sm:$0xf] %vm718_vm0, %v5937_v48  ;;  %v3951_v49 = vld [vmem:[%s5928_s3 + $0x98] sm:$0xff]   ;;  %v3963_v51 = vld [vmem:[%s5928_s3 + $0x88] sm:$0xff]  }
  0x2c   : > { %735 = vst.msk [vmem:[#allocation2 + $0x3c] sm:$0xf] %vm718_vm0, %v5937_v48  ;;  %736 = vst.msk [vmem:[#allocation2 + $0x40] sm:$0xf] %vm718_vm0, %v5937_v48  ;;  %v3968_v52 = vld [vmem:[%s5928_s3 + $0x80] sm:$0xff]   ;;  %v3975_v1 = vld [vmem:[%s5928_s3 + $0x78] sm:$0xff]  }
  0x2d   : > { %3762 = vmatpush3.bf16.msra.mxu0 %v3933_v19  ;;  %3875 = vmatpush3.bf16.msra.mxu1 %v3933_v19  ;;  %v300_v19 = vld [vmem:[%s4289_s21 + $0xb0] sm:$0xff]  ;;  %738 = vst.msk [vmem:[#allocation2 + $0x48] sm:$0xf] %vm718_vm0, %v5937_v48  ;;  %739 = vst.msk [vmem:[#allocation2 + $0x4c] sm:$0xf] %vm718_vm0, %v5937_v48  ;;  %v3977_v24 = vld [vmem:[%s5928_s3 + $0x68] sm:$0xff]  }
  0x2e   : > { %3763 = vmatprep.subr.bf16.mxu0 %v3934_v20  ;;  %3868 = vmatprep.subr.bf16.mxu1 %v3934_v20  ;;  %v303_v20 = vld [vmem:[%s4289_s21 + $0xc8] sm:$0xff]  ;;  %v352_v26 = vpack.c.bf16 %v300_v19, %v298_v18  ;;  %741 = vst.msk [vmem:[#allocation2 + $0x54] sm:$0xf] %vm718_vm0, %v5937_v48  ;;  %742 = vst.msk [vmem:[#allocation2 + $0x58] sm:$0xf] %vm718_vm0, %v5937_v48  ;;  %v3976_v8 = vld [vmem:[%s5928_s3 + $0x70] sm:$0xff]  }
  0x2f   : > { %744 = vst.msk [vmem:[#allocation2 + $0x60] sm:$0xf] %vm718_vm0, %v5937_v48  ;;  %745 = vst.msk [vmem:[#allocation2 + $0x64] sm:$0xf] %vm718_vm0, %v5937_v48  ;;  %v1295_v59 = vld [vmem:[#allocation2] sm:$0xf] }
  0x30   : > { %747 = vst.msk [vmem:[#allocation2 + $0x6c] sm:$0xf] %vm718_vm0, %v5937_v48  ;;  %748 = vst.msk [vmem:[#allocation2 + $0x70] sm:$0xf] %vm718_vm0, %v5937_v48  ;;  %v1296_v60 = vld [vmem:[#allocation2 + $0x4] sm:$0xf] }
  0x31   : > { %3764 = vmatpush3.bf16.msra.mxu0 %v3935_v21  ;;  %3876 = vmatpush3.bf16.msra.mxu1 %v3935_v21  ;;  %v305_v21 = vld [vmem:[%s4289_s21 + $0xd8] sm:$0xff]  ;;  %750 = vst.msk [vmem:[#allocation2 + $0x78] sm:$0xf] %vm718_vm0, %v5937_v48  ;;  %751 = vst.msk [vmem:[#allocation2 + $0x7c] sm:$0xf] %vm718_vm0, %v5937_v48 }
  0x32   : > { %v355_v27 = vpack.c.bf16 %v305_v21, %v303_v20  ;;  %753 = vst.msk [vmem:[#allocation2 + $0x84] sm:$0xf] %vm718_vm0, %v5937_v48  ;;  %754 = vst.msk [vmem:[#allocation2 + $0x88] sm:$0xf] %vm718_vm0, %v5937_v48  ;;  %2097 = vmatprep.subr.bf16.mxu1 %v5937_v48  ;;  %2333 = vmatprep.subr.bf16.mxu0 %v5937_v48  ;;  %v1181_v36 = vld [vmem:[#allocation2 + $0xc] sm:$0xf] }
  0x33   : > { %756 = vst.msk [vmem:[#allocation2 + $0x90] sm:$0xf] %vm718_vm0, %v5937_v48  ;;  %757 = vst.msk [vmem:[#allocation2 + $0x94] sm:$0xf] %vm718_vm0, %v5937_v48 }
  0x34   : > { %542 = vmatmul.mubr.bf16.vlgmr.msra.gmra.mxu0 %v342_v30  ;;  %606 = vmatmul.mubr.bf16.vlgmr.msra.gmra.mxu1 %v358_v32  ;;  %v302_v30 = vld [vmem:[%s4289_s21 + $0xc0] sm:$0xff]  ;;  %v307_v32 = vld [vmem:[%s4289_s21 + $0xe8] sm:$0xff]  ;;  %759 = vst.msk [vmem:[#allocation2 + $0x9c] sm:$0xf] %vm718_vm0, %v5937_v48  ;;  %760 = vst.msk [vmem:[#allocation2 + $0xa0] sm:$0xf] %vm718_vm0, %v5937_v48 }
  0x35   : > { %549 = vmatprep.mubr.bf16.mxu0 %v345_v31  ;;  %613 = vmatprep.mubr.bf16.mxu1 %v361_v33  ;;  %v304_v31 = vld [vmem:[%s4289_s21 + $0xd0] sm:$0xff]  ;;  %v309_v33 = vld [vmem:[%s4289_s21 + $0xf8] sm:$0xff]  ;;  %762 = vst.msk [vmem:[#allocation2 + $0xa8] sm:$0xf] %vm718_vm0, %v5937_v48  ;;  %763 = vst.msk [vmem:[#allocation2 + $0xac] sm:$0xf] %vm718_vm0, %v5937_v48 }
  0x36   : > { %v354_v38 = vpack.c.bf16 %v304_v31, %v302_v30  ;;  %v357_v39 = vpack.c.bf16 %v309_v33, %v307_v32  ;;  %765 = vst.msk [vmem:[#allocation2 + $0xb4] sm:$0xf] %vm718_vm0, %v5937_v48  ;;  %766 = vst.msk [vmem:[#allocation2 + $0xb8] sm:$0xf] %vm718_vm0, %v5937_v48  ;;  %2098 = vmatpush1.bf16.msra.mxu1 %v3951_v49  ;;  %v3978_v49 = vld [vmem:[%s5928_s3 + $0x60] sm:$0xff]  }
  0x37   : > { %768 = vst.msk [vmem:[#allocation2 + $0xc0] sm:$0xf] %vm718_vm0, %v5937_v48  ;;  %769 = vst.msk [vmem:[#allocation2 + $0xc4] sm:$0xf] %vm718_vm0, %v5937_v48  ;;  %2099 = vmatprep.subr.bf16.mxu1 %v5937_v48 }
  0x38   : > { %771 = vst.msk [vmem:[#allocation2 + $0xcc] sm:$0xf] %vm718_vm0, %v5937_v48  ;;  %772 = vst.msk [vmem:[#allocation2 + $0xd0] sm:$0xf] %vm718_vm0, %v5937_v48 }
  0x39   : > { %725 = vst.msk [vmem:[#allocation2 + $0x14] sm:$0x1] %vm721_vm1, %v5937_v48  ;;  %722 = vst.msk [vmem:[#allocation2 + $0x8] sm:$0x1] %vm721_vm1, %v5937_v48 }
  0x3a   : > { %728 = vst.msk [vmem:[#allocation2 + $0x20] sm:$0x1] %vm721_vm1, %v5937_v48  ;;  %731 = vst.msk [vmem:[#allocation2 + $0x2c] sm:$0x1] %vm721_vm1, %v5937_v48  ;;  %2100 = vmatpush1.bf16.msra.mxu1 %v3958_v50 }
  0x3b   : > { %734 = vst.msk [vmem:[#allocation2 + $0x38] sm:$0x1] %vm721_vm1, %v5937_v48  ;;  %737 = vst.msk [vmem:[#allocation2 + $0x44] sm:$0x1] %vm721_vm1, %v5937_v48  ;;  %2101 = vmatprep.subr.bf16.mxu1 %v5937_v48 }
  0x3c   : > { %550 = vmatmul.mubr.bf16.gmra.mxu0 %v344_v42  ;;  %614 = vmatmul.mubr.bf16.gmra.mxu1 %v360_v44  ;;  %v306_v42 = vld [vmem:[%s4289_s21 + $0xe0] sm:$0xff]  ;;  %740 = vst.msk [vmem:[#allocation2 + $0x50] sm:$0x1] %vm721_vm1, %v5937_v48  ;;  %743 = vst.msk [vmem:[#allocation2 + $0x5c] sm:$0x1] %vm721_vm1, %v5937_v48 }
  0x3d   : > { %557 = vmatprep.mubr.bf16.mxu0 %v347_v43  ;;  %621 = vmatprep.mubr.bf16.mxu1 %v363_v45  ;;  %v308_v43 = vld [vmem:[%s4289_s21 + $0xf0] sm:$0xff]  ;;  %v338_v44 = vld [vmem:[%s4289_s21 + $0x1e0] sm:$0xff]  ;;  %746 = vst.msk [vmem:[#allocation2 + $0x68] sm:$0x1] %vm721_vm1, %v5937_v48  ;;  %749 = vst.msk [vmem:[#allocation2 + $0x74] sm:$0x1] %vm721_vm1, %v5937_v48 }
  0x3e   : > { %v340_v45 = vld [vmem:[%s4289_s21 + $0x1f0] sm:$0xff]  ;;  %v356_v46 = vpack.c.bf16 %v308_v43, %v306_v42  ;;  %752 = vst.msk [vmem:[#allocation2 + $0x80] sm:$0x1] %vm721_vm1, %v5937_v48  ;;  %755 = vst.msk [vmem:[#allocation2 + $0x8c] sm:$0x1] %vm721_vm1, %v5937_v48  ;;  %2102 = vmatpush1.bf16.msra.mxu1 %v3963_v51 }
  0x3f   : > { %v372_v47 = vpack.c.bf16 %v340_v45, %v338_v44  ;;  %758 = vst.msk [vmem:[#allocation2 + $0x98] sm:$0x1] %vm721_vm1, %v5937_v48  ;;  %761 = vst.msk [vmem:[#allocation2 + $0xa4] sm:$0x1] %vm721_vm1, %v5937_v48  ;;  %2103 = vmatprep.subr.bf16.mxu1 %v5937_v48 }
  0x40   : > { %764 = vst.msk [vmem:[#allocation2 + $0xb0] sm:$0x1] %vm721_vm1, %v5937_v48  ;;  %767 = vst.msk [vmem:[#allocation2 + $0xbc] sm:$0x1] %vm721_vm1, %v5937_v48 }
  0x41   : > { %770 = vst.msk [vmem:[#allocation2 + $0xc8] sm:$0x1] %vm721_vm1, %v5937_v48  ;;  %773 = vst.msk [vmem:[#allocation2 + $0xd4] sm:$0x1] %vm721_vm1, %v5937_v48 }
  0x42   : > { %2104 = vmatpush1.bf16.msra.mxu1 %v3968_v52  ;;  %vm4558_vm7 = vmand %vm721_vm1, %vm854_vm3 }
  0x43   : > { %2105 = vmatprep.subr.bf16.mxu1 %v5937_v48 }
  0x44   : > { %558 = vmatmul.mubr.bf16.gmra.mxu0 %v346_v54  ;;  %622 = vmatmul.mubr.bf16.gmra.mxu1 %v362_v56 }
  0x45   : > { %565 = vmatprep.mubr.bf16.mxu0 %v349_v55  ;;  %629 = vmatprep.mubr.bf16.mxu1 %v365_v57  ;;  %v4504_v55 = vld [vmem:[%s5927_s2] ss:$0 sm:$0xff] }
  0x46   : > { %2106 = vmatpush1.bf16.msra.mxu1 %v3975_v1 }
  0x47   : > { %2107 = vmatprep.subr.bf16.mxu1 %v5937_v48 }
  0x4a   : > { %2108 = vmatpush1.bf16.msra.mxu1 %v3976_v8 }
  0x4b   : > { %2109 = vmatprep.subr.bf16.mxu1 %v5937_v48 }
  0x4c   : > { %566 = vmatmul.mubr.bf16.gmra.mxu0 %v348_v2  ;;  %630 = vmatmul.mubr.bf16.gmra.mxu1 %v364_v4  ;;  %v4512_v4 = vcombine.low %v1295_v59, %v1296_v60 }
  0x4d   : > { %573 = vmatprep.mubr.bf16.mxu0 %v351_v3  ;;  %637 = vmatprep.mubr.bf16.mxu1 %v367_v5 }
  0x4e   : > { %5946 = vst [vmem:[#allocation6_spill] sm:$0xff] %v4512_v4  ;;  %v1515_v18 = vshll.u32 %v4512_v4, 16  ;;  %2110 = vmatpush1.bf16.msra.mxu1 %v3977_v24 }
  0x4f   : > { %2111 = vmatprep.subr.bf16.mxu1 %v5937_v48 }
  0x52   : > { %2112 = vmatpush1.bf16.msra.mxu1 %v3978_v49 }
  0x53   : > { %2121 = vmatprep.subr.bf16.mxu1 %v5937_v48 }
  0x54   : > { %574 = vmatmul.mubr.bf16.gmra.mxu0 %v350_v14  ;;  %638 = vmatmul.mubr.bf16.gmra.mxu1 %v366_v16 }
  0x55   : > { %581 = vmatprep.mubr.bf16.mxu0 %v353_v15  ;;  %645 = vmatprep.mubr.bf16.mxu1 %v369_v17 }
  0x5c   : > { %582 = vmatmul.mubr.bf16.gmra.mxu0 %v352_v26  ;;  %646 = vmatmul.mubr.bf16.gmra.mxu1 %v368_v28 }
  0x5d   : > { %589 = vmatprep.mubr.bf16.mxu0 %v355_v27  ;;  %653 = vmatprep.mubr.bf16.mxu1 %v371_v29 }
  0x64   : > { %590 = vmatmul.mubr.bf16.gmra.mxu0 %v354_v38  ;;  %654 = vmatmul.mubr.bf16.gmra.mxu1 %v370_v40 }
  0x65   : > { %597 = vmatprep.mubr.bf16.mxu0 %v357_v39  ;;  %661 = vmatprep.mubr.bf16.mxu1 %v373_v41  ;;  %v4538_v41 = vrot.slane %v1515_v18, 1 }
  0x6c   : > { %598 = vmatmul.mubr.bf16.gmra.mxu0 %v356_v46  ;;  %662 = vmatmul.mubr.bf16.gmra.mxu1 %v372_v47  ;;  %v1239_v46 = vld [vmem:[#allocation2 + $0x6c] sm:$0xf] }
  0xf4   : > { %v3765_v53 = vpop.f32.mrf.mxu0  ;;  %v3813_v54 = vpop.f32.mrf.mxu1 }
  0xf6   : > { %v3766_v56 = vpop.f32.mrf.mxu0  ;;  %v3814_v58 = vpop.f32.mrf.mxu1 }
  0xf7   : > { %v3767_v57 = vadd.f32 %v3766_v56, %v3765_v53  ;;  %v3815_v62 = vadd.f32 %v3814_v58, %v3813_v54 }
  0xf8   : > { %v3768_v61 = vpop.f32.mrf.mxu0  ;;  %v3816_v0 = vpop.f32.mrf.mxu1 }
  0xf9   : > { %v544_v63 = vadd.f32 %v3767_v57, %v4504_v55  ;;  %v608_v3 = vadd.f32 %v3815_v62, %v4504_v55 }
  0xfa   : > { %v3769_v2 = vpop.f32.mrf.mxu0  ;;  %v3817_v7 = vpop.f32.mrf.mxu1 }
  0xfb   : > { %v670_v5 = vmax.f32 %v544_v63, 0.0  ;;  %v3770_v6 = vadd.f32 %v3769_v2, %v3768_v61  ;;  %v686_v10 = vmax.f32 %v608_v3, 0.0  ;;  %v3818_v11 = vadd.f32 %v3817_v7, %v3816_v0  ;;  %v1187_v63 = vld [vmem:[#allocation2 + $0x14] sm:$0x1] }
  0xfc   : > { %v3771_v9 = vpop.f32.mrf.mxu0  ;;  %v3819_v14 = vpop.f32.mrf.mxu1 }
  0xfd   : > { %v3716_v12 = vpack.c.bf16 %v670_v5, %v670_v5  ;;  %v547_v13 = vadd.f32 %v3770_v6, %v4504_v55  ;;  %v3732_v16 = vpack.c.bf16 %v686_v10, %v686_v10  ;;  %v611_v17 = vadd.f32 %v3818_v11, %v4504_v55  ;;  %v3979_v11 = vld [vmem:[%s5928_s3 + $0xb8] sm:$0xff]  }
  0xfe   : > { %v3772_v15 = vpop.f32.mrf.mxu0  ;;  %v3820_v22 = vpop.f32.mrf.mxu1  ;;  %2122 = vmatpush2.bf16.msra.mxu1 %v3979_v11 }
  0xff   : > { %v858_v19 = vshrl.u32 %v3716_v12, 16  ;;  %v671_v20 = vmax.f32 %v547_v13, 0.0  ;;  %v3773_v21 = vadd.f32 %v3772_v15, %v3771_v9  ;;  %v994_v26 = vshrl.u32 %v3732_v16, 16  ;;  %2123 = vmatprep.subr.bf16.mxu1 %v5937_v48 }
 0x100   : > { %v3774_v25 = vpop.f32.mrf.mxu0  ;;  %v997_v27 = vshll.u32 %v3732_v16, 16  ;;  %v687_v28 = vmax.f32 %v611_v17, 0.0  ;;  %v3821_v29 = vadd.f32 %v3820_v22, %v3819_v14  ;;  %v861_v31 = vshll.u32 %v3716_v12, 16  ;;  %v4527_v34 = vpop.f32.mrf.mxu1 }
 0x101   : > { %v860_v30 = vrot.slane %v858_v19, 7  ;;  %v3717_v32 = vpack.c.bf16 %v671_v20, %v671_v20  ;;  %v552_v33 = vadd.f32 %v3773_v21, %v4504_v55  ;;  %v4535_v38 = vrot.slane %v994_v26, 7 }
 0x102   : > { %v3775_v37 = vpop.f32.mrf.mxu0  ;;  %v3733_v39 = vpack.c.bf16 %v687_v28, %v687_v28  ;;  %v616_v40 = vadd.f32 %v3821_v29, %v4504_v55  ;;  %v4540_v47 = vpop.f32.mrf.mxu1  ;;  %v1190_v29 = vld [vmem:[#allocation2 + $0x18] sm:$0xf] }
 0x103   : > { %v863_v42 = vor.u32 %v861_v31, %v860_v30  ;;  %v864_v43 = vrot.slane %v860_v30, 4  ;;  %v866_v44 = vshrl.u32 %v3717_v32, 16  ;;  %v869_v45 = vshll.u32 %v3717_v32, 16 }
 0x104   : > { %v672_v50 = vmax.f32 %v552_v33, 0.0  ;;  %v3776_v51 = vadd.f32 %v3775_v37, %v3774_v25  ;;  %v3777_v52 = vpop.f32.mrf.mxu0  ;;  %v999_v53 = vor.u32 %v997_v27, %v4535_v38  ;;  %v1000_v54 = vrot.slane %v4535_v38, 4  ;;  %v3825_v61 = vpop.f32.mrf.mxu1  ;;  %v1243_v27 = vld [vmem:[#allocation2 + $0x74] sm:$0x1] }
 0x105   : > { %v1182_v56 = vsel %vm4531_vm5, %v863_v42, %v1181_v36  ;;  %v868_v58 = vrot.slane %v866_v44, 7  ;;  %v1002_v59 = vshrl.u32 %v3733_v39, 16  ;;  %v1005_v60 = vshll.u32 %v3733_v39, 16  ;;  %v3980_v37 = vld [vmem:[%s5928_s3 + $0xb0] sm:$0xff]  }
 0x106   : > { %1183 = vst [vmem:[#allocation2 + $0xc] sm:$0xf] %v1182_v56  ;;  %v3718_v0 = vpack.c.bf16 %v672_v50, %v672_v50  ;;  %v555_v1 = vadd.f32 %v3776_v51, %v4504_v55  ;;  %v3778_v2 = vpop.f32.mrf.mxu0  ;;  %v1240_v3 = vsel %vm4531_vm5, %v999_v53, %v1239_v46  ;;  %v688_v5 = vmax.f32 %v616_v40, 0.0  ;;  %v3826_v10 = vpop.f32.mrf.mxu1  ;;  %v1194_v53 = vld [vmem:[#allocation2 + $0x20] sm:$0x1]  ;;  %2124 = vmatpush2.bf16.msra.mxu1 %v3980_v37 }
 0x107   : > { %v871_v6 = vor.u32 %v869_v45, %v868_v58  ;;  %v873_v7 = vrot.slane %v868_v58, 4  ;;  %v3779_v8 = vadd.f32 %v3778_v2, %v3777_v52  ;;  %1241 = vst [vmem:[#allocation2 + $0x6c] sm:$0xf] %v1240_v3  ;;  %v1004_v9 = vrot.slane %v1002_v59, 7  ;;  %v3981_v3 = vld [vmem:[%s5928_s3 + $0xa8] sm:$0xff]   ;;  %2125 = vmatprep.subr.bf16.mxu1 %v5937_v48 }
 0x108   : > { %v875_v12 = vshrl.u32 %v3718_v0, 16  ;;  %v878_v13 = vshll.u32 %v3718_v0, 16  ;;  %v673_v14 = vmax.f32 %v555_v1, 0.0  ;;  %v3780_v15 = vpop.f32.mrf.mxu0  ;;  %v3734_v16 = vpack.c.bf16 %v688_v5, %v688_v5  ;;  %v4574_v21 = vpop.f32.mrf.mxu1  ;;  %v1246_v1 = vld [vmem:[#allocation2 + $0x78] sm:$0xf] }
 0x109   : > { %v872_v17 = vsel %vm4552_vm6, %v864_v43, %v871_v6  ;;  %v1188_v18 = vsel %vm4558_vm7, %v873_v7, %v1187_v63  ;;  %v560_v19 = vadd.f32 %v3779_v8, %v4504_v55  ;;  %v1007_v20 = vor.u32 %v1005_v60, %v1004_v9 }
 0x10a   : > { %1184 = vst.msk [vmem:[#allocation2 + $0x10] sm:$0xf] %vm718_vm0, %v872_v17  ;;  %1189 = vst [vmem:[#allocation2 + $0x14] sm:$0x1] %v1188_v18  ;;  %v877_v22 = vrot.slane %v875_v12, 7  ;;  %v3719_v24 = vpack.c.bf16 %v673_v14, %v673_v14  ;;  %v3781_v25 = vpop.f32.mrf.mxu0  ;;  %v1009_v26 = vrot.slane %v1004_v9, 4  ;;  %v4579_v36 = vpop.f32.mrf.mxu1  ;;  %v3824_v56 = vadd.f32 %v4540_v47, %v4527_v34  ;;  %2126 = vmatpush2.bf16.msra.mxu1 %v3981_v3 }
 0x10b   : > { %v1011_v28 = vshrl.u32 %v3734_v16, 16  ;;  %v674_v30 = vmax.f32 %v560_v19, 0.0  ;;  %v3782_v31 = vadd.f32 %v3781_v25, %v3780_v15  ;;  %v1008_v32 = vsel %vm4552_vm6, %v1000_v54, %v1007_v20  ;;  %v1197_v14 = vld [vmem:[#allocation2 + $0x24] sm:$0xf]  ;;  %2127 = vmatprep.subr.bf16.mxu1 %v5937_v48 }
 0x10c   : > { %v1014_v33 = vshll.u32 %v3734_v16, 16  ;;  %v880_v38 = vor.u32 %v878_v13, %v877_v22  ;;  %v881_v39 = vrot.slane %v877_v22, 4  ;;  %v883_v40 = vshrl.u32 %v3719_v24, 16  ;;  %1242 = vst.msk [vmem:[#allocation2 + $0x70] sm:$0xf] %vm718_vm0, %v1008_v32  ;;  %v3783_v43 = vpop.f32.mrf.mxu0  ;;  %v4591_v50 = vpop.f32.mrf.mxu1 }
 0x10d   : > { %v886_v42 = vshll.u32 %v3719_v24, 16  ;;  %v3720_v44 = vpack.c.bf16 %v674_v30, %v674_v30  ;;  %v563_v45 = vadd.f32 %v3782_v31, %v4504_v55  ;;  %v1244_v46 = vsel %vm4558_vm7, %v1009_v26, %v1243_v27  ;;  %v1297_v25 = vld [vmem:[#allocation2 + $0xc] sm:$0xf]  ;;  %v3982_v27 = vld [vmem:[%s5928_s3 + $0xa0] sm:$0xff]  }
 0x10e   : > { %v4589_v49 = vrot.slane %v1011_v28, 7  ;;  %v1191_v51 = vsel %vm4531_vm5, %v880_v38, %v1190_v29  ;;  %v885_v52 = vrot.slane %v883_v40, 7  ;;  %1245 = vst [vmem:[#allocation2 + $0x74] sm:$0x1] %v1244_v46  ;;  %v3784_v54 = vpop.f32.mrf.mxu0  ;;  %v3827_v58 = vadd.f32 %v3826_v10, %v3825_v61  ;;  %v4597_v2 = vpop.f32.mrf.mxu1  ;;  %2128 = vmatpush2.bf16.msra.mxu1 %v3982_v27 }
 0x10f   : > { %1192 = vst [vmem:[#allocation2 + $0x18] sm:$0xf] %v1191_v51  ;;  %v892_v59 = vshrl.u32 %v3720_v44, 16  ;;  %v895_v60 = vshll.u32 %v3720_v44, 16  ;;  %v675_v63 = vmax.f32 %v563_v45, 0.0  ;;  %v3785_v0 = vadd.f32 %v3784_v54, %v3783_v43  ;;  %2594 = vmatprep.subr.bf16.mxu1 %v5937_v48 }
 0x110   : > { %v888_v5 = vor.u32 %v886_v42, %v885_v52  ;;  %v890_v6 = vrot.slane %v885_v52, 4  ;;  %v1016_v7 = vor.u32 %v1014_v33, %v4589_v49  ;;  %v1017_v34 = vrot.slane %v4589_v49, 4  ;;  %v3786_v47 = vpop.f32.mrf.mxu0  ;;  %v4607_v11 = vpop.f32.mrf.mxu1  ;;  %v1350_v33 = vld [vmem:[#allocation2 + $0xc] sm:$0xe]  ;;  %v1201_v43 = vld [vmem:[#allocation2 + $0x2c] sm:$0x1] }
 0x111   : > { %v894_v61 = vrot.slane %v892_v59, 7  ;;  %v3721_v8 = vpack.c.bf16 %v675_v63, %v675_v63  ;;  %v568_v9 = vadd.f32 %v3785_v0, %v4504_v55  ;;  %v619_v10 = vadd.f32 %v3824_v56, %v4504_v55  ;;  %v1298_v18 = vld [vmem:[#allocation2 + $0x10] sm:$0xf] }
 0x112   : > { %v889_v12 = vsel %vm4552_vm6, %v881_v39, %v888_v5  ;;  %v1195_v13 = vsel %vm4558_vm7, %v890_v6, %v1194_v53  ;;  %v1247_v15 = vsel %vm4531_vm5, %v1016_v7, %v1246_v1  ;;  %v3787_v16 = vpop.f32.mrf.mxu0  ;;  %v624_v17 = vadd.f32 %v3827_v58, %v4504_v55  ;;  %v4617_v26 = vpop.f32.mrf.mxu1  ;;  %v4630_v58 = vld [vmem:[#allocation2 + $0x14] ss:$0 sps:$4 sm:$0x11]  }
 0x113   : > { %1193 = vst.msk [vmem:[#allocation2 + $0x1c] sm:$0xf] %vm718_vm0, %v889_v12  ;;  %1196 = vst [vmem:[#allocation2 + $0x20] sm:$0x1] %v1195_v13  ;;  %v897_v19 = vor.u32 %v895_v60, %v894_v61  ;;  %v898_v20 = vrot.slane %v894_v61, 4  ;;  %v900_v22 = vshrl.u32 %v3721_v8, 16  ;;  %v3788_v29 = vadd.f32 %v3787_v16, %v3786_v47 }
 0x114   : > { %v903_v24 = vshll.u32 %v3721_v8, 16  ;;  %1248 = vst [vmem:[#allocation2 + $0x78] sm:$0xf] %v1247_v15  ;;  %v676_v28 = vmax.f32 %v568_v9, 0.0  ;;  %v689_v30 = vmax.f32 %v619_v10, 0.0  ;;  %v3789_v31 = vpop.f32.mrf.mxu0  ;;  %v690_v32 = vmax.f32 %v624_v17, 0.0  ;;  %v4627_v42 = vpop.f32.mrf.mxu1 }
 0x115   : > { %v1198_v37 = vsel %vm4531_vm5, %v897_v19, %v1197_v14  ;;  %v902_v38 = vrot.slane %v900_v22, 7  ;;  %v4625_v39 = vcombine.low %v1297_v25, %v1298_v18  ;;  %v3536_v40 = vcombine.low %v1350_v33, %v1298_v18  ;;  %v1204_v9 = vld [vmem:[#allocation2 + $0x30] sm:$0xf]  ;;  %v1250_v25 = vld [vmem:[#allocation2 + $0x80] sm:$0x1] }
 0x116   : > { %1199 = vst [vmem:[#allocation2 + $0x24] sm:$0xf] %v1198_v37  ;;  %v3722_v44 = vpack.c.bf16 %v676_v28, %v676_v28  ;;  %v571_v45 = vadd.f32 %v3788_v29, %v4504_v55  ;;  %v3735_v46 = vpack.c.bf16 %v689_v30, %v689_v30  ;;  %v3790_v51 = vpop.f32.mrf.mxu0  ;;  %v3736_v52 = vpack.c.bf16 %v690_v32, %v690_v32  ;;  %v4632_v5 = vpop.f32.mrf.mxu1 }
 0x117   : > { %v905_v53 = vor.u32 %v903_v24, %v902_v38  ;;  %v907_v54 = vrot.slane %v902_v38, 4  ;;  %v3791_v56 = vadd.f32 %v3790_v51, %v3789_v31  ;;  %v1822_v59 = vrot.slane %v3536_v40, 1 }
 0x118   : > { %v909_v60 = vshrl.u32 %v3722_v44, 16  ;;  %v912_v63 = vshll.u32 %v3722_v44, 16  ;;  %v677_v0 = vmax.f32 %v571_v45, 0.0  ;;  %v1019_v1 = vshrl.u32 %v3735_v46, 16  ;;  %v3792_v3 = vpop.f32.mrf.mxu0  ;;  %v4642_v28 = vpop.f32.mrf.mxu1  ;;  %v1208_v44 = vld [vmem:[#allocation2 + $0x38] sm:$0x1] }
 0x119   : > { %v906_v6 = vsel %vm4552_vm6, %v898_v20, %v905_v53  ;;  %v1202_v7 = vsel %vm4558_vm7, %v907_v54, %v1201_v43  ;;  %v1022_v47 = vshll.u32 %v3735_v46, 16  ;;  %v576_v61 = vadd.f32 %v3791_v56, %v4504_v55  ;;  %v1253_v53 = vld [vmem:[#allocation2 + $0x84] sm:$0xf] }
 0x11a   : > { %1200 = vst.msk [vmem:[#allocation2 + $0x28] sm:$0xf] %vm718_vm0, %v906_v6  ;;  %1203 = vst [vmem:[#allocation2 + $0x2c] sm:$0x1] %v1202_v7  ;;  %v911_v8 = vrot.slane %v909_v60, 7  ;;  %v3723_v10 = vpack.c.bf16 %v677_v0, %v677_v0  ;;  %v1021_v12 = vrot.slane %v1019_v1, 7  ;;  %v3793_v14 = vpop.f32.mrf.mxu0  ;;  %v3830_v1 = vadd.f32 %v4579_v36, %v4574_v21 }
 0x11b   : > { %v1028_v13 = vshrl.u32 %v3736_v52, 16  ;;  %v678_v15 = vmax.f32 %v576_v61, 0.0  ;;  %v1031_v16 = vshll.u32 %v3736_v52, 16  ;;  %v1823_v17 = vrot.slane %v4630_v58, 1 }
 0x11c   : > { %v3794_v18 = vadd.f32 %v3793_v14, %v3792_v3  ;;  %v914_v19 = vor.u32 %v912_v63, %v911_v8  ;;  %v915_v20 = vrot.slane %v911_v8, 4  ;;  %v917_v22 = vshrl.u32 %v3723_v10, 16  ;;  %v3795_v27 = vpop.f32.mrf.mxu0 }
 0x11d   : > { %v920_v24 = vshll.u32 %v3723_v10, 16  ;;  %v1024_v29 = vor.u32 %v1022_v47, %v1021_v12  ;;  %v1026_v30 = vrot.slane %v1021_v12, 4  ;;  %v3724_v31 = vpack.c.bf16 %v678_v15, %v678_v15  ;;  %v1211_v47 = vld [vmem:[#allocation2 + $0x3c] sm:$0xf] }
 0x11e   : > { %v4644_v32 = vrot.slane %v1028_v13, 7  ;;  %v1205_v33 = vsel %vm4531_vm5, %v914_v19, %v1204_v9  ;;  %v919_v37 = vrot.slane %v917_v22, 7  ;;  %v4649_v38 = vsel %vm1818_vm8, %v1822_v59, %v1823_v17  ;;  %v3796_v43 = vpop.f32.mrf.mxu0 }
 0x11f   : > { %5953 = vst [vmem:[#allocation7_spill] sm:$0xff] %v4649_v38  ;;  %v579_v40 = vadd.f32 %v3794_v18, %v4504_v55  ;;  %1206 = vst [vmem:[#allocation2 + $0x30] sm:$0xf] %v1205_v33  ;;  %v1025_v45 = vsel %vm4552_vm6, %v1017_v34, %v1024_v29  ;;  %v1251_v46 = vsel %vm4558_vm7, %v1026_v30, %v1250_v25  ;;  %v926_v51 = vshrl.u32 %v3724_v31, 16  ;;  %v4663_v34 = vpop.f32.mrf.mxu1  ;;  %v1300_v25 = vld [vmem:[#allocation2 + $0x1c] sm:$0xf] }
 0x120   : > { %v929_v52 = vshll.u32 %v3724_v31, 16  ;;  %3589 = vmatprep.mubr.msk.bf16.mxu1 %vm1873_vm9, %v4649_v38  ;;  %v922_v54 = vor.u32 %v920_v24, %v919_v37  ;;  %v924_v56 = vrot.slane %v919_v37, 4  ;;  %1249 = vst.msk [vmem:[#allocation2 + $0x7c] sm:$0xf] %vm718_vm0, %v1025_v45  ;;  %1252 = vst [vmem:[#allocation2 + $0x80] sm:$0x1] %v1251_v46  ;;  %v1033_v59 = vor.u32 %v1031_v16, %v4644_v32  ;;  %v3798_v60 = vpop.f32.mrf.mxu0 }
 0x121   : > { %v1034_v49 = vrot.slane %v4644_v32, 4  ;;  %v928_v63 = vrot.slane %v926_v51, 7  ;;  %v679_v0 = vmax.f32 %v579_v40, 0.0  ;;  %v1525_v3 = vshrl.u32 %v4625_v39, 16  ;;  %v4682_v18 = vpop.f32.mrf.mxu1  ;;  %v1299_v40 = vld [vmem:[#allocation2 + $0x18] sm:$0xf] }
 0x122   : > { %v923_v6 = vsel %vm4552_vm6, %v915_v20, %v922_v54  ;;  %v1209_v7 = vsel %vm4558_vm7, %v924_v56, %v1208_v44  ;;  %v1254_v61 = vsel %vm4531_vm5, %v1033_v59, %v1253_v53  ;;  %v1527_v8 = vshll.u32 %v4625_v39, 16  ;;  %v3799_v9 = vpop.f32.mrf.mxu0 }
 0x123   : > { %1207 = vst.msk [vmem:[#allocation2 + $0x34] sm:$0xf] %vm718_vm0, %v923_v6  ;;  %1210 = vst [vmem:[#allocation2 + $0x38] sm:$0x1] %v1209_v7  ;;  %v931_v10 = vor.u32 %v929_v52, %v928_v63  ;;  %v932_v21 = vrot.slane %v928_v63, 4  ;;  %v3725_v36 = vpack.c.bf16 %v679_v0, %v679_v0  ;;  %v627_v12 = vadd.f32 %v3830_v1, %v4504_v55  ;;  %v4695_v52 = vpop.f32.mrf.mxu1 }
 0x124   : > { %1255 = vst [vmem:[#allocation2 + $0x84] sm:$0xf] %v1254_v61  ;;  %v1529_v13 = vrot.slane %v1527_v8, 1  ;;  %v1532_v14 = vshll.u32 %v4630_v58, 16  ;;  %v3797_v15 = vadd.f32 %v3796_v43, %v3795_v27  ;;  %v3833_v16 = vadd.f32 %v4597_v2, %v4591_v50  ;;  %v4680_v17 = vpop.f32.mrf.mxu0  ;;  %v1215_v43 = vld [vmem:[#allocation2 + $0x44] sm:$0x1] }
 0x125   : > { %v1212_v19 = vsel %vm4531_vm5, %v931_v10, %v1211_v47  ;;  %v934_v20 = vshrl.u32 %v3725_v36, 16  ;;  %v937_v22 = vshll.u32 %v3725_v36, 16  ;;  %v691_v24 = vmax.f32 %v627_v12, 0.0  ;;  %v3940_v0 = vld [vmem:[#allocation2 + $0x20] ss:$0 sps:$4 sm:$0x11]   ;;  %v4706_v12 = vpop.f32.mrf.mxu1 }
 0x126   : > { %1213 = vst [vmem:[#allocation2 + $0x3c] sm:$0xf] %v1212_v19  ;;  %v1530_v29 = vor.u32 %v1529_v13, %v1525_v3  ;;  %v1534_v30 = vrot.slane %v1532_v14, 1  ;;  %v584_v58 = vadd.f32 %v3797_v15, %v4504_v55  ;;  %v632_v27 = vadd.f32 %v3833_v16, %v4504_v55  ;;  %v4688_v31 = vpop.f32.mrf.mxu0  ;;  %v1257_v61 = vld [vmem:[#allocation2 + $0x8c] sm:$0x1] }
 0x127   : > { %v936_v50 = vrot.slane %v934_v20, 7  ;;  %v3737_v2 = vpack.c.bf16 %v691_v24, %v691_v24  ;;  %v3800_v33 = vadd.f32 %v3799_v9, %v3798_v60  ;;  %v3836_v37 = vadd.f32 %v4617_v26, %v4607_v11 }
 0x128   : > { %v1535_v44 = vsel %vm1511_vm10, %v1530_v29, %v1534_v30  ;;  %v680_v45 = vmax.f32 %v584_v58, 0.0  ;;  %v692_v46 = vmax.f32 %v632_v27, 0.0  ;;  %v4693_v51 = vcombine.low %v1299_v40, %v1300_v25  ;;  %v3804_v1 = vpop.f32.mrf.mxu0  ;;  %v1218_v30 = vld [vmem:[#allocation2 + $0x48] sm:$0xf]  ;;  %v1260_v58 = vld [vmem:[#allocation2 + $0x90] sm:$0xf] }
 0x129   : > { %v939_v53 = vor.u32 %v937_v22, %v936_v50  ;;  %v941_v54 = vrot.slane %v936_v50, 4  ;;  %v1036_v56 = vshrl.u32 %v3737_v2, 16  ;;  %v1039_v59 = vshll.u32 %v3737_v2, 16  ;;  %1730 = vrot.lane.b32.xlu0 %v1535_v44, %s4165_s23 }
 0x12a   : > { %v3726_v60 = vpack.c.bf16 %v680_v45, %v680_v45  ;;  %v3738_v63 = vpack.c.bf16 %v692_v46, %v692_v46  ;;  %v587_v11 = vadd.f32 %v3800_v33, %v4504_v55  ;;  %v635_v26 = vadd.f32 %v3836_v37, %v4504_v55  ;;  %v3805_v24 = vpop.f32.mrf.mxu0  ;;  %v4718_v46 = vld [vmem:[#allocation2 + $0x28] sm:$0xf] }
 0x12b   : > { %v940_v3 = vsel %vm4552_vm6, %v932_v21, %v939_v53  ;;  %v1216_v6 = vsel %vm4558_vm7, %v941_v54, %v1215_v43  ;;  %v1038_v7 = vrot.slane %v1036_v56, 7  ;;  %v1537_v47 = vshrl.u32 %v4693_v51, 16  ;;  %v4716_v43 = vpop.f32.mrf.mxu1 }
 0x12c   : > { %1214 = vst.msk [vmem:[#allocation2 + $0x40] sm:$0xf] %vm718_vm0, %v940_v3  ;;  %1217 = vst [vmem:[#allocation2 + $0x44] sm:$0x1] %v1216_v6  ;;  %v943_v8 = vshrl.u32 %v3726_v60, 16  ;;  %v946_v9 = vshll.u32 %v3726_v60, 16  ;;  %v3807_v60 = vpop.f32.mrf.mxu0 }
 0x12d   : > { %v1045_v10 = vshrl.u32 %v3738_v63, 16  ;;  %v1048_v36 = vshll.u32 %v3738_v63, 16  ;;  %v1041_v13 = vor.u32 %v1039_v59, %v1038_v7  ;;  %v1043_v14 = vrot.slane %v1038_v7, 4  ;;  %v1301_v3 = vld [vmem:[#allocation2 + $0x24] sm:$0xf] }
 0x12e   : > { %v681_v15 = vmax.f32 %v587_v11, 0.0  ;;  %v693_v21 = vmax.f32 %v635_v26, 0.0  ;;  %v945_v16 = vrot.slane %v943_v8, 7  ;;  %v1539_v20 = vshll.u32 %v4693_v51, 16  ;;  %v1222_v6 = vld [vmem:[#allocation2 + $0x50] sm:$0x1] }
 0x12f   : > { %v1047_v19 = vrot.slane %v1045_v10, 7  ;;  %v1544_v22 = vshll.u32 %v3940_v0, 16  ;;  %v1042_v25 = vsel %vm4552_vm6, %v1034_v49, %v1041_v13  ;;  %v1258_v29 = vsel %vm4558_vm7, %v1043_v14, %v1257_v61  ;;  %v1264_v7 = vld [vmem:[#allocation2 + $0x98] sm:$0x1] }
 0x130   : > { %v3727_v27 = vpack.c.bf16 %v681_v15, %v681_v15  ;;  %v3739_v50 = vpack.c.bf16 %v693_v21, %v693_v21  ;;  %1256 = vst.msk [vmem:[#allocation2 + $0x88] sm:$0xf] %vm718_vm0, %v1042_v25  ;;  %1259 = vst [vmem:[#allocation2 + $0x8c] sm:$0x1] %v1258_v29  ;;  %v948_v2 = vor.u32 %v946_v9, %v945_v16  ;;  %v949_v33 = vrot.slane %v945_v16, 4 }
 0x131   : > { %v1050_v37 = vor.u32 %v1048_v36, %v1047_v19  ;;  %v1051_v40 = vrot.slane %v1047_v19, 4  ;;  %v1541_v56 = vrot.slane %v1539_v20, 1  ;;  %v1546_v59 = vrot.slane %v1544_v22, 1  ;;  %v4733_v36 = vpop.f32.mrf.mxu1 }
 0x132   : > { %v951_v32 = vshrl.u32 %v3727_v27, 16  ;;  %v954_v44 = vshll.u32 %v3727_v27, 16  ;;  %v1053_v45 = vshrl.u32 %v3739_v50, 16  ;;  %v1056_v49 = vshll.u32 %v3739_v50, 16 }
 0x133   : > { %v1219_v53 = vsel %vm4531_vm5, %v948_v2, %v1218_v30  ;;  %v1261_v54 = vsel %vm4531_vm5, %v1050_v37, %v1260_v58  ;;  %v3803_v26 = vadd.f32 %v4688_v31, %v4680_v17  ;;  %v3839_v0 = vadd.f32 %v4632_v5, %v4627_v42  ;;  %v4735_v31 = vld [vmem:[#allocation2 + $0x2c] ss:$0 sps:$4 sm:$0x11]   ;;  %v3985_v42 = vld [vmem:[%s5928_s3 + $0x38] sm:$0xff]   ;;  %v4756_v30 = vpop.f32.mrf.mxu1 }
 0x134   : > { %1220 = vst [vmem:[#allocation2 + $0x48] sm:$0xf] %v1219_v53  ;;  %1262 = vst [vmem:[#allocation2 + $0x90] sm:$0xf] %v1261_v54  ;;  %v953_v63 = vrot.slane %v951_v32, 7  ;;  %v1055_v11 = vrot.slane %v1053_v45, 7  ;;  %v1542_v61 = vor.u32 %v1541_v56, %v1537_v47  ;;  %v3806_v8 = vadd.f32 %v3805_v24, %v3804_v1  ;;  %v3808_v47 = vpop.f32.mrf.mxu0  ;;  %2334 = vmatpush1.bf16.msra.mxu0 %v3985_v42 }
 0x135   : > { %v3842_v9 = vadd.f32 %v4663_v34, %v4642_v28  ;;  %v4731_v10 = vcombine.low %v1301_v3, %v4718_v46  ;;  %v592_v1 = vadd.f32 %v3803_v26, %v4504_v55  ;;  %v640_v28 = vadd.f32 %v3839_v0, %v4504_v55  ;;  %2335 = vmatprep.subr.bf16.mxu0 %v5937_v48  ;;  %v4765_v26 = vpop.f32.mrf.mxu1 }
 0x136   : > { %v956_v13 = vor.u32 %v954_v44, %v953_v63  ;;  %v958_v14 = vrot.slane %v953_v63, 4  ;;  %v1058_v15 = vor.u32 %v1056_v49, %v1055_v11  ;;  %v1060_v17 = vrot.slane %v1055_v11, 4  ;;  %v3810_v54 = vpop.f32.mrf.mxu0 }
 0x137   : > { %v1547_v5 = vsel %vm1511_vm10, %v1542_v61, %v1546_v59  ;;  %v595_v34 = vadd.f32 %v3806_v8, %v4504_v55  ;;  %v682_v22 = vmax.f32 %v592_v1, 0.0  ;;  %v694_v24 = vmax.f32 %v640_v28, 0.0  ;;  %v1225_v61 = vld [vmem:[#allocation2 + $0x54] sm:$0xf] }
 0x138   : > { %v957_v21 = vsel %vm4552_vm6, %v949_v33, %v956_v13  ;;  %v1223_v16 = vsel %vm4558_vm7, %v958_v14, %v1222_v6  ;;  %v1059_v19 = vsel %vm4552_vm6, %v1051_v40, %v1058_v15  ;;  %v1265_v20 = vsel %vm4558_vm7, %v1060_v17, %v1264_v7  ;;  %1732 = vrot.lane.b32.xlu0 %v1547_v5, %s4165_s23  ;;  %v1267_v14 = vld [vmem:[#allocation2 + $0x9c] sm:$0xf]  ;;  %v3811_v42 = vpop.f32.mrf.mxu0 }
 0x139   : > { %1221 = vst.msk [vmem:[#allocation2 + $0x4c] sm:$0xf] %vm718_vm0, %v957_v21  ;;  %1224 = vst [vmem:[#allocation2 + $0x50] sm:$0x1] %v1223_v16  ;;  %v683_v25 = vmax.f32 %v595_v34, 0.0  ;;  %v643_v29 = vadd.f32 %v3842_v9, %v4504_v55  ;;  %v1549_v58 = vshrl.u32 %v4731_v10, 16  ;;  %v3809_v2 = vadd.f32 %v3808_v47, %v3807_v60  ;;  %v4770_v21 = vpop.f32.mrf.mxu1 }
 0x13a   : > { %1263 = vst.msk [vmem:[#allocation2 + $0x94] sm:$0xf] %vm718_vm0, %v1059_v19  ;;  %1266 = vst [vmem:[#allocation2 + $0x98] sm:$0x1] %v1265_v20  ;;  %v1551_v27 = vshll.u32 %v4731_v10, 16  ;;  %v1556_v50 = vshll.u32 %v4735_v31, 16  ;;  %v3728_v33 = vpack.c.bf16 %v682_v22, %v682_v22  ;;  %v3740_v37 = vpack.c.bf16 %v694_v24, %v694_v24 }
 0x13b   : > { %v3729_v40 = vpack.c.bf16 %v683_v25, %v683_v25  ;;  %v695_v32 = vmax.f32 %v643_v29, 0.0  ;;  %v600_v49 = vadd.f32 %v3809_v2, %v4504_v55  ;;  %v3845_v53 = vadd.f32 %v4695_v52, %v4682_v18  ;;  %v1229_v47 = vld [vmem:[#allocation2 + $0x5c] sm:$0x1]  ;;  %v1271_v22 = vld [vmem:[#allocation2 + $0xa4] sm:$0x1] }
 0x13c   : > { %v1553_v44 = vrot.slane %v1551_v27, 1  ;;  %v1558_v45 = vrot.slane %v1556_v50, 1  ;;  %v960_v56 = vshrl.u32 %v3728_v33, 16  ;;  %v963_v59 = vshll.u32 %v3728_v33, 16  ;;  %v4776_v50 = vld [vmem:[#allocation2 + $0x34] sm:$0xf] }
 0x13d   : > { %v1062_v63 = vshrl.u32 %v3740_v37, 16  ;;  %v1065_v11 = vshll.u32 %v3740_v37, 16  ;;  %v968_v60 = vshrl.u32 %v3729_v40, 16  ;;  %v971_v0 = vshll.u32 %v3729_v40, 16 }
 0x13e   : > { %v3741_v3 = vpack.c.bf16 %v695_v32, %v695_v32  ;;  %v1554_v6 = vor.u32 %v1553_v44, %v1549_v58  ;;  %v962_v7 = vrot.slane %v960_v56, 7  ;;  %v684_v9 = vmax.f32 %v600_v49, 0.0  ;;  %v4782_v32 = vld [vmem:[#allocation2 + $0x38] ss:$0 sps:$4 sm:$0x11]   ;;  %v3987_v44 = vld [vmem:[%s5928_s3 + $0x30] sm:$0xff]  }
 0x13f   : > { %v1064_v8 = vrot.slane %v1062_v63, 7  ;;  %v648_v13 = vadd.f32 %v3845_v53, %v4504_v55  ;;  %v970_v15 = vrot.slane %v968_v60, 7  ;;  %v3812_v27 = vadd.f32 %v3811_v42, %v3810_v54  ;;  %v1303_v56 = vld [vmem:[#allocation2 + $0x30] sm:$0xf]  ;;  %2336 = vmatpush1.bf16.msra.mxu0 %v3987_v44 }
 0x140   : > { %v1070_v18 = vshrl.u32 %v3741_v3, 16  ;;  %v1073_v52 = vshll.u32 %v3741_v3, 16  ;;  %v1559_v17 = vsel %vm1511_vm10, %v1554_v6, %v1558_v45  ;;  %v965_v5 = vor.u32 %v963_v59, %v962_v7  ;;  %v4789_v59 = vpop.f32.mrf.mxu1  ;;  %v3988_v3 = vld [vmem:[%s5928_s3 + $0x28] sm:$0xff]   ;;  %2337 = vmatprep.subr.bf16.mxu0 %v5937_v48 }
 0x141   : > { %v966_v1 = vrot.slane %v962_v7, 4  ;;  %v1067_v28 = vor.u32 %v1065_v11, %v1064_v8  ;;  %v1068_v34 = vrot.slane %v1064_v8, 4  ;;  %1734 = vrot.lane.b32.xlu1 %v1559_v17, %s4165_s23  ;;  %v973_v16 = vor.u32 %v971_v0, %v970_v15  ;;  %v1274_v17 = vld [vmem:[#allocation2 + $0xa8] sm:$0xf] }
 0x142   : > { %v975_v19 = vrot.slane %v970_v15, 4  ;;  %v1072_v20 = vrot.slane %v1070_v18, 7  ;;  %v3730_v24 = vpack.c.bf16 %v684_v9, %v684_v9  ;;  %v1226_v25 = vsel %vm4531_vm5, %v965_v5, %v1225_v61  ;;  %v1232_v9 = vld [vmem:[#allocation2 + $0x60] sm:$0xf]  ;;  %v3856_v5 = vpop.f32.mrf.mxu1 }
 0x143   : > { %v1268_v29 = vsel %vm4531_vm5, %v1067_v28, %v1267_v14  ;;  %v696_v58 = vmax.f32 %v648_v13, 0.0  ;;  %1227 = vst [vmem:[#allocation2 + $0x54] sm:$0xf] %v1226_v25  ;;  %v974_v2 = vsel %vm4552_vm6, %v966_v1, %v973_v16  ;;  %v603_v54 = vadd.f32 %v3812_v27, %v4504_v55  ;;  %2338 = vmatpush1.bf16.msra.mxu0 %v3988_v3  ;;  %v4826_v27 = vld [vmem:[#allocation2 + $0x44] ss:$0 sps:$4 sm:$0x11]  }
 0x144   : > { %1269 = vst [vmem:[#allocation2 + $0x9c] sm:$0xf] %v1268_v29  ;;  %v1230_v33 = vsel %vm4558_vm7, %v975_v19, %v1229_v47  ;;  %v1075_v37 = vor.u32 %v1073_v52, %v1072_v20  ;;  %v1077_v40 = vrot.slane %v1072_v20, 4  ;;  %1228 = vst.msk [vmem:[#allocation2 + $0x58] sm:$0xf] %vm718_vm0, %v974_v2  ;;  %v977_v45 = vshrl.u32 %v3730_v24, 16  ;;  %2339 = vmatprep.subr.bf16.mxu0 %v5937_v48  ;;  %v3858_v44 = vpop.f32.mrf.mxu1 }
 0x145   : > { %1231 = vst [vmem:[#allocation2 + $0x5c] sm:$0x1] %v1230_v33  ;;  %v980_v49 = vshll.u32 %v3730_v24, 16  ;;  %v3742_v53 = vpack.c.bf16 %v696_v58, %v696_v58  ;;  %v3848_v60 = vadd.f32 %v4716_v43, %v4706_v12  ;;  %v4798_v0 = vcombine.low %v1303_v56, %v4776_v50  ;;  %v1305_v24 = vld [vmem:[#allocation2 + $0x3c] sm:$0xf] }
 0x146   : > { %v1076_v63 = vsel %vm4552_vm6, %v1068_v34, %v1075_v37  ;;  %v1272_v11 = vsel %vm4558_vm7, %v1077_v40, %v1271_v22  ;;  %v979_v6 = vrot.slane %v977_v45, 7  ;;  %v685_v8 = vmax.f32 %v603_v54, 0.0  ;;  %v3991_v45 = vld [vmem:[%s5928_s3 + $0x20] sm:$0xff]   ;;  %v3992_v3 = vld [vmem:[%s5928_s3 + $0x18] sm:$0xff]  }
 0x147   : > { %1270 = vst.msk [vmem:[#allocation2 + $0xa0] sm:$0xf] %vm718_vm0, %v1076_v63  ;;  %1273 = vst [vmem:[#allocation2 + $0xa4] sm:$0x1] %v1272_v11  ;;  %v1079_v7 = vshrl.u32 %v3742_v53, 16  ;;  %v1082_v61 = vshll.u32 %v3742_v53, 16  ;;  %v651_v12 = vadd.f32 %v3848_v60, %v4504_v55  ;;  %v3851_v47 = vadd.f32 %v4756_v30, %v4733_v36  ;;  %2340 = vmatpush1.bf16.msra.mxu0 %v3991_v45 }
 0x148   : > { %v1561_v43 = vshrl.u32 %v4798_v0, 16  ;;  %v1563_v13 = vshll.u32 %v4798_v0, 16  ;;  %v1568_v14 = vshll.u32 %v4782_v32, 16  ;;  %v982_v15 = vor.u32 %v980_v49, %v979_v6  ;;  %v4813_v55 = vld [vmem:[#allocation2 + $0x40] sm:$0xf]  ;;  %2341 = vmatprep.subr.bf16.mxu0 %v5937_v48 }
 0x149   : > { %v983_v18 = vrot.slane %v979_v6, 4  ;;  %v4809_v52 = vrot.slane %v1079_v7, 7  ;;  %v3731_v42 = vpack.c.bf16 %v685_v8, %v685_v8  ;;  %v697_v1 = vmax.f32 %v651_v12, 0.0  ;;  %v4823_v36 = vld [vmem:[%s5927_s2] ss:$0 sm:$0xff] }
 0x14a   : > { %v1565_v28 = vrot.slane %v1563_v13, 1  ;;  %v1570_v34 = vrot.slane %v1568_v14, 1  ;;  %v1233_v16 = vsel %vm4531_vm5, %v982_v15, %v1232_v9  ;;  %v656_v30 = vadd.f32 %v4823_v36, %v3851_v47  ;;  %v1236_v49 = vld [vmem:[#allocation2 + $0x68] sm:$0x1]  ;;  %v3859_v15 = vpop.f32.mrf.mxu1 }
 0x14b   : > { %v1084_v19 = vor.u32 %v1082_v61, %v4809_v52  ;;  %v1085_v20 = vrot.slane %v4809_v52, 4  ;;  %v985_v22 = vshrl.u32 %v3731_v42, 16  ;;  %1234 = vst [vmem:[#allocation2 + $0x60] sm:$0xf] %v1233_v16  ;;  %v988_v25 = vshll.u32 %v3731_v42, 16  ;;  %2342 = vmatpush1.bf16.msra.mxu0 %v3992_v3 }
 0x14c   : > { %v3743_v29 = vpack.c.bf16 %v697_v1, %v697_v1  ;;  %v1566_v58 = vor.u32 %v1565_v28, %v1561_v43  ;;  %v3854_v37 = vadd.f32 %v4770_v21, %v4765_v26  ;;  %v4833_v40 = vcombine.low %v1305_v24, %v4813_v55  ;;  %v1278_v43 = vld [vmem:[#allocation2 + $0xb0] sm:$0x1]  ;;  %v4854_v28 = vld [vmem:[#allocation2 + $0x4c] sm:$0xf]  ;;  %v1281_v24 = vld [vmem:[#allocation2 + $0xb4] sm:$0xf]  ;;  %2343 = vmatprep.subr.bf16.mxu0 %v5937_v48 }
 0x14d   : > { %v1275_v2 = vsel %vm4531_vm5, %v1084_v19, %v1274_v17  ;;  %v987_v33 = vrot.slane %v985_v22, 7  ;;  %v698_v63 = vmax.f32 %v656_v30, 0.0  ;;  %v1580_v8 = vshll.u32 %v4826_v27, 16  ;;  %v4857_v19 = vld [vmem:[#allocation2 + $0x50] ss:$0 sps:$4 sm:$0x11]  }
 0x14e   : > { %1276 = vst [vmem:[#allocation2 + $0xa8] sm:$0xf] %v1275_v2  ;;  %v1087_v53 = vshrl.u32 %v3743_v29, 16  ;;  %v1090_v54 = vshll.u32 %v3743_v29, 16  ;;  %v1571_v56 = vsel %vm1511_vm10, %v1566_v58, %v1570_v34  ;;  %v659_v26 = vadd.f32 %v4823_v36, %v3854_v37 }
 0x14f   : > { %v990_v11 = vor.u32 %v988_v25, %v987_v33  ;;  %v992_v60 = vrot.slane %v987_v33, 4  ;;  %1736 = vrot.lane.b32.xlu1 %v1571_v56, %s4165_s23  ;;  %v1573_v21 = vshrl.u32 %v4833_v40, 16  ;;  %v3744_v7 = vpack.c.bf16 %v698_v63, %v698_v63  ;;  %v1307_v33 = vld [vmem:[#allocation2 + $0x48] sm:$0xf] }
 0x150   : > { %v1089_v6 = vrot.slane %v1087_v53, 7  ;;  %v1575_v61 = vshll.u32 %v4833_v40, 16  ;;  %v699_v13 = vmax.f32 %v659_v26, 0.0  ;;  %v3857_v14 = vadd.f32 %v3856_v5, %v4789_v59  ;;  %v4876_v26 = vld [vmem:[#allocation2 + $0x5c] ss:$0 sps:$4 sm:$0x11]  }
 0x151   : > { %v991_v9 = vsel %vm4552_vm6, %v983_v18, %v990_v11  ;;  %v1237_v12 = vsel %vm4558_vm7, %v992_v60, %v1236_v49  ;;  %v1096_v42 = vshrl.u32 %v3744_v7, 16  ;;  %v1099_v1 = vshll.u32 %v3744_v7, 16  ;;  %v1285_v49 = vld [vmem:[#allocation2 + $0xbc] sm:$0x1] }
 0x152   : > { %1235 = vst.msk [vmem:[#allocation2 + $0x64] sm:$0xf] %vm718_vm0, %v991_v9  ;;  %1238 = vst [vmem:[#allocation2 + $0x68] sm:$0x1] %v1237_v12  ;;  %v1092_v52 = vor.u32 %v1090_v54, %v1089_v6  ;;  %v1094_v17 = vrot.slane %v1089_v6, 4  ;;  %v3745_v34 = vpack.c.bf16 %v699_v13, %v699_v13  ;;  %v1577_v47 = vrot.slane %v1575_v61, 1 }
 0x153   : > { %v1582_v18 = vrot.slane %v1580_v8, 1  ;;  %v664_v16 = vadd.f32 %v4823_v36, %v3857_v14  ;;  %v1098_v22 = vrot.slane %v1096_v42, 7  ;;  %v3860_v25 = vadd.f32 %v3859_v15, %v3858_v44  ;;  %v4872_v54 = vld [vmem:[#allocation2 + $0x58] sm:$0xf]  ;;  %v1309_v13 = vld [vmem:[#allocation2 + $0x54] sm:$0xf] }
 0x154   : > { %v1093_v59 = vsel %vm4552_vm6, %v1085_v20, %v1092_v52  ;;  %v1279_v5 = vsel %vm4558_vm7, %v1094_v17, %v1278_v43  ;;  %v1104_v29 = vshrl.u32 %v3745_v34, 16  ;;  %v1107_v58 = vshll.u32 %v3745_v34, 16  ;;  %v3994_v20 = vld [vmem:[%s5928_s3 + $0x10] sm:$0xff]   ;;  %v1313_v14 = vld [vmem:[#allocation2 + $0x6c] sm:$0xf] }
 0x155   : > { %1277 = vst.msk [vmem:[#allocation2 + $0xac] sm:$0xf] %vm718_vm0, %v1093_v59  ;;  %1280 = vst [vmem:[#allocation2 + $0xb0] sm:$0x1] %v1279_v5  ;;  %v1578_v30 = vor.u32 %v1577_v47, %v1573_v21  ;;  %v700_v2 = vmax.f32 %v664_v16, 0.0  ;;  %v1101_v37 = vor.u32 %v1099_v1, %v1098_v22  ;;  %v1102_v45 = vrot.slane %v1098_v22, 4  ;;  %2344 = vmatpush1.bf16.msra.mxu0 %v3994_v20 }
 0x156   : > { %v667_v53 = vadd.f32 %v4823_v36, %v3860_v25  ;;  %v4870_v44 = vcombine.low %v1307_v33, %v4854_v28  ;;  %v1106_v56 = vrot.slane %v1104_v29, 7  ;;  %v1592_v60 = vshll.u32 %v4857_v19, 16  ;;  %v3996_v21 = vld [vmem:[%s5928_s3 + $0x8] sm:$0xff]   ;;  %v4886_v61 = vld [vmem:[#allocation2 + $0x74] ss:$0 sps:$4 sm:$0x11]   ;;  %2345 = vmatprep.subr.bf16.mxu0 %v5937_v48 }
 0x157   : > { %v1583_v63 = vsel %vm1511_vm10, %v1578_v30, %v1582_v18  ;;  %v3746_v11 = vpack.c.bf16 %v700_v2, %v700_v2  ;;  %v1282_v36 = vsel %vm4531_vm5, %v1101_v37, %v1281_v24  ;;  %v1288_v15 = vld [vmem:[#allocation2 + $0xc0] sm:$0xf]  ;;  %v4890_v1 = vcombine.low %v1309_v13, %v4872_v54  ;;  %v4892_v34 = vld [vmem:[#allocation2 + $0x70] sm:$0xf]  ;;  %v1292_v33 = vld [vmem:[#allocation2 + $0xc8] sm:$0x1] }
 0x158   : > { %1738 = vrot.lane.b32.xlu0 %v1583_v63, %s4165_s23  ;;  %v701_v3 = vmax.f32 %v667_v53, 0.0  ;;  %v1585_v6 = vshrl.u32 %v4870_v44, 16  ;;  %v1587_v7 = vshll.u32 %v4870_v44, 16  ;;  %1283 = vst [vmem:[#allocation2 + $0xb4] sm:$0xf] %v1282_v36  ;;  %v1109_v8 = vor.u32 %v1107_v58, %v1106_v56  ;;  %v3999_v13 = vld [vmem:[%s5928_s3 + $0x58] sm:$0xff]  }
 0x159   : > { %v1111_v9 = vrot.slane %v1106_v56, 4  ;;  %v1113_v12 = vshrl.u32 %v3746_v11, 16  ;;  %v1116_v43 = vshll.u32 %v3746_v11, 16  ;;  %v1594_v42 = vrot.slane %v1592_v60, 1  ;;  %2346 = vmatpush1.bf16.msra.mxu0 %v3996_v21  ;;  %v4903_v58 = vld [vmem:[#allocation2 + $0x64] sm:$0xf] }
 0x15a   : > { %v3747_v52 = vpack.c.bf16 %v701_v3, %v701_v3  ;;  %v1589_v17 = vrot.slane %v1587_v7, 1  ;;  %v1110_v47 = vsel %vm4552_vm6, %v1102_v45, %v1109_v8  ;;  %v1604_v59 = vshll.u32 %v4876_v26, 16  ;;  %v4899_v5 = vld [vmem:[#allocation2 + $0x68] ss:$0 sps:$4 sm:$0x11]   ;;  %2347 = vmatprep.subr.bf16.mxu0 %v5937_v48  ;;  %v3998_v45 = vld [vmem:[%s5928_s3] sm:$0xff]  }
 0x15b   : > { %v1286_v18 = vsel %vm4558_vm7, %v1111_v9, %v1285_v49  ;;  %v1115_v16 = vrot.slane %v1113_v12, 7  ;;  %1284 = vst.msk [vmem:[#allocation2 + $0xb8] sm:$0xf] %vm718_vm0, %v1110_v47  ;;  %v1597_v29 = vshrl.u32 %v4890_v1, 16  ;;  %v1599_v20 = vshll.u32 %v4890_v1, 16 }
 0x15c   : > { %1287 = vst [vmem:[#allocation2 + $0xbc] sm:$0x1] %v1286_v18  ;;  %v1121_v22 = vshrl.u32 %v3747_v52, 16  ;;  %v1124_v24 = vshll.u32 %v3747_v52, 16  ;;  %v1590_v25 = vor.u32 %v1589_v17, %v1585_v6  ;;  %v1606_v37 = vrot.slane %v1604_v59, 1 }
 0x15d   : > { %v1118_v30 = vor.u32 %v1116_v43, %v1115_v16  ;;  %v1119_v2 = vrot.slane %v1115_v16, 4  ;;  %v4912_v56 = vcombine.low %v1313_v14, %v4892_v34  ;;  %v1628_v63 = vshll.u32 %v4886_v61, 16  ;;  %v1311_v11 = vld [vmem:[#allocation2 + $0x60] sm:$0xf]  ;;  %v1317_v60 = vld [vmem:[#allocation2 + $0x84] sm:$0xf]  ;;  %2348 = vmatpush1.bf16.msra.mxu0 %v3998_v45 }
 0x15e   : > { %v1123_v49 = vrot.slane %v1121_v22, 7  ;;  %v1595_v53 = vsel %vm1511_vm10, %v1590_v25, %v1594_v42  ;;  %v4915_v21 = vld [vmem:[#allocation2 + $0x88] sm:$0xf]  ;;  %v4917_v36 = vld [vmem:[#allocation2 + $0x80] ss:$0 sps:$4 sm:$0x11]   ;;  %v4923_v7 = vcombine.low %v1311_v11, %v4903_v58  ;;  %2357 = vmatprep.subr.bf16.mxu0 %v5937_v48 }
 0x15f   : > { %5954 = vst [vmem:[#allocation8_spill] sm:$0xff] %v4912_v56  ;;  %v1289_v3 = vsel %vm4531_vm5, %v1118_v30, %v1288_v15  ;;  %1740 = vrot.lane.b32.xlu1 %v1595_v53, %s4165_s23  ;;  %v1601_v6 = vrot.slane %v1599_v20, 1  ;;  %v1616_v8 = vshll.u32 %v4899_v5, 16  ;;  %v4926_v9 = vld [vmem:[#allocation2 + $0x8c] ss:$0 sps:$4 sm:$0x11]   ;;  %v4951_v53 = vcombine.low %v1317_v60, %v4915_v21 }
 0x160   : > { %v1315_v12 = vld [vmem:[#allocation2 + $0x78] sm:$0xf]  ;;  %v4928_v43 = vld [vmem:[#allocation2 + $0x7c] sm:$0xf]  ;;  %1290 = vst [vmem:[#allocation2 + $0xc0] sm:$0xf] %v1289_v3  ;;  %v1126_v35 = vor.u32 %v1124_v24, %v1123_v49 }
 0x161   : > { %v1128_v14 = vrot.slane %v1123_v49, 4  ;;  %v1621_v15 = vshrl.u32 %v4912_v56, 16  ;;  %v1623_v52 = vshll.u32 %v4912_v56, 16  ;;  %v1321_v17 = vld [vmem:[#allocation2 + $0x9c] sm:$0xf]  ;;  %v1602_v42 = vor.u32 %v1601_v6, %v1597_v29  ;;  %5955 = vst [vmem:[#allocation9_spill] sm:$0xff] %v4951_v53  ;;  %2358 = vmatpush2.bf16.msra.mxu0 %v3999_v13 }
 0x162   : > { %v1630_v47 = vrot.slane %v1628_v63, 1  ;;  %v1609_v18 = vshrl.u32 %v4923_v7, 16  ;;  %v1611_v16 = vshll.u32 %v4923_v7, 16  ;;  %v4938_v59 = vld [vmem:[#allocation2 + $0xa0] sm:$0xf]  ;;  %v1127_v22 = vsel %vm4552_vm6, %v1119_v2, %v1126_v35  ;;  %2359 = vmatprep.subr.bf16.mxu0 %v5937_v48 }
 0x163   : > { %v1293_v24 = vsel %vm4558_vm7, %v1128_v14, %v1292_v33  ;;  %v1625_v25 = vrot.slane %v1623_v52, 1  ;;  %v1618_v30 = vrot.slane %v1616_v8, 1  ;;  %v4944_v20 = vld [vmem:[#allocation2 + $0xa4] ss:$0 sps:$4 sm:$0x11]   ;;  %v1607_v29 = vsel %vm1511_vm10, %v1602_v42, %v1606_v37  ;;  %v4002_v14 = vld [vmem:[%s5928_s3 + $0x50] sm:$0xff]  }
 0x164   : > { %v4946_v45 = vld [vmem:[#allocation2 + $0x98] ss:$0 sps:$4 sm:$0x11]   ;;  %1291 = vst.msk [vmem:[#allocation2 + $0xc4] sm:$0xf] %vm718_vm0, %v1127_v22  ;;  %v1613_v49 = vrot.slane %v1611_v16, 1  ;;  %1742 = vrot.lane.b32.xlu0 %v1607_v29, %s4165_s23  ;;  %v4956_v33 = vcombine.low %v1315_v12, %v4928_v43  ;;  %v4960_v11 = vcombine.low %v1321_v17, %v4938_v59 }
 0x165   : > { %1294 = vst [vmem:[#allocation2 + $0xc8] sm:$0x1] %v1293_v24  ;;  %v1652_v57 = vshll.u32 %v4926_v9, 16  ;;  %v1319_v2 = vld [vmem:[#allocation2 + $0x90] sm:$0xf]  ;;  %v1626_v62 = vor.u32 %v1625_v25, %v1621_v15  ;;  %v1640_v63 = vshll.u32 %v4917_v36, 16  ;;  %2360 = vmatpush2.bf16.msra.mxu0 %v4002_v14 }
 0x166   : > { %5956 = vst [vmem:[#allocation10_spill] sm:$0xff] %v4956_v33  ;;  %5957 = vst [vmem:[#allocation11_spill] sm:$0xff] %v4960_v11  ;;  %v4962_v37 = vld [vmem:[#allocation2 + $0x94] sm:$0xf]  ;;  %v1614_v60 = vor.u32 %v1613_v49, %v1609_v18  ;;  %v1645_v6 = vshrl.u32 %v4951_v53, 16  ;;  %v1647_v8 = vshll.u32 %v4951_v53, 16  ;;  %2361 = vmatprep.subr.bf16.mxu0 %v5937_v48 }
 0x167   : > { %v4964_v3 = vld [vmem:[#allocation2 + $0xbc] ss:$0 sps:$4 sm:$0x11]   ;;  %v1654_v13 = vrot.slane %v1652_v57, 1  ;;  %v1325_v35 = vld [vmem:[#allocation2 + $0xb4] sm:$0xf]  ;;  %v1631_v15 = vsel %vm1511_vm10, %v1626_v62, %v1630_v47  ;;  %v4989_v57 = vcombine.low %v1319_v2, %v4962_v37 }
 0x168   : > { %v4969_v12 = vld [vmem:[#allocation2 + $0x8] ss:$0 sps:$4 sm:$0x11]   ;;  %v1633_v52 = vshrl.u32 %v4956_v33, 16  ;;  %v1635_v17 = vshll.u32 %v4956_v33, 16  ;;  %v1642_v42 = vrot.slane %v1640_v63, 1  ;;  %v1619_v16 = vsel %vm1511_vm10, %v1614_v60, %v1618_v30  ;;  %1746 = vrot.lane.b32.xlu0 %v1631_v15, %s4165_s23 }
 0x169   : > { %v4977_v18 = vld [vmem:[#allocation2 + $0xb8] sm:$0xf]  ;;  %v1649_v22 = vrot.slane %v1647_v8, 1  ;;  %v1669_v24 = vshrl.u32 %v4960_v11, 16  ;;  %v1671_v25 = vshll.u32 %v4960_v11, 16  ;;  %v4003_v29 = vld [vmem:[%s5928_s3 + $0x48] sm:$0xff]   ;;  %1744 = vrot.lane.b32.xlu1 %v1619_v16, %s4165_s23 }
 0x16a   : > { %v1637_v47 = vrot.slane %v1635_v17, 1  ;;  %v1676_v49 = vshll.u32 %v4944_v20, 16  ;;  %5958 = vst [vmem:[#allocation12_spill] sm:$0xff] %v4989_v57  ;;  %v1664_v30 = vshll.u32 %v4946_v45, 16  ;;  %v1323_v62 = vld [vmem:[#allocation2 + $0xa8] sm:$0xf]  ;;  %v4995_v14 = vcombine.low %v1325_v35, %v4977_v18  ;;  %2362 = vmatpush2.bf16.msra.mxu0 %v4003_v29 }
 0x16b   : > { %v4992_v63 = vld [vmem:[#allocation2 + $0xb0] ss:$0 sps:$4 sm:$0x11]   ;;  %v1650_v60 = vor.u32 %v1649_v22, %v1645_v6  ;;  %v1673_v8 = vrot.slane %v1671_v25, 1  ;;  %v1700_v15 = vshll.u32 %v4964_v3, 16  ;;  %v1657_v11 = vshrl.u32 %v4989_v57, 16 }
 0x16c   : > { %5959 = vst [vmem:[#allocation13_spill] sm:$0xff] %v4995_v14  ;;  %v4998_v23 = vld [vmem:[#allocation2 + $0xac] sm:$0xf]  ;;  %v1327_v17 = vld [vmem:[#allocation2 + $0xc0] sm:$0xf]  ;;  %v1638_v16 = vor.u32 %v1637_v47, %v1633_v52  ;;  %v1678_v2 = vrot.slane %v1676_v49, 1 }
 0x16d   : > { %v1659_v53 = vshll.u32 %v4989_v57, 16  ;;  %v5003_v33 = vld [vmem:[#allocation2 + $0xc4] sm:$0xf]  ;;  %v1655_v6 = vsel %vm1511_vm10, %v1650_v60, %v1654_v13  ;;  %v1674_v22 = vor.u32 %v1673_v8, %v1669_v24  ;;  %v1666_v35 = vrot.slane %v1664_v30, 1 }
 0x16e   : > { %v1520_v25 = vshll.u32 %v4969_v12, 16  ;;  %1750 = vrot.lane.b32.xlu0 %v1655_v6, %s4165_s23  ;;  %v1643_v38 = vsel %vm1511_vm10, %v1638_v16, %v1642_v42  ;;  %v1693_v52 = vshrl.u32 %v4995_v14, 16  ;;  %v1695_v47 = vshll.u32 %v4995_v14, 16  ;;  %v5011_v49 = vld [vmem:[#allocation2 + $0xc8] ss:$0 sps:$4 sm:$0x11]  }
 0x16f   : > { %v1661_v48 = vrot.slane %v1659_v53, 1  ;;  %v5960_v57 = vmov 0   ;;  %1748 = vrot.lane.b32.xlu1 %v1643_v38, %s4165_s23  ;;  %v1679_v13 = vsel %vm1511_vm10, %v1674_v22, %v1678_v2  ;;  %v5017_v24 = vcombine.low %v1323_v62, %v4998_v23  ;;  %v4006_v53 = vld [vmem:[%s5928_s3 + $0x40] sm:$0xff]  }
 0x170   : > { %2363 = vmatprep.subr.bf16.mxu0 %v5960_v57  ;;  %v1688_v29 = vshll.u32 %v4992_v63, 16  ;;  %v5021_v42 = vcombine.low %v1327_v17, %v5003_v33  ;;  %v1697_v60 = vrot.slane %v1695_v47, 1  ;;  %v1702_v8 = vrot.slane %v1700_v15, 1  ;;  %v1352_v15 = vld [vmem:[#allocation2 + $0x24] sm:$0xe] }
 0x171   : > { %5961 = vst [vmem:[#allocation14_spill] sm:$0xff] %v5017_v24  ;;  %v1662_v30 = vor.u32 %v1661_v48, %v1657_v11  ;;  %v1712_v16 = vshll.u32 %v5011_v49, 16  ;;  %v1681_v38 = vshrl.u32 %v5017_v24, 16  ;;  %v1683_v2 = vshll.u32 %v5017_v24, 16  ;;  %2364 = vmatpush2.bf16.msra.mxu0 %v4006_v53 }
 0x172   : > { %v5962_v62 = vshrl.u32 %v4512_v4, 16  ;;  %v1522_v22 = vrot.slane %v1520_v25, 1  ;;  %1754 = vrot.lane.b32.xlu0 %v1679_v13, %s4165_s23  ;;  %v1698_v14 = vor.u32 %v1697_v60, %v1693_v52  ;;  %v1705_v48 = vshrl.u32 %v5021_v42, 16 }
 0x173   : > { %v1667_v17 = vsel %vm1511_vm10, %v1662_v30, %v1666_v35  ;;  %v1707_v11 = vshll.u32 %v5021_v42, 16  ;;  %v1685_v47 = vrot.slane %v1683_v2, 1  ;;  %v1690_v24 = vrot.slane %v1688_v29, 1  ;;  %v1358_v2 = vld [vmem:[#allocation2 + $0x6c] sm:$0xe] }
 0x174   : > { %v1518_v6 = vor.u32 %v4538_v41, %v5962_v62  ;;  %1752 = vrot.lane.b32.xlu1 %v1667_v17, %s4165_s23  ;;  %v1714_v56 = vrot.slane %v1712_v16, 1  ;;  %v3538_v4 = vcombine.low %v1352_v15, %v4718_v46  ;;  %v1353_v41 = vld [vmem:[#allocation2 + $0x30] sm:$0xe]  ;;  %v1703_v25 = vsel %vm1511_vm10, %v1698_v14, %v1702_v8  ;;  %v1354_v17 = vld [vmem:[#allocation2 + $0x3c] sm:$0xe] }
 0x175   : > { %v1709_v53 = vrot.slane %v1707_v11, 1  ;;  %v1829_v13 = vrot.slane %v4735_v31, 1  ;;  %v3539_v35 = vcombine.low %v1353_v41, %v4776_v50  ;;  %v1686_v52 = vor.u32 %v1685_v47, %v1681_v38  ;;  %v1355_v8 = vld [vmem:[#allocation2 + $0x48] sm:$0xe]  ;;  %v1349_v47 = vld [vmem:[#allocation2] sm:$0xe] }
 0x176   : > { %v1523_v30 = vsel %vm1511_vm10, %v1518_v6, %v1522_v22  ;;  %v1828_v60 = vrot.slane %v3538_v4, 1  ;;  %v1832_v62 = vrot.slane %v4782_v32, 1  ;;  %1758 = vrot.lane.b32.xlu0 %v1703_v25, %s4165_s23  ;;  %v3540_v46 = vcombine.low %v1354_v17, %v4813_v55  ;;  %v1356_v32 = vld [vmem:[#allocation2 + $0x54] sm:$0xe] }
 0x177   : > { %v1710_v29 = vor.u32 %v1709_v53, %v1705_v48  ;;  %v1831_v16 = vrot.slane %v3539_v35, 1  ;;  %v1835_v14 = vrot.slane %v4826_v27, 1  ;;  %v1691_v31 = vsel %vm1511_vm10, %v1686_v52, %v1690_v24  ;;  %v1357_v24 = vld [vmem:[#allocation2 + $0x60] sm:$0xe]  ;;  %v1359_v48 = vld [vmem:[#allocation2 + $0x78] sm:$0xe] }
 0x178   : > { %v5048_v50 = vsel %vm1818_vm8, %v1828_v60, %v1829_v13  ;;  %v3541_v38 = vcombine.low %v1355_v8, %v4854_v28  ;;  %v1838_v4 = vrot.slane %v4857_v19, 1  ;;  %1756 = vrot.lane.b32.xlu1 %v1691_v31, %s4165_s23  ;;  %v1834_v27 = vrot.slane %v3540_v46, 1  ;;  %v1360_v53 = vld [vmem:[#allocation2 + $0x84] sm:$0xe]  ;;  %v1361_v35 = vld [vmem:[#allocation2 + $0x90] sm:$0xe] }
 0x179   : > { %v1715_v6 = vsel %vm1511_vm10, %v1710_v29, %v1714_v56  ;;  %v5055_v55 = vsel %vm1818_vm8, %v1831_v16, %v1832_v62  ;;  %v3542_v22 = vcombine.low %v1356_v32, %v4872_v54  ;;  %v1841_v15 = vrot.slane %v4876_v26, 1  ;;  %v4035_v60 = vld [vmem:[#allocation2 + $0x4] sm:$0xf]  ;;  %v1362_v62 = vld [vmem:[#allocation2 + $0x9c] sm:$0xe] }
 0x17a   : > { %v1837_v11 = vrot.slane %v3541_v38, 1  ;;  %v3543_v28 = vcombine.low %v1357_v24, %v4903_v58  ;;  %v1844_v19 = vrot.slane %v4899_v5, 1  ;;  %1728 = vrot.lane.b32.xlu0 %v1523_v30, %s4165_s23  ;;  %v5063_v56 = vsel %vm1818_vm8, %v1834_v27, %v1835_v14  ;;  %v1363_v16 = vld [vmem:[#allocation2 + $0xa8] sm:$0xe]  ;;  %v1364_v38 = vld [vmem:[#allocation2 + $0xb4] sm:$0xe] }
 0x17b   : > { %v1840_v41 = vrot.slane %v3542_v22, 1  ;;  %v3544_v25 = vcombine.low %v1358_v2, %v4892_v34  ;;  %v1847_v54 = vrot.slane %v4886_v61, 1  ;;  %v3545_v58 = vcombine.low %v1359_v48, %v4928_v43  ;;  %v1365_v2 = vld [vmem:[#allocation2 + $0xc0] sm:$0xe] }
 0x17c   : > { %v5068_v13 = vsel %vm1818_vm8, %v1837_v11, %v1838_v4  ;;  %v1843_v26 = vrot.slane %v3543_v28, 1  ;;  %v1850_v5 = vrot.slane %v4917_v36, 1  ;;  %1760 = vrot.lane.b32.xlu1 %v1715_v6, %s4165_s23  ;;  %v3535_v34 = vcombine.low %v1349_v47, %v4035_v60  ;;  %v1351_v47 = vld [vmem:[#allocation2 + $0x18] sm:$0xe] }
 0x17d   : > { %v5074_v52 = vsel %vm1818_vm8, %v1840_v41, %v1841_v15  ;;  %v1846_v30 = vrot.slane %v3544_v25, 1  ;;  %v1820_v61 = vrot.slane %v4969_v12, 1  ;;  %v1849_v29 = vrot.slane %v3545_v58, 1  ;;  %v4036_v41 = vld [vmem:[#allocation2 + $0x1c] sm:$0xf] }
 0x17e   : > { %v5078_v17 = vsel %vm1818_vm8, %v1843_v26, %v1844_v19  ;;  %v3546_v43 = vcombine.low %v1360_v53, %v4915_v21  ;;  %v1853_v36 = vrot.slane %v4926_v9, 1  ;;  %v1819_v14 = vrot.slane %v3535_v34, 1  ;;  %v3983_v53 = vld [vmem:[%s5928_s3 + $0xf8] sm:$0xff]  }
 0x17f   : > { %v5083_v46 = vsel %vm1818_vm8, %v1846_v30, %v1847_v54  ;;  %v3547_v8 = vcombine.low %v1361_v35, %v4962_v37  ;;  %v1856_v31 = vrot.slane %v4946_v45, 1  ;;  %v5088_v12 = vsel %vm1818_vm8, %v1849_v29, %v1850_v5  ;;  %v4037_v54 = vld [vmem:[#allocation2 + $0x20] ss:$0 sps:$4 sm:$0x11]   ;;  %v3984_v35 = vld [vmem:[%s5928_s3 + $0xf0] sm:$0xff]  }
 0x180   : > { %v1852_v4 = vrot.slane %v3546_v43, 1  ;;  %v3548_v32 = vcombine.low %v1362_v62, %v4938_v59  ;;  %v1859_v21 = vrot.slane %v4944_v20, 1  ;;  %v1821_v9 = vsel %vm1818_vm8, %v1819_v14, %v1820_v61  ;;  %v3989_v30 = vld [vmem:[%s5928_s3 + $0xe0] sm:$0xff]   ;;  %v3995_v61 = vld [vmem:[%s5928_s3 + $0xd8] sm:$0xff]   ;;  %v1329_v62 = vld [vmem:[#allocation2 + $0xcc] sm:$0xf] }
 0x181   : > { %v1855_v6 = vrot.slane %v3547_v8, 1  ;;  %v3549_v27 = vcombine.low %v1363_v16, %v4998_v23  ;;  %v1862_v22 = vrot.slane %v4992_v63, 1  ;;  %3617 = vmatprep.mubr.msk.bf16.mxu0 %vm1873_vm9, %v1821_v9  ;;  %v3550_v24 = vcombine.low %v1364_v38, %v4977_v18  ;;  %v5154_v29 = vld [vmem:[#allocation2 + $0xd0] sm:$0xf] }
 0x182   : > { %v5097_v45 = vsel %vm1818_vm8, %v1852_v4, %v1853_v36  ;;  %v1858_v37 = vrot.slane %v3548_v32, 1  ;;  %v1865_v59 = vrot.slane %v4964_v3, 1  ;;  %v3551_v11 = vcombine.low %v1365_v2, %v5003_v33  ;;  %v4000_v36 = vld [vmem:[%s5928_s3 + $0xd0] sm:$0xff]   ;;  %v4004_v32 = vld [vmem:[%s5928_s3 + $0xc8] sm:$0xff]  }
 0x183   : > { %v5102_v20 = vsel %vm1818_vm8, %v1855_v6, %v1856_v31  ;;  %v1861_v48 = vrot.slane %v3549_v27, 1  ;;  %v1868_v23 = vrot.slane %v5011_v49, 1  ;;  %v1864_v15 = vrot.slane %v3550_v24, 1  ;;  %v4009_v6 = vld [vmem:[%s5928_s3 + $0xc0] sm:$0xff]   ;;  %v4013_v27 = vld [vmem:[%s5928_s3 + $0x110] sm:$0xff]   ;;  %v4016_v24 = vld [vmem:[%s5928_s3 + $0x108] sm:$0xff]  }
 0x184   : > { %v5107_v63 = vsel %vm1818_vm8, %v1858_v37, %v1859_v21  ;;  %v1867_v19 = vrot.slane %v3551_v11, 1  ;;  %v3537_v25 = vcombine.low %v1351_v47, %v4036_v41  ;;  %v1826_v49 = vrot.slane %v4037_v54, 1  ;;  %v5963_v54 = vld [vmem:[#allocation8_spill] sm:$0xff] }
 0x185   : > { %v5110_v28 = vsel %vm1818_vm8, %v1861_v48, %v1862_v22  ;;  %v5113_v18 = vsel %vm1818_vm8, %v1864_v15, %v1865_v59  ;;  %v5157_v43 = vcombine.low %v1329_v62, %v5154_v29  ;;  %v5967_v62 = vld [vmem:[#allocation9_spill] sm:$0xff] }
 0x186   : > { %v5116_v3 = vsel %vm1818_vm8, %v1867_v19, %v1868_v23  ;;  %v1825_v33 = vrot.slane %v3537_v25, 1 }
 0x187   : > { %v1717_v16 = vshrl.u32 %v5157_v43, 16  ;;  %v1719_v14 = vshll.u32 %v5157_v43, 16 }
 0x188   : > { %v5127_v5 = vsel %vm1818_vm8, %v1825_v33, %v1826_v49 }
 0x189   : > { %v1721_v31 = vrot.slane %v1719_v14, 1 }
 0x18b   : > { %v1722_v2 = vor.u32 %v1721_v31, %v1717_v16  ;;  %v5968_v16 = vld [vmem:[#allocation12_spill] sm:$0xff] }
 0x19b   : > { %v1731_v26 = vpop.permute.xlu0 %1730 }
 0x19c   : > { %v5123_v58 = vsel %vm1873_vm9, %v4625_v39, %v1731_v26  ;;  %v3986_v39 = vld [vmem:[%s5928_s3 + $0xe8] sm:$0xff]  }
 0x19d   : > { %2130 = vmatmul.mubr.bf16.vlgmr.msra.gmra.mxu1 %v5123_v58 }
 0x19e   : > { %2595 = vmatpush1.bf16.msra.mxu1 %v3983_v53  ;;  %3590 = vmatprep.mubr.msk.bf16.mxu1 %vm1873_vm9, %v5127_v5  ;;  %v5964_v53 = vld [vmem:[#allocation6_spill] sm:$0xff] }
 0x19f   : > { %2596 = vmatprep.subr.bf16.mxu1 %v5960_v57 }
 0x1a2   : > { %2597 = vmatpush1.bf16.msra.mxu1 %v3984_v35 }
 0x1a3   : > { %2598 = vmatprep.subr.bf16.mxu1 %v5960_v57 }
 0x1a6   : > { %2599 = vmatpush1.bf16.msra.mxu1 %v3986_v39  ;;  %v5966_v39 = vld [vmem:[#allocation10_spill] sm:$0xff] }
 0x1a7   : > { %2600 = vmatprep.subr.bf16.mxu1 %v5960_v57 }
 0x1aa   : > { %v1733_v60 = vpop.permute.xlu0 %1732  ;;  %2601 = vmatpush1.bf16.msra.mxu1 %v3989_v30 }
 0x1ab   : > { %v5145_v34 = vsel %vm1873_vm9, %v4693_v51, %v1733_v60  ;;  %2602 = vmatprep.subr.bf16.mxu1 %v5960_v57  ;;  %v5159_v51 = vld [vmem:[#allocation2 + $0xd4] ss:$0 sps:$4 sm:$0x11]   ;;  %v4021_v60 = vld [vmem:[%s5930_s5 + $0x30] ss:$8 sps:$4 sm:$0xff]  }
 0x1ac   : > { %2138 = vmatmul.mubr.bf16.gmra.mxu1 %v5145_v34  ;;  %v1724_v8 = vshll.u32 %v5159_v51, 16 }
 0x1ad   : > { %3591 = vmatprep.mubr.msk.bf16.mxu1 %vm1873_vm9, %v5048_v50 }
 0x1ae   : > { %2603 = vmatpush1.bf16.msra.mxu1 %v3995_v61  ;;  %v1726_v38 = vrot.slane %v1724_v8, 1  ;;  %v4023_v61 = vld [vmem:[%s5930_s5 + $0x34] ss:$8 sps:$4 sm:$0xff]   ;;  %v5969_v8 = vld [vmem:[#allocation11_spill] sm:$0xff] }
 0x1af   : > { %2604 = vmatprep.subr.bf16.mxu1 %v5960_v57  ;;  %2990 = vmatprep.subr.bf16.mxu0 %v4023_v61 }
 0x1b0   : > { %v1727_v9 = vsel %vm1511_vm10, %v1722_v2, %v1726_v38  ;;  %v4024_v2 = vld [vmem:[%s5930_s5 + $0x20] ss:$8 sps:$4 sm:$0xff]  }
 0x1b1   : > { %1762 = vrot.lane.b32.xlu1 %v1727_v9, %s4165_s23  ;;  %v4026_v9 = vld [vmem:[%s5930_s5 + $0x24] ss:$8 sps:$4 sm:$0xff]   ;;  %s5685_s23 = scalar_lea.vmem [#allocation3], %s3447_s19 }
 0x1b2   : > { %2605 = vmatpush1.bf16.msra.mxu1 %v4000_v36  ;;  %s3381_s22 = sshll.u32 %s5685_s23, 4  ;;  %s5879_s22 = int_to_ptr.vmem [resolvable:$true] %s3381_s22 }
 0x1b3   : > { %v1735_v4 = vpop.permute.xlu1 %1734  ;;  %2606 = vmatprep.subr.bf16.mxu1 %v5960_v57  ;;  %s4102_s13 = scalar_lea.vmem %s5879_s22, 8192 }
 0x1b4   : > { %v5173_v21 = vsel %vm1873_vm9, %v4731_v10, %v1735_v4  ;;  %v4011_v10 = vld [vmem:[%s5928_s3 + $0x118] sm:$0xff]   ;;  %p4103_p11 = scmp.ne.s32.totalorder %s5879_s22, %s4102_s13 }
 0x1b5   : > { %2146 = vmatmul.mubr.bf16.gmra.mxu1 %v5173_v21  ;;  %v5970_v4 = vld [vmem:[#allocation14_spill] sm:$0xff] }
 0x1b6   : > { %3592 = vmatprep.mubr.msk.bf16.mxu1 %vm1873_vm9, %v5055_v55  ;;  %2607 = vmatpush1.bf16.msra.mxu1 %v4004_v32  ;;  %p4104_p12 = pnand %p4103_p11, %p4247_p5 }
 0x1b7   : > { %2608 = vmatprep.subr.bf16.mxu1 %v5960_v57 }
 0x1b8   : > { %p4105_p13 = pneg %p4104_p12 }
 0x1ba   : > { %2609 = vmatpush1.bf16.msra.mxu1 %v4009_v6  ;;  %v5971_v6 = vld [vmem:[#allocation13_spill] sm:$0xff] }
 0x1bb   : > { %2618 = vmatprep.subr.bf16.mxu1 %v5960_v57 }
 0x1be   : > { %2619 = vmatpush2.bf16.msra.mxu1 %v4011_v10 }
 0x1bf   : > { %2620 = vmatprep.subr.bf16.mxu1 %v5960_v57 }
 0x1c1   : > { %v1737_v22 = vpop.permute.xlu1 %1736 }
 0x1c2   : > { %v5195_v37 = vsel %vm1873_vm9, %v4798_v0, %v1737_v22  ;;  %2621 = vmatpush2.bf16.msra.mxu1 %v4013_v27  ;;  %v4018_v0 = vld [vmem:[%s5928_s3 + $0x100] sm:$0xff]  }
 0x1c3   : > { %2154 = vmatmul.mubr.bf16.gmra.mxu1 %v5195_v37  ;;  %2622 = vmatprep.subr.bf16.mxu1 %v5960_v57 }
 0x1c4   : > { %3593 = vmatprep.mubr.msk.bf16.mxu1 %vm1873_vm9, %v5063_v56 }
 0x1c6   : > { %2623 = vmatpush2.bf16.msra.mxu1 %v4016_v24 }
 0x1c7   : > { %2624 = vmatprep.subr.bf16.mxu1 %v5960_v57 }
 0x1ca   : > { %v1739_v59 = vpop.permute.xlu0 %1738  ;;  %2625 = vmatpush2.bf16.msra.mxu1 %v4018_v0 }
 0x1cb   : > { %v5210_v48 = vsel %vm1873_vm9, %v4833_v40, %v1739_v59 }
 0x1cc   : > { %2162 = vmatmul.mubr.bf16.gmra.mxu1 %v5210_v48 }
 0x1cd   : > { %3594 = vmatprep.mubr.msk.bf16.mxu1 %vm1873_vm9, %v5068_v13 }
 0x1d1   : > { %v1741_v11 = vpop.permute.xlu1 %1740 }
 0x1d2   : > { %v5217_v23 = vsel %vm1873_vm9, %v4870_v44, %v1741_v11 }
 0x1d4   : > { %2170 = vmatmul.mubr.bf16.gmra.mxu1 %v5217_v23 }
 0x1d5   : > { %3595 = vmatprep.mubr.msk.bf16.mxu1 %vm1873_vm9, %v5074_v52 }
 0x1d6   : > { %v1743_v15 = vpop.permute.xlu0 %1742 }
 0x1d7   : > { %v5224_v40 = vsel %vm1873_vm9, %v4890_v1, %v1743_v15 }
 0x1da   : > { %v1747_v19 = vpop.permute.xlu0 %1746 }
 0x1db   : > { %v1745_v47 = vpop.permute.xlu1 %1744  ;;  %v5238_v49 = vsel %vm1873_vm9, %v5963_v54, %v1747_v19 }
 0x1dc   : > { %2178 = vmatmul.mubr.bf16.gmra.mxu1 %v5224_v40  ;;  %v5231_v44 = vsel %vm1873_vm9, %v4923_v7, %v1745_v47  ;;  %v5965_v7 = vld [vmem:[#allocation7_spill] sm:$0xff] }
 0x1dd   : > { %3596 = vmatprep.mubr.msk.bf16.mxu1 %vm1873_vm9, %v5078_v17 }
 0x1e0   : > { %v1751_v41 = vpop.permute.xlu0 %1750 }
 0x1e1   : > { %v1749_v35 = vpop.permute.xlu1 %1748  ;;  %v5265_v36 = vsel %vm1873_vm9, %v5967_v62, %v1751_v41 }
 0x1e2   : > { %v5249_v30 = vsel %vm1873_vm9, %v5966_v39, %v1749_v35 }
 0x1e4   : > { %v1755_v25 = vpop.permute.xlu0 %1754  ;;  %2186 = vmatmul.mubr.bf16.gmra.mxu1 %v5231_v44 }
 0x1e5   : > { %3597 = vmatprep.mubr.msk.bf16.mxu1 %vm1873_vm9, %v5083_v46  ;;  %v5285_v31 = vsel %vm1873_vm9, %v5969_v8, %v1755_v25  ;;  %v1871_v25 = vrot.slane %v5159_v51, 1 }
 0x1e8   : > { %v1759_v1 = vpop.permute.xlu0 %1758 }
 0x1e9   : > { %v5311_v10 = vsel %vm1873_vm9, %v5971_v6, %v1759_v1 }
 0x1ec   : > { %v1729_v33 = vpop.permute.xlu0 %1728  ;;  %2194 = vmatmul.mubr.bf16.gmra.mxu1 %v5238_v49 }
 0x1ed   : > { %v1875_v26 = vsel %vm1873_vm9, %v5964_v53, %v1729_v33  ;;  %3598 = vmatprep.mubr.msk.bf16.mxu1 %vm1873_vm9, %v5088_v12 }
 0x1ee   : > { %2366 = vmatmul.mubr.bf16.vlgmr.msra.gmra.mxu0 %v1875_v26 }
 0x1ef   : > { %3618 = vmatprep.mubr.msk.bf16.mxu0 %vm1873_vm9, %v5965_v7  ;;  %2991 = vmatpush1.bf16.msra.mxu0 %v4021_v60 }
 0x1f0   : > { %2992 = vmatprep.subr.bf16.mxu0 %v4026_v9 }
 0x1f3   : > { %2993 = vmatpush1.bf16.msra.mxu0 %v4024_v2 }
 0x1f4   : > { %2202 = vmatmul.mubr.bf16.gmra.mxu1 %v5249_v30 }
 0x1f5   : > { %3599 = vmatprep.mubr.msk.bf16.mxu1 %vm1873_vm9, %v5097_v45 }
 0x1f6   : > { %2374 = vmatmul.mubr.bf16.gmra.mxu0 %v5123_v58  ;;  %v1753_v58 = vpop.permute.xlu1 %1752 }
 0x1f7   : > { %3619 = vmatprep.mubr.msk.bf16.mxu0 %vm1873_vm9, %v5127_v5  ;;  %v5275_v14 = vsel %vm1873_vm9, %v5968_v16, %v1753_v58 }
 0x1fa   : > { %v1757_v38 = vpop.permute.xlu1 %1756 }
 0x1fb   : > { %v5295_v32 = vsel %vm1873_vm9, %v5970_v4, %v1757_v38 }
 0x1fc   : > { %2210 = vmatmul.mubr.bf16.gmra.mxu1 %v5265_v36 }
 0x1fd   : > { %3600 = vmatprep.mubr.msk.bf16.mxu1 %vm1873_vm9, %v5102_v20 }
 0x1fe   : > { %2382 = vmatmul.mubr.bf16.gmra.mxu0 %v5145_v34  ;;  %v1761_v27 = vpop.permute.xlu1 %1760 }
 0x1ff   : > { %3620 = vmatprep.mubr.msk.bf16.mxu0 %vm1873_vm9, %v5048_v50  ;;  %v5321_v22 = vsel %vm1873_vm9, %v5021_v42, %v1761_v27  ;;  %v4028_v42 = vld [vmem:[%s5930_s5 + $0x10] ss:$8 sps:$4 sm:$0xff]  }
 0x204   : > { %2218 = vmatmul.mubr.bf16.gmra.mxu1 %v5275_v14 }
 0x205   : > { %3601 = vmatprep.mubr.msk.bf16.mxu1 %vm1873_vm9, %v5107_v63 }
 0x206   : > { %2390 = vmatmul.mubr.bf16.gmra.mxu0 %v5173_v21 }
 0x207   : > { %3621 = vmatprep.mubr.msk.bf16.mxu0 %vm1873_vm9, %v5055_v55 }
 0x20c   : > { %2226 = vmatmul.mubr.bf16.gmra.mxu1 %v5285_v31 }
 0x20d   : > { %3602 = vmatprep.mubr.msk.bf16.mxu1 %vm1873_vm9, %v5110_v28 }
 0x20e   : > { %2398 = vmatmul.mubr.bf16.gmra.mxu0 %v5195_v37 }
 0x20f   : > { %3622 = vmatprep.mubr.msk.bf16.mxu0 %vm1873_vm9, %v5063_v56 }
 0x214   : > { %2234 = vmatmul.mubr.bf16.gmra.mxu1 %v5295_v32 }
 0x215   : > { %3603 = vmatprep.mubr.msk.bf16.mxu1 %vm1873_vm9, %v5113_v18 }
 0x216   : > { %2406 = vmatmul.mubr.bf16.gmra.mxu0 %v5210_v48 }
 0x217   : > { %3623 = vmatprep.mubr.msk.bf16.mxu0 %vm1873_vm9, %v5068_v13 }
 0x21c   : > { %2242 = vmatmul.mubr.bf16.gmra.mxu1 %v5311_v10 }
 0x21d   : > { %3604 = vmatprep.mubr.msk.bf16.mxu1 %vm1873_vm9, %v5116_v3 }
 0x21e   : > { %2414 = vmatmul.mubr.bf16.gmra.mxu0 %v5217_v23 }
 0x21f   : > { %3624 = vmatprep.mubr.msk.bf16.mxu0 %vm1873_vm9, %v5074_v52 }
 0x224   : > { %2250 = vmatmul.mubr.bf16.gmra.mxu1 %v5321_v22 }
 0x225   : > { %3669 = vmatprep.mubr.msk.bf16.mxu1 %vm1873_vm9, %v5127_v5 }
 0x226   : > { %2422 = vmatmul.mubr.bf16.gmra.mxu0 %v5224_v40 }
 0x227   : > { %3625 = vmatprep.mubr.msk.bf16.mxu0 %vm1873_vm9, %v5078_v17 }
 0x22c   : > { %2627 = vmatmul.mubr.bf16.vlgmr.msra.gmra.mxu1 %v5145_v34 }
 0x22d   : > { %3670 = vmatprep.mubr.msk.bf16.mxu1 %vm1873_vm9, %v5048_v50  ;;  %v4030_v50 = vld [vmem:[%s5930_s5 + $0x14] ss:$8 sps:$4 sm:$0xff]  }
 0x22e   : > { %2430 = vmatmul.mubr.bf16.gmra.mxu0 %v5231_v44  ;;  %2994 = vmatprep.subr.bf16.mxu0 %v4030_v50 }
 0x22f   : > { %3626 = vmatprep.mubr.msk.bf16.mxu0 %vm1873_vm9, %v5083_v46  ;;  %2995 = vmatpush1.bf16.msra.mxu0 %v4028_v42 }
 0x234   : > { %2635 = vmatmul.mubr.bf16.gmra.mxu1 %v5173_v21 }
 0x235   : > { %3671 = vmatprep.mubr.msk.bf16.mxu1 %vm1873_vm9, %v5055_v55  ;;  %v4031_v55 = vld [vmem:[%s5930_s5] ss:$8 sps:$4 sm:$0xff]  }
 0x236   : > { %2438 = vmatmul.mubr.bf16.gmra.mxu0 %v5238_v49 }
 0x237   : > { %3627 = vmatprep.mubr.msk.bf16.mxu0 %vm1873_vm9, %v5088_v12 }
 0x23c   : > { %2643 = vmatmul.mubr.bf16.gmra.mxu1 %v5195_v37 }
 0x23d   : > { %3672 = vmatprep.mubr.msk.bf16.mxu1 %vm1873_vm9, %v5063_v56  ;;  %v4033_v56 = vld [vmem:[%s5930_s5 + $0x4] ss:$8 sps:$4 sm:$0xff]  }
 0x23e   : > { %2446 = vmatmul.mubr.bf16.gmra.mxu0 %v5249_v30  ;;  %2996 = vmatprep.subr.bf16.mxu0 %v4033_v56 }
 0x23f   : > { %3628 = vmatprep.mubr.msk.bf16.mxu0 %vm1873_vm9, %v5097_v45  ;;  %2997 = vmatpush1.bf16.msra.mxu0 %v4031_v55 }
 0x244   : > { %2651 = vmatmul.mubr.bf16.gmra.mxu1 %v5210_v48 }
 0x245   : > { %3673 = vmatprep.mubr.msk.bf16.mxu1 %vm1873_vm9, %v5068_v13 }
 0x246   : > { %2454 = vmatmul.mubr.bf16.gmra.mxu0 %v5265_v36 }
 0x247   : > { %3629 = vmatprep.mubr.msk.bf16.mxu0 %vm1873_vm9, %v5102_v20 }
 0x24c   : > { %2659 = vmatmul.mubr.bf16.gmra.mxu1 %v5217_v23 }
 0x24d   : > { %3674 = vmatprep.mubr.msk.bf16.mxu1 %vm1873_vm9, %v5074_v52 }
 0x24e   : > { %2462 = vmatmul.mubr.bf16.gmra.mxu0 %v5275_v14 }
 0x24f   : > { %3630 = vmatprep.mubr.msk.bf16.mxu0 %vm1873_vm9, %v5107_v63 }
 0x254   : > { %2667 = vmatmul.mubr.bf16.gmra.mxu1 %v5224_v40  ;;  %v1366_v40 = vld [vmem:[#allocation2 + $0xcc] sm:$0xe] }
 0x255   : > { %3675 = vmatprep.mubr.msk.bf16.mxu1 %vm1873_vm9, %v5078_v17  ;;  %v3552_v47 = vcombine.low %v1366_v40, %v5154_v29 }
 0x256   : > { %2470 = vmatmul.mubr.bf16.gmra.mxu0 %v5285_v31 }
 0x257   : > { %3631 = vmatprep.mubr.msk.bf16.mxu0 %vm1873_vm9, %v5110_v28 }
 0x25c   : > { %2675 = vmatmul.mubr.bf16.gmra.mxu1 %v5231_v44  ;;  %v1870_v44 = vrot.slane %v3552_v47, 1 }
 0x25d   : > { %3676 = vmatprep.mubr.msk.bf16.mxu1 %vm1873_vm9, %v5083_v46  ;;  %v5383_v13 = vpop.f32.mrf.mxu1 }
 0x25e   : > { %2478 = vmatmul.mubr.bf16.gmra.mxu0 %v5295_v32  ;;  %v1872_v33 = vsel %vm1818_vm8, %v1870_v44, %v1871_v25 }
 0x25f   : > { %3632 = vmatprep.mubr.msk.bf16.mxu0 %vm1873_vm9, %v5113_v18  ;;  %v2133_v52 = vpop.f32.mrf.mxu1 }
 0x261   : > { %v5385_v17 = vpop.f32.mrf.mxu1 }
 0x263   : > { %v2136_v5 = vpop.f32.mrf.mxu1 }
 0x264   : > { %2683 = vmatmul.mubr.bf16.gmra.mxu1 %v5238_v49  ;;  %v1763_v49 = vpop.permute.xlu1 %1762 }
 0x265   : > { %3677 = vmatprep.mubr.msk.bf16.mxu1 %vm1873_vm9, %v5088_v12 }
 0x266   : > { %2486 = vmatmul.mubr.bf16.gmra.mxu0 %v5311_v10 }
 0x267   : > { %3014 = vmatprep.mubr.bf16.mxu0 %v5960_v57 }
 0x26c   : > { %2691 = vmatmul.mubr.bf16.gmra.mxu1 %v5249_v30  ;;  %v5393_v46 = vpop.f32.mrf.mxu1 }
 0x26d   : > { %3678 = vmatprep.mubr.msk.bf16.mxu1 %vm1873_vm9, %v5097_v45 }
 0x26e   : > { %v2141_v34 = vpop.f32.mrf.mxu1 }
 0x270   : > { %v5397_v21 = vpop.f32.mrf.mxu1 }
 0x272   : > { %v2144_v37 = vpop.f32.mrf.mxu1 }
 0x274   : > { %2699 = vmatmul.mubr.bf16.gmra.mxu1 %v5265_v36 }
 0x275   : > { %3679 = vmatprep.mubr.msk.bf16.mxu1 %vm1873_vm9, %v5102_v20  ;;  %v5402_v24 = vpop.f32.mrf.mxu1 }
 0x277   : > { %v2149_v12 = vpop.f32.mrf.mxu1 }
 0x279   : > { %v5404_v0 = vpop.f32.mrf.mxu1 }
 0x27b   : > { %v2152_v59 = vpop.f32.mrf.mxu1 }
 0x27c   : > { %2707 = vmatmul.mubr.bf16.gmra.mxu1 %v5275_v14 }
 0x27d   : > { %3680 = vmatprep.mubr.msk.bf16.mxu1 %vm1873_vm9, %v5107_v63 }
 0x283   : > { %v2155_v45 = vpop.f32.mrf.mxu1 }
 0x284   : > { %2715 = vmatmul.mubr.bf16.gmra.mxu1 %v5285_v31 }
 0x285   : > { %3681 = vmatprep.mubr.msk.bf16.mxu1 %vm1873_vm9, %v5110_v28  ;;  %v2157_v48 = vpop.f32.mrf.mxu1 }
 0x287   : > { %v5412_v11 = vpop.f32.mrf.mxu1 }
 0x289   : > { %v2160_v20 = vpop.f32.mrf.mxu1 }
 0x28c   : > { %v5414_v23 = vpop.f32.mrf.mxu1  ;;  %2723 = vmatmul.mubr.bf16.gmra.mxu1 %v5295_v32 }
 0x28d   : > { %3682 = vmatprep.mubr.msk.bf16.mxu1 %vm1873_vm9, %v5113_v18 }
 0x28e   : > { %v2165_v15 = vpop.f32.mrf.mxu1 }
 0x290   : > { %v5419_v63 = vpop.f32.mrf.mxu1 }
 0x292   : > { %v2168_v19 = vpop.f32.mrf.mxu1 }
 0x294   : > { %v5422_v41 = vpop.f32.mrf.mxu1  ;;  %2731 = vmatmul.mubr.bf16.gmra.mxu1 %v5311_v10 }
 0x295   : > { %3683 = vmatprep.mubr.msk.bf16.mxu1 %vm1873_vm9, %v5116_v3  ;;  %v1926_v3 = vsel %vm1873_vm9, %v5157_v43, %v1763_v49 }
 0x296   : > { %v2173_v28 = vpop.f32.mrf.mxu1 }
 0x298   : > { %v5428_v1 = vpop.f32.mrf.mxu1 }
 0x29a   : > { %v2176_v18 = vpop.f32.mrf.mxu1 }
 0x29c   : > { %v5431_v54 = vpop.f32.mrf.mxu1  ;;  %2739 = vmatmul.mubr.bf16.gmra.mxu1 %v5321_v22 }
 0x29d   : > { %3684 = vmatprep.mubr.msk.bf16.mxu1 %vm1873_vm9, %v1872_v33 }
 0x29e   : > { %v2181_v29 = vpop.f32.mrf.mxu1 }
 0x2a0   : > { %v5435_v53 = vpop.f32.mrf.mxu1 }
 0x2a2   : > { %v2184_v26 = vpop.f32.mrf.mxu1 }
 0x2a4   : > { %v5439_v51 = vpop.f32.mrf.mxu1  ;;  %2747 = vmatmul.mubr.bf16.gmra.mxu1 %v1926_v3 }
 0x2a6   : > { %v2189_v7 = vpop.f32.mrf.mxu1 }
 0x2a8   : > { %v5441_v35 = vpop.f32.mrf.mxu1 }
 0x2aa   : > { %v2192_v39 = vpop.f32.mrf.mxu1 }
 0x2ac   : > { %v5443_v30 = vpop.f32.mrf.mxu1 }
 0x2ae   : > { %v5445_v60 = vpop.f32.mrf.mxu0  ;;  %v2197_v61 = vpop.f32.mrf.mxu1 }
 0x2b0   : > { %v2369_v62 = vpop.f32.mrf.mxu0  ;;  %v5447_v36 = vpop.f32.mrf.mxu1 }
 0x2b2   : > { %v5449_v58 = vpop.f32.mrf.mxu0  ;;  %v2200_v16 = vpop.f32.mrf.mxu1 }
 0x2b4   : > { %v2372_v43 = vpop.f32.mrf.mxu0  ;;  %v5451_v14 = vpop.f32.mrf.mxu1 }
 0x2b6   : > { %v5453_v8 = vpop.f32.mrf.mxu0  ;;  %v2205_v31 = vpop.f32.mrf.mxu1 }
 0x2b8   : > { %v2377_v38 = vpop.f32.mrf.mxu0  ;;  %v5455_v4 = vpop.f32.mrf.mxu1 }
 0x2ba   : > { %v5457_v32 = vpop.f32.mrf.mxu0  ;;  %v2208_v2 = vpop.f32.mrf.mxu1 }
 0x2bc   : > { %v2380_v9 = vpop.f32.mrf.mxu0  ;;  %v5459_v6 = vpop.f32.mrf.mxu1 }
 0x2be   : > { %v5461_v10 = vpop.f32.mrf.mxu0  ;;  %v2213_v27 = vpop.f32.mrf.mxu1 }
 0x2c0   : > { %v2385_v22 = vpop.f32.mrf.mxu0  ;;  %v5463_v42 = vpop.f32.mrf.mxu1 }
 0x2c2   : > { %v5465_v50 = vpop.f32.mrf.mxu0  ;;  %v2216_v55 = vpop.f32.mrf.mxu1 }
 0x2c4   : > { %v2388_v56 = vpop.f32.mrf.mxu0  ;;  %v5467_v52 = vpop.f32.mrf.mxu1 }
 0x2c6   : > { %v2391_v5 = vpop.f32.mrf.mxu0  ;;  %v2221_v37 = vpop.f32.mrf.mxu1 }
 0x2c7   : > { %v5469_v34 = vadd.f32 %v2391_v5, %v2155_v45 }
 0x2c8   : > { %v2393_v12 = vpop.f32.mrf.mxu0  ;;  %v5471_v59 = vpop.f32.mrf.mxu1 }
 0x2ca   : > { %v5473_v48 = vpop.f32.mrf.mxu0  ;;  %v2224_v20 = vpop.f32.mrf.mxu1 }
 0x2cc   : > { %v2396_v15 = vpop.f32.mrf.mxu0  ;;  %v5475_v40 = vpop.f32.mrf.mxu1 }
 0x2ce   : > { %v2399_v19 = vpop.f32.mrf.mxu0  ;;  %v2229_v28 = vpop.f32.mrf.mxu1 }
 0x2cf   : > { %v5478_v47 = vadd.f32 %v2399_v19, %v5414_v23  ;;  %v2368_v28 = vadd.f32 %v5445_v60, %v5383_v13 }
 0x2d0   : > { %v2401_v44 = vpop.f32.mrf.mxu0  ;;  %v5480_v25 = vpop.f32.mrf.mxu1 }
 0x2d2   : > { %v5482_v45 = vpop.f32.mrf.mxu0  ;;  %v2232_v18 = vpop.f32.mrf.mxu1 }
 0x2d4   : > { %v2404_v33 = vpop.f32.mrf.mxu0  ;;  %v5484_v29 = vpop.f32.mrf.mxu1 }
 0x2d6   : > { %v2407_v49 = vpop.f32.mrf.mxu0  ;;  %v2237_v26 = vpop.f32.mrf.mxu1 }
 0x2d7   : > { %v5487_v3 = vadd.f32 %v2407_v49, %v5422_v41 }
 0x2d8   : > { %v2409_v7 = vpop.f32.mrf.mxu0  ;;  %v5489_v39 = vpop.f32.mrf.mxu1 }
 0x2da   : > { %v5491_v23 = vpop.f32.mrf.mxu0  ;;  %v2240_v61 = vpop.f32.mrf.mxu1 }
 0x2db   : > { %v2371_v61 = vadd.f32 %v5449_v58, %v5385_v17 }
 0x2dc   : > { %v2412_v62 = vpop.f32.mrf.mxu0  ;;  %v5493_v16 = vpop.f32.mrf.mxu1 }
 0x2de   : > { %v2415_v43 = vpop.f32.mrf.mxu0  ;;  %v2245_v38 = vpop.f32.mrf.mxu1 }
 0x2df   : > { %v5496_v31 = vadd.f32 %v2415_v43, %v5431_v54 }
 0x2e0   : > { %v2417_v2 = vpop.f32.mrf.mxu0  ;;  %v5498_v9 = vpop.f32.mrf.mxu1 }
 0x2e2   : > { %v5500_v41 = vpop.f32.mrf.mxu0  ;;  %v2248_v27 = vpop.f32.mrf.mxu1 }
 0x2e4   : > { %v2420_v22 = vpop.f32.mrf.mxu0  ;;  %v5502_v55 = vpop.f32.mrf.mxu1 }
 0x2e6   : > { %v2423_v56 = vpop.f32.mrf.mxu0  ;;  %v2253_v37 = vpop.f32.mrf.mxu1 }
 0x2e7   : > { %v5505_v5 = vadd.f32 %v2423_v56, %v5439_v51  ;;  %v5519_v51 = vld [vmem:[%s5929_s4] ss:$0 sm:$0xff] }
 0x2e8   : > { %v2425_v12 = vpop.f32.mrf.mxu0  ;;  %v5507_v20 = vpop.f32.mrf.mxu1 }
 0x2ea   : > { %v5509_v54 = vpop.f32.mrf.mxu0  ;;  %v2256_v15 = vpop.f32.mrf.mxu1 }
 0x2ec   : > { %v2428_v19 = vpop.f32.mrf.mxu0  ;;  %v2628_v44 = vpop.f32.mrf.mxu1 }
 0x2ed   : > { %v2755_v33 = vadd.f32 %v2628_v44, %v2368_v28  ;;  %v2379_v28 = vadd.f32 %v5457_v32, %v5397_v21 }
 0x2ee   : > { %v2431_v18 = vpop.f32.mrf.mxu0  ;;  %v2630_v26 = vpop.f32.mrf.mxu1 }
 0x2ef   : > { %v5514_v49 = vadd.f32 %v2431_v18, %v5443_v30  ;;  %v2794_v13 = vadd.f32 %v5519_v51, %v2755_v33  ;;  %v2376_v30 = vadd.f32 %v5453_v8, %v5393_v46 }
 0x2f0   : > { %v2433_v7 = vpop.f32.mrf.mxu0  ;;  %v2631_v62 = vpop.f32.mrf.mxu1 }
 0x2f1   : > { %v2756_v60 = vadd.f32 %v2631_v62, %v2371_v61  ;;  %v2826_v37 = vmax.f32 %v2794_v13, 0.0 }
 0x2f2   : > { %v5523_v43 = vpop.f32.mrf.mxu0  ;;  %v2633_v38 = vpop.f32.mrf.mxu1 }
 0x2f3   : > { %v2795_v27 = vadd.f32 %v5519_v51, %v2756_v60 }
 0x2f4   : > { %v2436_v2 = vpop.f32.mrf.mxu0  ;;  %v2636_v22 = vpop.f32.mrf.mxu1 }
 0x2f5   : > { %v2827_v12 = vmax.f32 %v2795_v27, 0.0  ;;  %v2757_v15 = vadd.f32 %v2636_v22, %v2376_v30  ;;  %v2387_v27 = vadd.f32 %v5465_v50, %v5404_v0 }
 0x2f6   : > { %v2439_v56 = vpop.f32.mrf.mxu0  ;;  %v2638_v58 = vpop.f32.mrf.mxu1 }
 0x2f7   : > { %v5530_v17 = vadd.f32 %v2439_v56, %v5451_v14  ;;  %v2858_v44 = vpack.c.bf16 %v2827_v12, %v2826_v37  ;;  %v2796_v46 = vadd.f32 %v5519_v51, %v2757_v15  ;;  %v2384_v14 = vadd.f32 %v5461_v10, %v5402_v24 }
 0x2f8   : > { %v2441_v19 = vpop.f32.mrf.mxu0  ;;  %v2639_v18 = vpop.f32.mrf.mxu1 }
 0x2f9   : > { %v2758_v8 = vadd.f32 %v2639_v18, %v2379_v28  ;;  %3694 = vmatmul.mubr.msk.bf16.vlgmr.msra.gmra.mxu0 %vm1873_vm9, %v2858_v44  ;;  %v2828_v32 = vmax.f32 %v2796_v46, 0.0 }
 0x2fa   : > { %v5534_v33 = vpop.f32.mrf.mxu0  ;;  %v2641_v26 = vpop.f32.mrf.mxu1  ;;  %3024 = vmatprep.mubr.bf16.mxu0 %v5960_v57 }
 0x2fb   : > { %v2797_v61 = vadd.f32 %v5519_v51, %v2758_v8  ;;  %v2395_v8 = vadd.f32 %v5473_v48, %v5412_v11 }
 0x2fc   : > { %v2444_v7 = vpop.f32.mrf.mxu0  ;;  %v2644_v62 = vpop.f32.mrf.mxu1 }
 0x2fd   : > { %v2829_v13 = vmax.f32 %v2797_v61, 0.0  ;;  %v2759_v60 = vadd.f32 %v2644_v62, %v2384_v14 }
 0x2fe   : > { %v2447_v21 = vpop.f32.mrf.mxu0  ;;  %v2646_v2 = vpop.f32.mrf.mxu1 }
 0x2ff   : > { %v5543_v38 = vadd.f32 %v2447_v21, %v5459_v6  ;;  %v2859_v22 = vpack.c.bf16 %v2829_v13, %v2828_v32  ;;  %v2798_v24 = vadd.f32 %v5519_v51, %v2759_v60 }
 0x300   : > { %v2449_v30 = vpop.f32.mrf.mxu0  ;;  %v2647_v56 = vpop.f32.mrf.mxu1 }
 0x301   : > { %v2760_v10 = vadd.f32 %v2647_v56, %v2387_v27  ;;  %3695 = vmatmul.mubr.msk.bf16.gmra.mxu0 %vm1873_vm9, %v2859_v22  ;;  %v2830_v28 = vmax.f32 %v2798_v24, 0.0  ;;  %v2403_v22 = vadd.f32 %v5482_v45, %v5419_v63 }
 0x302   : > { %v5547_v37 = vpop.f32.mrf.mxu0  ;;  %v2649_v12 = vpop.f32.mrf.mxu1  ;;  %3034 = vmatprep.mubr.bf16.mxu0 %v5960_v57 }
 0x303   : > { %v2799_v6 = vadd.f32 %v5519_v51, %v2760_v10 }
 0x304   : > { %v2452_v15 = vpop.f32.mrf.mxu0  ;;  %v2652_v58 = vpop.f32.mrf.mxu1 }
 0x305   : > { %v2831_v44 = vmax.f32 %v2799_v6, 0.0  ;;  %v2761_v0 = vadd.f32 %v2652_v58, %v5469_v34 }
 0x306   : > { %v2455_v19 = vpop.f32.mrf.mxu0  ;;  %v2654_v18 = vpop.f32.mrf.mxu1 }
 0x307   : > { %v5555_v50 = vadd.f32 %v2455_v19, %v5467_v52  ;;  %v2860_v26 = vpack.c.bf16 %v2831_v44, %v2830_v28  ;;  %v2800_v61 = vadd.f32 %v5519_v51, %v2761_v0 }
 0x308   : > { %v2457_v46 = vpop.f32.mrf.mxu0  ;;  %v2655_v7 = vpop.f32.mrf.mxu1 }
 0x309   : > { %v2762_v62 = vadd.f32 %v2655_v7, %v2395_v8  ;;  %3696 = vmatmul.mubr.msk.bf16.gmra.mxu0 %vm1873_vm9, %v2860_v26  ;;  %v2832_v60 = vmax.f32 %v2800_v61, 0.0  ;;  %v2411_v46 = vadd.f32 %v5491_v23, %v5428_v1 }
 0x30a   : > { %v5559_v14 = vpop.f32.mrf.mxu0  ;;  %v2657_v21 = vpop.f32.mrf.mxu1  ;;  %3044 = vmatprep.mubr.bf16.mxu0 %v5960_v57 }
 0x30b   : > { %v2801_v52 = vadd.f32 %v5519_v51, %v2762_v62 }
 0x30c   : > { %v2460_v32 = vpop.f32.mrf.mxu0  ;;  %v2660_v34 = vpop.f32.mrf.mxu1 }
 0x30d   : > { %v2833_v2 = vmax.f32 %v2801_v52, 0.0  ;;  %v2763_v11 = vadd.f32 %v2660_v34, %v5478_v47 }
 0x30e   : > { %v2463_v13 = vpop.f32.mrf.mxu0  ;;  %v2662_v30 = vpop.f32.mrf.mxu1 }
 0x30f   : > { %v5567_v48 = vadd.f32 %v2463_v13, %v5475_v40  ;;  %v2861_v56 = vpack.c.bf16 %v2833_v2, %v2832_v60  ;;  %v2802_v12 = vadd.f32 %v5519_v51, %v2763_v11  ;;  %v2419_v11 = vadd.f32 %v5500_v41, %v5435_v53 }
 0x310   : > { %v2465_v27 = vpop.f32.mrf.mxu0  ;;  %v2663_v24 = vpop.f32.mrf.mxu1 }
 0x311   : > { %v2764_v15 = vadd.f32 %v2663_v24, %v2403_v22  ;;  %3697 = vmatmul.mubr.msk.bf16.gmra.mxu0 %vm1873_vm9, %v2861_v56  ;;  %v2834_v28 = vmax.f32 %v2802_v12, 0.0 }
 0x312   : > { %v5571_v10 = vpop.f32.mrf.mxu0  ;;  %v2665_v6 = vpop.f32.mrf.mxu1  ;;  %3054 = vmatprep.mubr.bf16.mxu0 %v5960_v57 }
 0x313   : > { %v2803_v40 = vadd.f32 %v5519_v51, %v2764_v15 }
 0x314   : > { %v2468_v58 = vpop.f32.mrf.mxu0  ;;  %v2668_v47 = vpop.f32.mrf.mxu1 }
 0x315   : > { %v2835_v44 = vmax.f32 %v2803_v40, 0.0  ;;  %v2765_v63 = vadd.f32 %v2668_v47, %v5487_v3 }
 0x316   : > { %v2471_v19 = vpop.f32.mrf.mxu0  ;;  %v2670_v0 = vpop.f32.mrf.mxu1 }
 0x317   : > { %v5579_v45 = vadd.f32 %v2471_v19, %v5484_v29  ;;  %v2862_v8 = vpack.c.bf16 %v2835_v44, %v2834_v28  ;;  %v2804_v61 = vadd.f32 %v5519_v51, %v2765_v63  ;;  %v2427_v28 = vadd.f32 %v5509_v54, %v5441_v35 }
 0x318   : > { %v2473_v18 = vpop.f32.mrf.mxu0  ;;  %v2671_v26 = vpop.f32.mrf.mxu1 }
 0x319   : > { %v2766_v62 = vadd.f32 %v2671_v26, %v2411_v46  ;;  %3698 = vmatmul.mubr.msk.bf16.gmra.mxu0 %vm1873_vm9, %v2862_v8  ;;  %v2836_v34 = vmax.f32 %v2804_v61, 0.0 }
 0x31a   : > { %v5583_v7 = vpop.f32.mrf.mxu0  ;;  %v2673_v21 = vpop.f32.mrf.mxu1  ;;  %3064 = vmatprep.mubr.bf16.mxu0 %v5960_v57 }
 0x31b   : > { %v2805_v29 = vadd.f32 %v5519_v51, %v2766_v62  ;;  %v2435_v21 = vadd.f32 %v5523_v43, %v5447_v36  ;;  %v2443_v36 = vadd.f32 %v5534_v33, %v5455_v4  ;;  %v2451_v4 = vadd.f32 %v5547_v37, %v5463_v42 }
 0x31c   : > { %v2476_v32 = vpop.f32.mrf.mxu0  ;;  %v2676_v3 = vpop.f32.mrf.mxu1  ;;  %v2459_v42 = vadd.f32 %v5559_v14, %v5471_v59  ;;  %v2467_v59 = vadd.f32 %v5571_v10, %v5480_v25  ;;  %v2475_v25 = vadd.f32 %v5583_v7, %v5489_v39 }
 0x31d   : > { %v2837_v13 = vmax.f32 %v2805_v29, 0.0  ;;  %v2767_v1 = vadd.f32 %v2676_v3, %v5496_v31 }
 0x31e   : > { %v2479_v52 = vpop.f32.mrf.mxu0  ;;  %v2678_v60 = vpop.f32.mrf.mxu1 }
 0x31f   : > { %v5591_v23 = vadd.f32 %v2479_v52, %v5493_v16  ;;  %v2863_v30 = vpack.c.bf16 %v2837_v13, %v2836_v34  ;;  %v2806_v56 = vadd.f32 %v5519_v51, %v2767_v1 }
 0x320   : > { %v2481_v2 = vpop.f32.mrf.mxu0  ;;  %v2679_v27 = vpop.f32.mrf.mxu1 }
 0x321   : > { %v2768_v24 = vadd.f32 %v2679_v27, %v2419_v11  ;;  %3699 = vmatmul.mubr.msk.bf16.gmra.mxu0 %vm1873_vm9, %v2863_v30  ;;  %v2838_v58 = vmax.f32 %v2806_v56, 0.0 }
 0x322   : > { %v5595_v22 = vpop.f32.mrf.mxu0  ;;  %v2681_v12 = vpop.f32.mrf.mxu1  ;;  %3074 = vmatprep.mubr.bf16.mxu0 %v5960_v57 }
 0x323   : > { %v2807_v16 = vadd.f32 %v5519_v51, %v2768_v24  ;;  %v2483_v39 = vadd.f32 %v5595_v22, %v5498_v9 }
 0x324   : > { %v2484_v15 = vpop.f32.mrf.mxu0  ;;  %v2684_v31 = vpop.f32.mrf.mxu1 }
 0x325   : > { %v2839_v40 = vmax.f32 %v2807_v16, 0.0  ;;  %v2769_v53 = vadd.f32 %v2684_v31, %v5505_v5 }
 0x326   : > { %v2487_v6 = vpop.f32.mrf.mxu0  ;;  %v2686_v47 = vpop.f32.mrf.mxu1 }
 0x327   : > { %v5603_v41 = vadd.f32 %v2487_v6, %v5502_v55  ;;  %v2864_v44 = vpack.c.bf16 %v2839_v40, %v2838_v58  ;;  %v2808_v18 = vadd.f32 %v5519_v51, %v2769_v53 }
 0x328   : > { %v2489_v19 = vpop.f32.mrf.mxu0  ;;  %v2687_v63 = vpop.f32.mrf.mxu1 }
 0x329   : > { %v2770_v46 = vadd.f32 %v2687_v63, %v2427_v28  ;;  %3700 = vmatmul.mubr.msk.bf16.gmra.mxu0 %vm1873_vm9, %v2864_v44  ;;  %v2840_v61 = vmax.f32 %v2808_v18, 0.0 }
 0x32a   : > { %v5607_v0 = vpop.f32.mrf.mxu0  ;;  %v2689_v8 = vpop.f32.mrf.mxu1  ;;  %3084 = vmatprep.mubr.bf16.mxu0 %v5960_v57 }
 0x32b   : > { %v2809_v55 = vadd.f32 %v5519_v51, %v2770_v46  ;;  %v2491_v9 = vadd.f32 %v5607_v0, %v5507_v20  ;;  %v2884_v20 = vlaneseq }
 0x32c   : > { %v2492_v26 = vpop.f32.mrf.mxu0  ;;  %v2692_v5 = vpop.f32.mrf.mxu1 }
 0x32d   : > { %v2841_v62 = vmax.f32 %v2809_v55, 0.0  ;;  %v2771_v35 = vadd.f32 %v2692_v5, %v5514_v49  ;;  %v2885_v0 = vshrl.u32 %v2884_v20, 7 }
 0x32e   : > { %v2694_v54 = vpop.f32.mrf.mxu1 }
 0x32f   : > { %v2865_v32 = vpack.c.bf16 %v2841_v62, %v2840_v61  ;;  %v2810_v3 = vadd.f32 %v5519_v51, %v2771_v35 }
 0x330   : > { %v2695_v29 = vpop.f32.mrf.mxu1 }
 0x331   : > { %v2772_v52 = vadd.f32 %v2695_v29, %v2435_v21  ;;  %3701 = vmatmul.mubr.msk.bf16.gmra.mxu0 %vm1873_vm9, %v2865_v32  ;;  %v2842_v60 = vmax.f32 %v2810_v3, 0.0 }
 0x332   : > { %v2697_v34 = vpop.f32.mrf.mxu1  ;;  %3094 = vmatprep.mubr.bf16.mxu0 %v5960_v57 }
 0x333   : > { %v2811_v13 = vadd.f32 %v5519_v51, %v2772_v52 }
 0x334   : > { %v2700_v1 = vpop.f32.mrf.mxu1 }
 0x335   : > { %v2843_v2 = vmax.f32 %v2811_v13, 0.0  ;;  %v2773_v49 = vadd.f32 %v2700_v1, %v5530_v17 }
 0x336   : > { %v2702_v11 = vpop.f32.mrf.mxu1 }
 0x337   : > { %v2866_v43 = vpack.c.bf16 %v2843_v2, %v2842_v60  ;;  %v2812_v27 = vadd.f32 %v5519_v51, %v2773_v49 }
 0x338   : > { %v2703_v30 = vpop.f32.mrf.mxu1 }
 0x339   : > { %v2774_v56 = vadd.f32 %v2703_v30, %v2443_v36  ;;  %3702 = vmatmul.mubr.msk.bf16.gmra.mxu0 %vm1873_vm9, %v2866_v43  ;;  %v2844_v16 = vmax.f32 %v2812_v27, 0.0 }
 0x33a   : > { %v2705_v24 = vpop.f32.mrf.mxu1  ;;  %3104 = vmatprep.mubr.bf16.mxu0 %v5960_v57 }
 0x33b   : > { %v2813_v12 = vadd.f32 %v5519_v51, %v2774_v56 }
 0x33c   : > { %v2708_v15 = vpop.f32.mrf.mxu1 }
 0x33d   : > { %v2845_v31 = vmax.f32 %v2813_v12, 0.0  ;;  %v2775_v17 = vadd.f32 %v2708_v15, %v5543_v38 }
 0x33e   : > { %v2710_v6 = vpop.f32.mrf.mxu1 }
 0x33f   : > { %v2867_v33 = vpack.c.bf16 %v2845_v31, %v2844_v16  ;;  %v2814_v40 = vadd.f32 %v5519_v51, %v2775_v17 }
 0x340   : > { %v2711_v58 = vpop.f32.mrf.mxu1 }
 0x341   : > { %v2776_v53 = vadd.f32 %v2711_v58, %v2451_v4  ;;  %3703 = vmatmul.mubr.msk.bf16.gmra.mxu0 %vm1873_vm9, %v2867_v33  ;;  %v2846_v44 = vmax.f32 %v2814_v40, 0.0 }
 0x342   : > { %v2713_v47 = vpop.f32.mrf.mxu1  ;;  %3114 = vmatprep.mubr.bf16.mxu0 %v5960_v57 }
 0x343   : > { %v2815_v19 = vadd.f32 %v5519_v51, %v2776_v53 }
 0x344   : > { %v2716_v28 = vpop.f32.mrf.mxu1 }
 0x345   : > { %v2847_v63 = vmax.f32 %v2815_v19, 0.0  ;;  %v2777_v38 = vadd.f32 %v2716_v28, %v5555_v50 }
 0x346   : > { %v2718_v18 = vpop.f32.mrf.mxu1 }
 0x347   : > { %v2868_v37 = vpack.c.bf16 %v2847_v63, %v2846_v44  ;;  %v2816_v8 = vadd.f32 %v5519_v51, %v2777_v38  ;;  %v2886_v38 = vsub.s32 0, %v2885_v0  ;;  %v2882_v18 = vld [vmem:[%s5931_s6] sm:$0x3] }
 0x348   : > { %v2719_v46 = vpop.f32.mrf.mxu1 }
 0x349   : > { %v2778_v26 = vadd.f32 %v2719_v46, %v2459_v42  ;;  %3704 = vmatmul.mubr.msk.bf16.gmra.mxu0 %vm1873_vm9, %v2868_v37  ;;  %v2848_v62 = vmax.f32 %v2816_v8, 0.0  ;;  %v2890_v42 = vsub.s32 1, %v2885_v0  ;;  %v5673_v37 = vrot.slane %v2882_v18, %v2886_v38  ;;  %v4049_v0 = vld [vmem:[%s4289_s21 + $0x58] sm:$0xff] }
 0x34a   : > { %v2721_v55 = vpop.f32.mrf.mxu1  ;;  %3124 = vmatprep.mubr.bf16.mxu0 %v5960_v57 }
 0x34b   : > { %v2817_v5 = vadd.f32 %v5519_v51, %v2778_v26  ;;  %v4038_v26 = vld [vmem:[%s4289_s21] sm:$0xff] }
 0x34c   : > { %v2724_v61 = vpop.f32.mrf.mxu1 }
 0x34d   : > { %v2849_v35 = vmax.f32 %v2817_v5, 0.0  ;;  %v2779_v50 = vadd.f32 %v2724_v61, %v5567_v48 }
 0x34e   : > { %v2726_v54 = vpop.f32.mrf.mxu1 }
 0x34f   : > { %v2869_v14 = vpack.c.bf16 %v2849_v35, %v2848_v62  ;;  %v2818_v32 = vadd.f32 %v5519_v51, %v2779_v50  ;;  %v4039_v35 = vld [vmem:[%s4289_s21 + $0x8] sm:$0xff] }
 0x350   : > { %v2727_v21 = vpop.f32.mrf.mxu1 }
 0x351   : > { %v2780_v29 = vadd.f32 %v2727_v21, %v2467_v59  ;;  %3705 = vmatmul.mubr.msk.bf16.gmra.mxu0 %vm1873_vm9, %v2869_v14  ;;  %v2850_v13 = vmax.f32 %v2818_v32, 0.0  ;;  %v4040_v21 = vld [vmem:[%s4289_s21 + $0x10] sm:$0xff] }
 0x352   : > { %v2729_v3 = vpop.f32.mrf.mxu1  ;;  %3134 = vmatprep.mubr.bf16.mxu0 %v5960_v57 }
 0x353   : > { %v2819_v52 = vadd.f32 %v5519_v51, %v2780_v29 }
 0x354   : > { %v2732_v34 = vpop.f32.mrf.mxu1 }
 0x355   : > { %v2851_v1 = vmax.f32 %v2819_v52, 0.0  ;;  %v2781_v48 = vadd.f32 %v2732_v34, %v5579_v45  ;;  %v4041_v34 = vld [vmem:[%s4289_s21 + $0x18] sm:$0xff] }
 0x356   : > { %v2734_v60 = vpop.f32.mrf.mxu1 }
 0x357   : > { %v2870_v10 = vpack.c.bf16 %v2851_v1, %v2850_v13  ;;  %v2820_v49 = vadd.f32 %v5519_v51, %v2781_v48 }
 0x358   : > { %v2735_v2 = vpop.f32.mrf.mxu1 }
 0x359   : > { %v2782_v11 = vadd.f32 %v2735_v2, %v2475_v25  ;;  %3706 = vmatmul.mubr.msk.bf16.gmra.mxu0 %vm1873_vm9, %v2870_v10  ;;  %v2852_v27 = vmax.f32 %v2820_v49, 0.0  ;;  %v4042_v25 = vld [vmem:[%s4289_s21 + $0x20] sm:$0xff] }
 0x35a   : > { %v2737_v36 = vpop.f32.mrf.mxu1  ;;  %3144 = vmatprep.mubr.bf16.mxu0 %v5960_v57 }
 0x35b   : > { %v2821_v43 = vadd.f32 %v5519_v51, %v2782_v11  ;;  %v4043_v36 = vld [vmem:[%s4289_s21 + $0x28] sm:$0xff] }
 0x35c   : > { %v2740_v30 = vpop.f32.mrf.mxu1 }
 0x35d   : > { %v2853_v56 = vmax.f32 %v2821_v43, 0.0  ;;  %v2783_v45 = vadd.f32 %v2740_v30, %v5591_v23 }
 0x35e   : > { %v2742_v24 = vpop.f32.mrf.mxu1 }
 0x35f   : > { %v2871_v7 = vpack.c.bf16 %v2853_v56, %v2852_v27  ;;  %v2822_v15 = vadd.f32 %v5519_v51, %v2783_v45  ;;  %v4044_v45 = vld [vmem:[%s4289_s21 + $0x30] sm:$0xff] }
 0x360   : > { %v2743_v12 = vpop.f32.mrf.mxu1 }
 0x361   : > { %v2784_v16 = vadd.f32 %v2743_v12, %v2483_v39  ;;  %3707 = vmatmul.mubr.msk.bf16.gmra.mxu0 %vm1873_vm9, %v2871_v7  ;;  %v2854_v4 = vmax.f32 %v2822_v15, 0.0  ;;  %v4045_v15 = vld [vmem:[%s4289_s21 + $0x38] sm:$0xff] }
 0x362   : > { %v2745_v31 = vpop.f32.mrf.mxu1  ;;  %3154 = vmatprep.mubr.bf16.mxu0 %v5960_v57 }
 0x363   : > { %v2823_v17 = vadd.f32 %v5519_v51, %v2784_v16 }
 0x364   : > { %v2748_v6 = vpop.f32.mrf.mxu1 }
 0x365   : > { %v2855_v33 = vmax.f32 %v2823_v17, 0.0  ;;  %v2785_v23 = vadd.f32 %v2748_v6, %v5603_v41 }
 0x366   : > { %v2750_v58 = vpop.f32.mrf.mxu1 }
 0x367   : > { %v2872_v22 = vpack.c.bf16 %v2855_v33, %v2854_v4  ;;  %v2824_v53 = vadd.f32 %v5519_v51, %v2785_v23  ;;  %v4046_v4 = vld [vmem:[%s4289_s21 + $0x40] sm:$0xff] }
 0x368   : > { %v2751_v40 = vpop.f32.mrf.mxu1 }
 0x369   : > { %v2786_v47 = vadd.f32 %v2751_v40, %v2491_v9  ;;  %3708 = vmatmul.mubr.msk.bf16.gmra.mxu0 %vm1873_vm9, %v2872_v22  ;;  %v2856_v44 = vmax.f32 %v2824_v53, 0.0  ;;  %v4047_v22 = vld [vmem:[%s4289_s21 + $0x48] sm:$0xff] }
 0x36a   : > { %v2753_v19 = vpop.f32.mrf.mxu1  ;;  %3164 = vmatprep.mubr.bf16.mxu0 %v5960_v57  ;;  %v5676_v57 = vrot.slane %v2882_v18, %v2890_v42 }
 0x36b   : > { %v2825_v28 = vadd.f32 %v5519_v51, %v2786_v47 }
 0x36d   : > { %v2857_v41 = vmax.f32 %v2825_v28, 0.0  ;;  %v4048_v28 = vld [vmem:[%s4289_s21 + $0x50] sm:$0xff] }
 0x36f   : > { %v2873_v63 = vpack.c.bf16 %v2857_v41, %v2856_v44 }
 0x371   : > { %3709 = vmatmul.mubr.msk.bf16.gmra.mxu0 %vm1873_vm9, %v2873_v63 }
 0x3b9   : > { %v3016_v51 = vpop.f32.mrf.mxu0 }
 0x3ba   : > { %v3017_v46 = vadd.f32 %v3016_v51, %v5673_v37 }
 0x3bb   : > { %v3018_v8 = vpop.f32.mrf.mxu0 }
 0x3bc   : > { %v3175_v55 = vadd.f32 %v4038_v26, %v3017_v46  ;;  %v3019_v5 = vadd.f32 %v3018_v8, %v5676_v57  ;;  %v4050_v46 = vld [vmem:[%s4289_s21 + $0x60] sm:$0xff] }
 0x3bd   : > { %v3020_v61 = vpop.f32.mrf.mxu0 }
 0x3be   : > { %v3239_v62 = vmax.f32 %v3175_v55, 0.0  ;;  %v3176_v50 = vadd.f32 %v4039_v35, %v3019_v5  ;;  %v3021_v54 = vadd.f32 %v3020_v61, %v5673_v37  ;;  %v4051_v61 = vld [vmem:[%s4289_s21 + $0x68] sm:$0xff] }
 0x3bf   : > { %v3022_v59 = vpop.f32.mrf.mxu0 }
 0x3c0   : > { %3303 = vst [vmem:[%s5685_s23] sm:$0xff] %v3239_v62  ;;  %v3240_v14 = vmax.f32 %v3176_v50, 0.0  ;;  %v3177_v32 = vadd.f32 %v4040_v21, %v3021_v54  ;;  %v3023_v29 = vadd.f32 %v3022_v59, %v5676_v57  ;;  %v4052_v59 = vld [vmem:[%s4289_s21 + $0x70] sm:$0xff] }
 0x3c1   : > { %v3026_v3 = vpop.f32.mrf.mxu0 }
 0x3c2   : > { %3304 = vst [vmem:[%s5685_s23 + $0x8] sm:$0xff] %v3240_v14  ;;  %v3241_v52 = vmax.f32 %v3177_v32, 0.0  ;;  %v3178_v13 = vadd.f32 %v4041_v34, %v3023_v29  ;;  %v3027_v1 = vadd.f32 %v3026_v3, %v5673_v37  ;;  %v4053_v3 = vld [vmem:[%s4289_s21 + $0x78] sm:$0xff] }
 0x3c3   : > { %v3028_v48 = vpop.f32.mrf.mxu0 }
 0x3c4   : > { %3305 = vst [vmem:[%s5685_s23 + $0x10] sm:$0xff] %v3241_v52  ;;  %v3242_v60 = vmax.f32 %v3178_v13, 0.0  ;;  %v3179_v10 = vadd.f32 %v4042_v25, %v3027_v1  ;;  %v3029_v2 = vadd.f32 %v3028_v48, %v5676_v57  ;;  %v4054_v48 = vld [vmem:[%s4289_s21 + $0x80] sm:$0xff] }
 0x3c5   : > { %v3030_v49 = vpop.f32.mrf.mxu0 }
 0x3c6   : > { %3306 = vst [vmem:[%s5685_s23 + $0x18] sm:$0xff] %v3242_v60  ;;  %v3243_v11 = vmax.f32 %v3179_v10, 0.0  ;;  %v3180_v43 = vadd.f32 %v4043_v36, %v3029_v2  ;;  %v3031_v30 = vadd.f32 %v3030_v49, %v5673_v37  ;;  %v4055_v49 = vld [vmem:[%s4289_s21 + $0x88] sm:$0xff] }
 0x3c7   : > { %v3032_v27 = vpop.f32.mrf.mxu0 }
 0x3c8   : > { %3307 = vst [vmem:[%s5685_s23 + $0x20] sm:$0xff] %v3243_v11  ;;  %v3244_v56 = vmax.f32 %v3180_v43, 0.0  ;;  %v3181_v24 = vadd.f32 %v4044_v45, %v3031_v30  ;;  %v3033_v39 = vadd.f32 %v3032_v27, %v5676_v57  ;;  %v4056_v27 = vld [vmem:[%s4289_s21 + $0x90] sm:$0xff] }
 0x3c9   : > { %v3036_v7 = vpop.f32.mrf.mxu0 }
 0x3ca   : > { %3308 = vst [vmem:[%s5685_s23 + $0x28] sm:$0xff] %v3244_v56  ;;  %v3245_v12 = vmax.f32 %v3181_v24, 0.0  ;;  %v3182_v16 = vadd.f32 %v4045_v15, %v3033_v39  ;;  %v3037_v31 = vadd.f32 %v3036_v7, %v5673_v37  ;;  %v4057_v7 = vld [vmem:[%s4289_s21 + $0x98] sm:$0xff] }
 0x3cb   : > { %v3038_v17 = vpop.f32.mrf.mxu0 }
 0x3cc   : > { %3309 = vst [vmem:[%s5685_s23 + $0x30] sm:$0xff] %v3245_v12  ;;  %v3246_v6 = vmax.f32 %v3182_v16, 0.0  ;;  %v3183_v33 = vadd.f32 %v4046_v4, %v3037_v31  ;;  %v3039_v23 = vadd.f32 %v3038_v17, %v5676_v57  ;;  %v4058_v17 = vld [vmem:[%s4289_s21 + $0xa0] sm:$0xff] }
 0x3cd   : > { %v3040_v58 = vpop.f32.mrf.mxu0 }
 0x3ce   : > { %3310 = vst [vmem:[%s5685_s23 + $0x38] sm:$0xff] %v3246_v6  ;;  %v3247_v9 = vmax.f32 %v3183_v33, 0.0  ;;  %v3184_v40 = vadd.f32 %v4047_v22, %v3039_v23  ;;  %v3041_v53 = vadd.f32 %v3040_v58, %v5673_v37  ;;  %v4059_v58 = vld [vmem:[%s4289_s21 + $0xa8] sm:$0xff] }
 0x3cf   : > { %v3042_v47 = vpop.f32.mrf.mxu0 }
 0x3d0   : > { %3311 = vst [vmem:[%s5685_s23 + $0x40] sm:$0xff] %v3247_v9  ;;  %v3248_v19 = vmax.f32 %v3184_v40, 0.0  ;;  %v3185_v44 = vadd.f32 %v4048_v28, %v3041_v53  ;;  %v3043_v41 = vadd.f32 %v3042_v47, %v5676_v57  ;;  %v4060_v47 = vld [vmem:[%s4289_s21 + $0xb0] sm:$0xff] }
 0x3d1   : > { %v3046_v63 = vpop.f32.mrf.mxu0 }
 0x3d2   : > { %3312 = vst [vmem:[%s5685_s23 + $0x48] sm:$0xff] %v3248_v19  ;;  %v3249_v20 = vmax.f32 %v3185_v44, 0.0  ;;  %v3186_v38 = vadd.f32 %v4049_v0, %v3043_v41  ;;  %v3047_v18 = vadd.f32 %v3046_v63, %v5673_v37  ;;  %v4061_v63 = vld [vmem:[%s4289_s21 + $0xb8] sm:$0xff] }
 0x3d3   : > { %v3048_v42 = vpop.f32.mrf.mxu0 }
 0x3d4   : > { %3313 = vst [vmem:[%s5685_s23 + $0x50] sm:$0xff] %v3249_v20  ;;  %v3250_v51 = vmax.f32 %v3186_v38, 0.0  ;;  %v3187_v8 = vadd.f32 %v4050_v46, %v3047_v18  ;;  %v3049_v26 = vadd.f32 %v3048_v42, %v5676_v57  ;;  %v4062_v42 = vld [vmem:[%s4289_s21 + $0xc0] sm:$0xff] }
 0x3d5   : > { %v3050_v55 = vpop.f32.mrf.mxu0 }
 0x3d6   : > { %3314 = vst [vmem:[%s5685_s23 + $0x58] sm:$0xff] %v3250_v51  ;;  %v3251_v5 = vmax.f32 %v3187_v8, 0.0  ;;  %v3188_v62 = vadd.f32 %v4051_v61, %v3049_v26  ;;  %v3051_v35 = vadd.f32 %v3050_v55, %v5673_v37  ;;  %v4063_v55 = vld [vmem:[%s4289_s21 + $0xc8] sm:$0xff] }
 0x3d7   : > { %v3052_v50 = vpop.f32.mrf.mxu0 }
 0x3d8   : > { %3315 = vst [vmem:[%s5685_s23 + $0x60] sm:$0xff] %v3251_v5  ;;  %v3252_v54 = vmax.f32 %v3188_v62, 0.0  ;;  %v3189_v14 = vadd.f32 %v4052_v59, %v3051_v35  ;;  %v3053_v21 = vadd.f32 %v3052_v50, %v5676_v57  ;;  %v4064_v50 = vld [vmem:[%s4289_s21 + $0xd0] sm:$0xff] }
 0x3d9   : > { %v3056_v32 = vpop.f32.mrf.mxu0 }
 0x3da   : > { %3316 = vst [vmem:[%s5685_s23 + $0x68] sm:$0xff] %v3252_v54  ;;  %v3253_v29 = vmax.f32 %v3189_v14, 0.0  ;;  %v3190_v52 = vadd.f32 %v4053_v3, %v3053_v21  ;;  %v3057_v34 = vadd.f32 %v3056_v32, %v5673_v37  ;;  %v4065_v32 = vld [vmem:[%s4289_s21 + $0xd8] sm:$0xff] }
 0x3db   : > { %v3058_v13 = vpop.f32.mrf.mxu0 }
 0x3dc   : > { %3317 = vst [vmem:[%s5685_s23 + $0x70] sm:$0xff] %v3253_v29  ;;  %v3254_v1 = vmax.f32 %v3190_v52, 0.0  ;;  %v3191_v60 = vadd.f32 %v4054_v48, %v3057_v34  ;;  %v3059_v25 = vadd.f32 %v3058_v13, %v5676_v57  ;;  %v4066_v13 = vld [vmem:[%s4289_s21 + $0xe0] sm:$0xff] }
 0x3dd   : > { %v3060_v10 = vpop.f32.mrf.mxu0 }
 0x3de   : > { %3318 = vst [vmem:[%s5685_s23 + $0x78] sm:$0xff] %v3254_v1  ;;  %v3255_v2 = vmax.f32 %v3191_v60, 0.0  ;;  %v3192_v11 = vadd.f32 %v4055_v49, %v3059_v25  ;;  %v3061_v36 = vadd.f32 %v3060_v10, %v5673_v37  ;;  %v4067_v10 = vld [vmem:[%s4289_s21 + $0xe8] sm:$0xff] }
 0x3df   : > { %v3062_v43 = vpop.f32.mrf.mxu0 }
 0x3e0   : > { %3319 = vst [vmem:[%s5685_s23 + $0x80] sm:$0xff] %v3255_v2  ;;  %v3256_v30 = vmax.f32 %v3192_v11, 0.0  ;;  %v3193_v56 = vadd.f32 %v4056_v27, %v3061_v36  ;;  %v3063_v45 = vadd.f32 %v3062_v43, %v5676_v57  ;;  %v4068_v43 = vld [vmem:[%s4289_s21 + $0xf0] sm:$0xff] }
 0x3e1   : > { %v3066_v24 = vpop.f32.mrf.mxu0 }
 0x3e2   : > { %3320 = vst [vmem:[%s5685_s23 + $0x88] sm:$0xff] %v3256_v30  ;;  %v3257_v39 = vmax.f32 %v3193_v56, 0.0  ;;  %v3194_v12 = vadd.f32 %v4057_v7, %v3063_v45  ;;  %v3067_v15 = vadd.f32 %v3066_v24, %v5673_v37  ;;  %v4069_v24 = vld [vmem:[%s4289_s21 + $0xf8] sm:$0xff] }
 0x3e3   : > { %v3068_v16 = vpop.f32.mrf.mxu0 }
 0x3e4   : > { %3321 = vst [vmem:[%s5685_s23 + $0x90] sm:$0xff] %v3257_v39  ;;  %v3258_v31 = vmax.f32 %v3194_v12, 0.0  ;;  %v3195_v6 = vadd.f32 %v4058_v17, %v3067_v15  ;;  %v3069_v4 = vadd.f32 %v3068_v16, %v5676_v57  ;;  %v4070_v16 = vld [vmem:[%s4289_s21 + $0x100] sm:$0xff] }
 0x3e5   : > { %v3070_v33 = vpop.f32.mrf.mxu0 }
 0x3e6   : > { %3322 = vst [vmem:[%s5685_s23 + $0x98] sm:$0xff] %v3258_v31  ;;  %v3259_v23 = vmax.f32 %v3195_v6, 0.0  ;;  %v3196_v9 = vadd.f32 %v4059_v58, %v3069_v4  ;;  %v3071_v22 = vadd.f32 %v3070_v33, %v5673_v37  ;;  %v4071_v33 = vld [vmem:[%s4289_s21 + $0x108] sm:$0xff] }
 0x3e7   : > { %v3072_v40 = vpop.f32.mrf.mxu0 }
 0x3e8   : > { %3323 = vst [vmem:[%s5685_s23 + $0xa0] sm:$0xff] %v3259_v23  ;;  %v3260_v53 = vmax.f32 %v3196_v9, 0.0  ;;  %v3197_v19 = vadd.f32 %v4060_v47, %v3071_v22  ;;  %v3073_v28 = vadd.f32 %v3072_v40, %v5676_v57  ;;  %v4072_v40 = vld [vmem:[%s4289_s21 + $0x110] sm:$0xff] }
 0x3e9   : > { %v3076_v44 = vpop.f32.mrf.mxu0 }
 0x3ea   : > { %3324 = vst [vmem:[%s5685_s23 + $0xa8] sm:$0xff] %v3260_v53  ;;  %v3261_v41 = vmax.f32 %v3197_v19, 0.0  ;;  %v3198_v20 = vadd.f32 %v4061_v63, %v3073_v28  ;;  %v3077_v0 = vadd.f32 %v3076_v44, %v5673_v37  ;;  %v4073_v44 = vld [vmem:[%s4289_s21 + $0x118] sm:$0xff] }
 0x3eb   : > { %v3078_v38 = vpop.f32.mrf.mxu0 }
 0x3ec   : > { %3325 = vst [vmem:[%s5685_s23 + $0xb0] sm:$0xff] %v3261_v41  ;;  %v3262_v18 = vmax.f32 %v3198_v20, 0.0  ;;  %v3199_v51 = vadd.f32 %v4062_v42, %v3077_v0  ;;  %v3079_v46 = vadd.f32 %v3078_v38, %v5676_v57  ;;  %v4074_v38 = vld [vmem:[%s4289_s21 + $0x120] sm:$0xff] }
 0x3ed   : > { %v3080_v8 = vpop.f32.mrf.mxu0 }
 0x3ee   : > { %3326 = vst [vmem:[%s5685_s23 + $0xb8] sm:$0xff] %v3262_v18  ;;  %v3263_v26 = vmax.f32 %v3199_v51, 0.0  ;;  %v3200_v5 = vadd.f32 %v4063_v55, %v3079_v46  ;;  %v3081_v61 = vadd.f32 %v3080_v8, %v5673_v37  ;;  %v4075_v8 = vld [vmem:[%s4289_s21 + $0x128] sm:$0xff] }
 0x3ef   : > { %v3082_v62 = vpop.f32.mrf.mxu0 }
 0x3f0   : > { %3327 = vst [vmem:[%s5685_s23 + $0xc0] sm:$0xff] %v3263_v26  ;;  %v3264_v35 = vmax.f32 %v3200_v5, 0.0  ;;  %v3201_v54 = vadd.f32 %v4064_v50, %v3081_v61  ;;  %v3083_v59 = vadd.f32 %v3082_v62, %v5676_v57  ;;  %v4076_v62 = vld [vmem:[%s4289_s21 + $0x130] sm:$0xff] }
 0x3f1   : > { %v3086_v14 = vpop.f32.mrf.mxu0 }
 0x3f2   : > { %3328 = vst [vmem:[%s5685_s23 + $0xc8] sm:$0xff] %v3264_v35  ;;  %v3265_v21 = vmax.f32 %v3201_v54, 0.0  ;;  %v3202_v29 = vadd.f32 %v4065_v32, %v3083_v59  ;;  %v3087_v3 = vadd.f32 %v3086_v14, %v5673_v37  ;;  %v4077_v14 = vld [vmem:[%s4289_s21 + $0x138] sm:$0xff] }
 0x3f3   : > { %v3088_v52 = vpop.f32.mrf.mxu0 }
 0x3f4   : > { %3329 = vst [vmem:[%s5685_s23 + $0xd0] sm:$0xff] %v3265_v21  ;;  %v3266_v34 = vmax.f32 %v3202_v29, 0.0  ;;  %v3203_v1 = vadd.f32 %v4066_v13, %v3087_v3  ;;  %v3089_v48 = vadd.f32 %v3088_v52, %v5676_v57  ;;  %v4078_v52 = vld [vmem:[%s4289_s21 + $0x140] sm:$0xff] }
 0x3f5   : > { %v3090_v60 = vpop.f32.mrf.mxu0 }
 0x3f6   : > { %3330 = vst [vmem:[%s5685_s23 + $0xd8] sm:$0xff] %v3266_v34  ;;  %v3267_v25 = vmax.f32 %v3203_v1, 0.0  ;;  %v3204_v2 = vadd.f32 %v4067_v10, %v3089_v48  ;;  %v3091_v49 = vadd.f32 %v3090_v60, %v5673_v37  ;;  %v4079_v60 = vld [vmem:[%s4289_s21 + $0x148] sm:$0xff] }
 0x3f7   : > { %v3092_v11 = vpop.f32.mrf.mxu0 }
 0x3f8   : > { %3331 = vst [vmem:[%s5685_s23 + $0xe0] sm:$0xff] %v3267_v25  ;;  %v3268_v36 = vmax.f32 %v3204_v2, 0.0  ;;  %v3205_v30 = vadd.f32 %v4068_v43, %v3091_v49  ;;  %v3093_v27 = vadd.f32 %v3092_v11, %v5676_v57  ;;  %v4080_v11 = vld [vmem:[%s4289_s21 + $0x150] sm:$0xff] }
 0x3f9   : > { %v3096_v56 = vpop.f32.mrf.mxu0 }
 0x3fa   : > { %3332 = vst [vmem:[%s5685_s23 + $0xe8] sm:$0xff] %v3268_v36  ;;  %v3269_v45 = vmax.f32 %v3205_v30, 0.0  ;;  %v3206_v39 = vadd.f32 %v4069_v24, %v3093_v27  ;;  %v3097_v7 = vadd.f32 %v3096_v56, %v5673_v37  ;;  %v4081_v56 = vld [vmem:[%s4289_s21 + $0x158] sm:$0xff] }
 0x3fb   : > { %v3098_v12 = vpop.f32.mrf.mxu0 }
 0x3fc   : > { %3333 = vst [vmem:[%s5685_s23 + $0xf0] sm:$0xff] %v3269_v45  ;;  %v3270_v15 = vmax.f32 %v3206_v39, 0.0  ;;  %v3207_v31 = vadd.f32 %v4070_v16, %v3097_v7  ;;  %v3099_v17 = vadd.f32 %v3098_v12, %v5676_v57  ;;  %v4082_v12 = vld [vmem:[%s4289_s21 + $0x160] sm:$0xff] }
 0x3fd   : > { %v3100_v6 = vpop.f32.mrf.mxu0 }
 0x3fe   : > { %3334 = vst [vmem:[%s5685_s23 + $0xf8] sm:$0xff] %v3270_v15  ;;  %v3271_v4 = vmax.f32 %v3207_v31, 0.0  ;;  %v3208_v23 = vadd.f32 %v4071_v33, %v3099_v17  ;;  %v3101_v58 = vadd.f32 %v3100_v6, %v5673_v37  ;;  %v4083_v6 = vld [vmem:[%s4289_s21 + $0x168] sm:$0xff] }
 0x3ff   : > { %v3102_v9 = vpop.f32.mrf.mxu0 }
 0x400   : > { %3335 = vst [vmem:[%s5685_s23 + $0x100] sm:$0xff] %v3271_v4  ;;  %v3272_v22 = vmax.f32 %v3208_v23, 0.0  ;;  %v3209_v53 = vadd.f32 %v4072_v40, %v3101_v58  ;;  %v3103_v47 = vadd.f32 %v3102_v9, %v5676_v57  ;;  %v4084_v9 = vld [vmem:[%s4289_s21 + $0x170] sm:$0xff] }
 0x401   : > { %v3106_v19 = vpop.f32.mrf.mxu0 }
 0x402   : > { %3336 = vst [vmem:[%s5685_s23 + $0x108] sm:$0xff] %v3272_v22  ;;  %v3273_v28 = vmax.f32 %v3209_v53, 0.0  ;;  %v3210_v41 = vadd.f32 %v4073_v44, %v3103_v47  ;;  %v3107_v63 = vadd.f32 %v3106_v19, %v5673_v37  ;;  %v4085_v19 = vld [vmem:[%s4289_s21 + $0x178] sm:$0xff] }
 0x403   : > { %v3108_v20 = vpop.f32.mrf.mxu0 }
 0x404   : > { %3337 = vst [vmem:[%s5685_s23 + $0x110] sm:$0xff] %v3273_v28  ;;  %v3274_v0 = vmax.f32 %v3210_v41, 0.0  ;;  %v3211_v18 = vadd.f32 %v4074_v38, %v3107_v63  ;;  %v3109_v42 = vadd.f32 %v3108_v20, %v5676_v57  ;;  %v4086_v20 = vld [vmem:[%s4289_s21 + $0x180] sm:$0xff] }
 0x405   : > { %v3110_v51 = vpop.f32.mrf.mxu0 }
 0x406   : > { %3338 = vst [vmem:[%s5685_s23 + $0x118] sm:$0xff] %v3274_v0  ;;  %v3275_v46 = vmax.f32 %v3211_v18, 0.0  ;;  %v3212_v26 = vadd.f32 %v4075_v8, %v3109_v42  ;;  %v3111_v55 = vadd.f32 %v3110_v51, %v5673_v37  ;;  %v4087_v51 = vld [vmem:[%s4289_s21 + $0x188] sm:$0xff] }
 0x407   : > { %v3112_v5 = vpop.f32.mrf.mxu0 }
 0x408   : > { %3339 = vst [vmem:[%s5685_s23 + $0x120] sm:$0xff] %v3275_v46  ;;  %v3276_v61 = vmax.f32 %v3212_v26, 0.0  ;;  %v3213_v35 = vadd.f32 %v4076_v62, %v3111_v55  ;;  %v3113_v50 = vadd.f32 %v3112_v5, %v5676_v57  ;;  %v4088_v5 = vld [vmem:[%s4289_s21 + $0x190] sm:$0xff] }
 0x409   : > { %v3116_v54 = vpop.f32.mrf.mxu0 }
 0x40a   : > { %3340 = vst [vmem:[%s5685_s23 + $0x128] sm:$0xff] %v3276_v61  ;;  %v3277_v59 = vmax.f32 %v3213_v35, 0.0  ;;  %v3214_v21 = vadd.f32 %v4077_v14, %v3113_v50  ;;  %v3117_v32 = vadd.f32 %v3116_v54, %v5673_v37  ;;  %v4089_v54 = vld [vmem:[%s4289_s21 + $0x198] sm:$0xff] }
 0x40b   : > { %v3118_v29 = vpop.f32.mrf.mxu0 }
 0x40c   : > { %3341 = vst [vmem:[%s5685_s23 + $0x130] sm:$0xff] %v3277_v59  ;;  %v3278_v3 = vmax.f32 %v3214_v21, 0.0  ;;  %v3215_v34 = vadd.f32 %v4078_v52, %v3117_v32  ;;  %v3119_v13 = vadd.f32 %v3118_v29, %v5676_v57  ;;  %v4090_v29 = vld [vmem:[%s4289_s21 + $0x1a0] sm:$0xff] }
 0x40d   : > { %v3120_v1 = vpop.f32.mrf.mxu0 }
 0x40e   : > { %3342 = vst [vmem:[%s5685_s23 + $0x138] sm:$0xff] %v3278_v3  ;;  %v3279_v48 = vmax.f32 %v3215_v34, 0.0  ;;  %v3216_v25 = vadd.f32 %v4079_v60, %v3119_v13  ;;  %v3121_v10 = vadd.f32 %v3120_v1, %v5673_v37  ;;  %v4091_v1 = vld [vmem:[%s4289_s21 + $0x1a8] sm:$0xff] }
 0x40f   : > { %v3122_v2 = vpop.f32.mrf.mxu0 }
 0x410   : > { %3343 = vst [vmem:[%s5685_s23 + $0x140] sm:$0xff] %v3279_v48  ;;  %v3280_v49 = vmax.f32 %v3216_v25, 0.0  ;;  %v3217_v36 = vadd.f32 %v4080_v11, %v3121_v10  ;;  %v3123_v43 = vadd.f32 %v3122_v2, %v5676_v57  ;;  %v4092_v2 = vld [vmem:[%s4289_s21 + $0x1b0] sm:$0xff] }
 0x411   : > { %v3126_v30 = vpop.f32.mrf.mxu0 }
 0x412   : > { %3344 = vst [vmem:[%s5685_s23 + $0x148] sm:$0xff] %v3280_v49  ;;  %v3281_v27 = vmax.f32 %v3217_v36, 0.0  ;;  %v3218_v45 = vadd.f32 %v4081_v56, %v3123_v43  ;;  %v3127_v24 = vadd.f32 %v3126_v30, %v5673_v37  ;;  %v4093_v30 = vld [vmem:[%s4289_s21 + $0x1b8] sm:$0xff] }
 0x413   : > { %v3128_v39 = vpop.f32.mrf.mxu0 }
 0x414   : > { %3345 = vst [vmem:[%s5685_s23 + $0x150] sm:$0xff] %v3281_v27  ;;  %v3282_v7 = vmax.f32 %v3218_v45, 0.0  ;;  %v3219_v15 = vadd.f32 %v4082_v12, %v3127_v24  ;;  %v3129_v16 = vadd.f32 %v3128_v39, %v5676_v57  ;;  %v4094_v39 = vld [vmem:[%s4289_s21 + $0x1c0] sm:$0xff] }
 0x415   : > { %v3130_v31 = vpop.f32.mrf.mxu0 }
 0x416   : > { %3346 = vst [vmem:[%s5685_s23 + $0x158] sm:$0xff] %v3282_v7  ;;  %v3283_v17 = vmax.f32 %v3219_v15, 0.0  ;;  %v3220_v4 = vadd.f32 %v4083_v6, %v3129_v16  ;;  %v3131_v33 = vadd.f32 %v3130_v31, %v5673_v37  ;;  %v4095_v31 = vld [vmem:[%s4289_s21 + $0x1c8] sm:$0xff] }
 0x417   : > { %v3132_v23 = vpop.f32.mrf.mxu0 }
 0x418   : > { %3347 = vst [vmem:[%s5685_s23 + $0x160] sm:$0xff] %v3283_v17  ;;  %v3284_v58 = vmax.f32 %v3220_v4, 0.0  ;;  %v3221_v22 = vadd.f32 %v4084_v9, %v3131_v33  ;;  %v3133_v40 = vadd.f32 %v3132_v23, %v5676_v57  ;;  %v4096_v23 = vld [vmem:[%s4289_s21 + $0x1d0] sm:$0xff] }
 0x419   : > { %v3136_v53 = vpop.f32.mrf.mxu0 }
 0x41a   : > { %3348 = vst [vmem:[%s5685_s23 + $0x168] sm:$0xff] %v3284_v58  ;;  %v3285_v47 = vmax.f32 %v3221_v22, 0.0  ;;  %v3222_v28 = vadd.f32 %v4085_v19, %v3133_v40  ;;  %v3137_v44 = vadd.f32 %v3136_v53, %v5673_v37  ;;  %v4097_v53 = vld [vmem:[%s4289_s21 + $0x1d8] sm:$0xff] }
 0x41b   : > { %v3138_v41 = vpop.f32.mrf.mxu0 }
 0x41c   : > { %3349 = vst [vmem:[%s5685_s23 + $0x170] sm:$0xff] %v3285_v47  ;;  %v3286_v63 = vmax.f32 %v3222_v28, 0.0  ;;  %v3223_v0 = vadd.f32 %v4086_v20, %v3137_v44  ;;  %v3139_v38 = vadd.f32 %v3138_v41, %v5676_v57  ;;  %v4098_v41 = vld [vmem:[%s4289_s21 + $0x1e0] sm:$0xff] }
 0x41d   : > { %v3140_v18 = vpop.f32.mrf.mxu0 }
 0x41e   : > { %3350 = vst [vmem:[%s5685_s23 + $0x178] sm:$0xff] %v3286_v63  ;;  %v3287_v42 = vmax.f32 %v3223_v0, 0.0  ;;  %v3224_v46 = vadd.f32 %v4087_v51, %v3139_v38  ;;  %v3141_v8 = vadd.f32 %v3140_v18, %v5673_v37  ;;  %v4099_v18 = vld [vmem:[%s4289_s21 + $0x1e8] sm:$0xff] }
 0x41f   : > { %v3142_v26 = vpop.f32.mrf.mxu0 }
 0x420   : > { %3351 = vst [vmem:[%s5685_s23 + $0x180] sm:$0xff] %v3287_v42  ;;  %v3288_v55 = vmax.f32 %v3224_v46, 0.0  ;;  %v3225_v61 = vadd.f32 %v4088_v5, %v3141_v8  ;;  %v3143_v62 = vadd.f32 %v3142_v26, %v5676_v57  ;;  %v4100_v26 = vld [vmem:[%s4289_s21 + $0x1f0] sm:$0xff] }
 0x421   : > { %v3146_v35 = vpop.f32.mrf.mxu0 }
 0x422   : > { %3352 = vst [vmem:[%s5685_s23 + $0x188] sm:$0xff] %v3288_v55  ;;  %v3289_v50 = vmax.f32 %v3225_v61, 0.0  ;;  %v3226_v59 = vadd.f32 %v4089_v54, %v3143_v62  ;;  %v3147_v14 = vadd.f32 %v3146_v35, %v5673_v37  ;;  %v4101_v62 = vld [vmem:[%s4289_s21 + $0x1f8] sm:$0xff]  ;;  %s4166_s21 = smov [#allocation3]  }
 0x423   : > { %v3148_v21 = vpop.f32.mrf.mxu0  ;;  %s4106_s14 = sshll.u32 %s4166_s21, 4  ;;  %s4107_s14 = int_to_ptr.vmem [resolvable:$false] %s4106_s14 }
 0x424   : > { %3353 = vst [vmem:[%s5685_s23 + $0x190] sm:$0xff] %v3289_v50  ;;  %v3290_v32 = vmax.f32 %v3226_v59, 0.0  ;;  %v3227_v3 = vadd.f32 %v4090_v29, %v3147_v14  ;;  %v3149_v52 = vadd.f32 %v3148_v21, %v5676_v57  ;;  %s4108_s15 = scalar_lea.vmem %s4107_s14, 16384  ;;  %p4109_p0 = scmp.lt.s32.totalorder %s5879_s22, %s4107_s14 }
 0x425   : > { %v3150_v34 = vpop.f32.mrf.mxu0  ;;  %p4110_p1 = scmp.lt.s32.totalorder %s4108_s15, %s4102_s13 }
 0x426   : > { %3354 = vst [vmem:[%s5685_s23 + $0x198] sm:$0xff] %v3290_v32  ;;  %v3291_v13 = vmax.f32 %v3227_v3, 0.0  ;;  %v3228_v48 = vadd.f32 %v4091_v1, %v3149_v52  ;;  %v3151_v60 = vadd.f32 %v3150_v34, %v5673_v37 }
 0x427   : > { %v3152_v25 = vpop.f32.mrf.mxu0  ;;  %p4111_p2 = por %p4110_p1, %p4109_p0 }
 0x428   : > { %3355 = vst [vmem:[%s5685_s23 + $0x1a0] sm:$0xff] %v3291_v13  ;;  %v3292_v10 = vmax.f32 %v3228_v48, 0.0  ;;  %v3229_v49 = vadd.f32 %v4092_v2, %v3151_v60  ;;  %v3153_v11 = vadd.f32 %v3152_v25, %v5676_v57 }
 0x429   : > { %v3156_v36 = vpop.f32.mrf.mxu0  ;;  %p4112_p3 = pnand %p4111_p2, %p4105_p13 }
 0x42a   : > { %3356 = vst [vmem:[%s5685_s23 + $0x1a8] sm:$0xff] %v3292_v10  ;;  %v3293_v43 = vmax.f32 %v3229_v49, 0.0  ;;  %v3230_v27 = vadd.f32 %v4093_v30, %v3153_v11  ;;  %v3157_v56 = vadd.f32 %v3156_v36, %v5673_v37 }
 0x42b   : > { %v3158_v45 = vpop.f32.mrf.mxu0 }
 0x42c   : > { %3357 = vst [vmem:[%s5685_s23 + $0x1b0] sm:$0xff] %v3293_v43  ;;  %v3294_v24 = vmax.f32 %v3230_v27, 0.0  ;;  %v3231_v7 = vadd.f32 %v4094_v39, %v3157_v56  ;;  %v3159_v12 = vadd.f32 %v3158_v45, %v5676_v57 }
 0x42d   : > { %v3160_v15 = vpop.f32.mrf.mxu0 }
 0x42e   : > { %3358 = vst [vmem:[%s5685_s23 + $0x1b8] sm:$0xff] %v3294_v24  ;;  %v3295_v16 = vmax.f32 %v3231_v7, 0.0  ;;  %v3232_v17 = vadd.f32 %v4095_v31, %v3159_v12  ;;  %v3161_v6 = vadd.f32 %v3160_v15, %v5673_v37 }
 0x42f   : > { %v3162_v4 = vpop.f32.mrf.mxu0 }
 0x430   : > { %3359 = vst [vmem:[%s5685_s23 + $0x1c0] sm:$0xff] %v3295_v16  ;;  %v3296_v33 = vmax.f32 %v3232_v17, 0.0  ;;  %v3233_v58 = vadd.f32 %v4096_v23, %v3161_v6  ;;  %v3163_v9 = vadd.f32 %v3162_v4, %v5676_v57 }
 0x431   : > { %v3166_v22 = vpop.f32.mrf.mxu0 }
 0x432   : > { %3360 = vst [vmem:[%s5685_s23 + $0x1c8] sm:$0xff] %v3296_v33  ;;  %v3297_v40 = vmax.f32 %v3233_v58, 0.0  ;;  %v3234_v47 = vadd.f32 %v4097_v53, %v3163_v9  ;;  %v3167_v19 = vadd.f32 %v3166_v22, %v5673_v37 }
 0x433   : > { %v3168_v28 = vpop.f32.mrf.mxu0 }
 0x434   : > { %3361 = vst [vmem:[%s5685_s23 + $0x1d0] sm:$0xff] %v3297_v40  ;;  %v3298_v44 = vmax.f32 %v3234_v47, 0.0  ;;  %v3235_v63 = vadd.f32 %v4098_v41, %v3167_v19  ;;  %v3169_v20 = vadd.f32 %v3168_v28, %v5676_v57 }
 0x435   : > { %v3170_v0 = vpop.f32.mrf.mxu0 }
 0x436   : > { %3362 = vst [vmem:[%s5685_s23 + $0x1d8] sm:$0xff] %v3298_v44  ;;  %v3299_v38 = vmax.f32 %v3235_v63, 0.0  ;;  %v3236_v42 = vadd.f32 %v4099_v18, %v3169_v20  ;;  %v3171_v51 = vadd.f32 %v3170_v0, %v5673_v37 }
 0x437   : > { %v3172_v46 = vpop.f32.mrf.mxu0 }
 0x438   : > { %3363 = vst [vmem:[%s5685_s23 + $0x1e0] sm:$0xff] %v3299_v38  ;;  %v3300_v8 = vmax.f32 %v3236_v42, 0.0  ;;  %v3237_v55 = vadd.f32 %v4100_v26, %v3171_v51  ;;  %v3173_v5 = vadd.f32 %v3172_v46, %v5676_v57 }
 0x43a   : > { %3364 = vst [vmem:[%s5685_s23 + $0x1e8] sm:$0xff] %v3300_v8  ;;  %v3301_v61 = vmax.f32 %v3237_v55, 0.0  ;;  %v3238_v35 = vadd.f32 %v4101_v62, %v3173_v5 }
 0x43c   : > { %3365 = vst [vmem:[%s5685_s23 + $0x1f0] sm:$0xff] %v3301_v61  ;;  %v3302_v37 = vmax.f32 %v3238_v35, 0.0 }
 0x43e   : > { %3366 = vst [vmem:[%s5685_s23 + $0x1f8] sm:$0xff] %v3302_v37 }
 0x43f   : > { %4115 = shalt.err (!%p4112_p3)
}
 0x440   : > { %s4116_s16 = scalar_lea.hbm %s5877_s9, 8192  ;;  %s4120_s19 = scalar_lea.hbm %s5932_s7, 16384 }
 0x441   : > { %p4117_p4 = scmp.ne.s32.totalorder %s5877_s9, %s4116_s16  ;;  %p4121_p9 = scmp.lt.s32.totalorder %s5877_s9, %s5932_s7 }
 0x442   : > { %p4122_p10 = scmp.lt.s32.totalorder %s4120_s19, %s4116_s16 }
 0x443   : > { %p4118_p7 = pnand %p4117_p4, %p4247_p5 }
 0x444   : > { %p4123_p11 = por %p4122_p10, %p4121_p9 }
 0x445   : > { %p4119_p8 = pneg %p4118_p7 }
 0x447   : > { %p4124_p12 = pnand %p4123_p11, %p4119_p8 }
 0x449   : > { %4127 = shalt.err (!%p4124_p12)
}
 0x44a   : > { %s4167_s29 = smov 256   ;;  %s4168_s8 = smov 16  }
 0x44b   : > { %3877 = dma.vmem_to_hbm [thread:$0]  (%p4247_p5), %s5879_s22, 8192, %s5877_s9, %s5885_s28, %s4167_s29, %s4167_s29, %s4168_s8  }
 0x44c PF: > { %p3883_p13 = scmp.ge.s32.totalorder %s4162_s27, 2  ;;  %s3396_s13 = sand.u32 1, %s4150_s24  }
 0x44d   : > { %s3397_s21 = scalar_lea.sflag [#allocation4], %s3396_s13 }
 0x44e   : > { %p3880_p0 = pnand %p3883_p13, %p4251_p6 }
 0x450   : > { %p3881_p1 = pneg %p3880_p0 }
 0x452   : > { %4145 = dma.done.wait (%p3881_p1), %s3397_s21, 8192  }
 0x453   : > { %4147 = vsyncadd (%p3881_p1), %s3397_s21, 4294959104  ;;  %p17_p2 = scmp.ge.s32.totalorder %s4234_s30, 4   ;;  %s5972_s24 = smov %s4154_s25 }
 0x454   : > { %s5973_s25 = smov %s4158_s26  ;;  %s5974_s26 = smov %s4245_s10 }
 0x455   : > { %s5975_s27 = smov %s4234_s30  ;;  %19 = sbr.rel (!%p17_p2) target bundleno = 3 (0x3), region = 86 }
 0x45a   :  { %3402 = vsyncpa [#allocation4], 1 }
 0x45b   :  { %3404 = vsyncpa [#allocation4 + $0x1], 1 }

</bundles_post_ra>
